<compile_context>
chip_gen: v7x
topology: tpu7x:2x2x1
jax: 0.10.0
libtpu: 0.0.40
codegen_flags: <defaults>
</compile_context>

<pallas_src>
import functools
import math

import jax
import jax.numpy as jnp
import numpy as np
from jax import lax
from jax.experimental import pallas as pl
from jax.experimental.pallas import tpu as pltpu


# ----------------------------------------------------------------------------
# Host-side heuristics (tiling / VMEM budgeting).
# ----------------------------------------------------------------------------
_PIPE_VMEM_BUDGET = 24 << 20  # conservative vs. v7x's 32 MiB default scoped VMEM


def _choose_batch_tile(B):
    # Split the batch across TensorCores (v7x megacore) when the tile stays a
    # multiple of 8 sublanes.
    if B >= 16 and B % 16 == 0:
        return B // 2
    return B


def _choose_time_chunk(T, BB, D, H, x_itemsize, out_itemsize, weight_bytes,
                       max_tt=64):
    """Pick the time-chunk length tt and (possibly padded) sequence length."""
    # Double-buffered per-timestep pipeline bytes (x in + hidden out).
    per_t = 2 * BB * (D * x_itemsize + H * out_itemsize)
    avail = max(_PIPE_VMEM_BUDGET - weight_bytes, per_t)
    cap = int(max(1, min(max_tt, avail // per_t, T)))
    divisors = [d for d in range(1, cap + 1) if T % d == 0]
    best_div = max(divisors)
    if best_div * 2 >= cap or best_div == T:
        return best_div, T                      # good divisor -> no padding
    tt = cap                                    # awkward T -> pad + mask tail
    return tt, ((T + tt - 1) // tt) * tt


def _choose_unroll(tt, BB, H):
    # Fully unroll small tiles (LLO visibility); partial unroll at production
    # sizes to avoid vreg spills (v5e has a single vector-store slot).
    if BB * H <= 16 * 1024:
        return True
    for u in (4, 2):
        if tt % u == 0:
            return u
    return 1


def _vmem_limit_bytes(tt, BB, D, H, x_itemsize, out_itemsize, weight_bytes):
    est = (2 * tt * BB * D * x_itemsize + 2 * tt * BB * H * out_itemsize
           + weight_bytes + BB * H * 4 + (2 << 20))
    if est <= 12 << 20:
        return None            # comfortably inside every generation's default
    # v7x has only 64 MiB physical VMEM per TensorCore; never request more.
    return int(min(est * 5 // 4, 60 << 20))


def _layer_dims(lw):
    whh = lw["w_hhT"]
    if whh.ndim == 2:                 # fused (H, 3H) layout (H % 128 == 0)
        return whh.shape[0], True
    return whh.shape[-1], False       # gate-major (3, H, H) layout


def _full_spec(arr):
    nd = arr.ndim
    return pl.BlockSpec(arr.shape, lambda b, tc: (0,) * nd)


# ----------------------------------------------------------------------------
# Kernel bodies.  Gate order follows PyTorch: (r, z, n).
# ----------------------------------------------------------------------------
def _gru_chunk(x_ref, wih_ref, bproj_ref, whh_ref, bhn_ref, h_ref, out_ref,
               *, tt, t_true, fused, masked, unroll):
    """Run tt timesteps of the GRU recurrence with h resident in VMEM.

    The input projection (x @ W_ih^T + b) is computed in-kernel per timestep:
    it does not depend on h, so when the loop is unrolled it overlaps with the
    previous step's recurrent matmul on an otherwise idle MXU.
    """
    H = h_ref.shape[-1]
    bhn = bhn_ref[...]                                   # (1, H) f32

    if fused:
        wih = wih_ref[...]                               # (D, 3H) bf16
        whh = whh_ref[...]                               # (H, 3H) bf16
        bproj = bproj_ref[...]                           # (1, 3H) f32
    else:
        wih_r, wih_z, wih_n = wih_ref[0], wih_ref[1], wih_ref[2]      # (D, H)
        whh_r, whh_z, whh_n = whh_ref[0], whh_ref[1], whh_ref[2]      # (H, H)
        bp_r, bp_z, bp_n = bproj_ref[0], bproj_ref[1], bproj_ref[2]   # (1, H)

    base = pl.program_id(1) * tt

    def step(i, carry):
        h = h_ref[...]                                   # (BB, H) f32
        xb = x_ref[i].astype(jnp.bfloat16)               # (BB, D) bf16 MXU operand
        hb = h.astype(jnp.bfloat16)
        if fused:
            # One wide GEMM per operand -> fills the 256-wide MXU on v6e/v7x;
            # lane slices below are 128-aligned because H % 128 == 0.
            gx = jnp.dot(xb, wih, preferred_element_type=jnp.float32) + bproj
            gh = jnp.dot(hb, whh, preferred_element_type=jnp.float32)
            gx_r, gx_z, gx_n = gx[:, :H], gx[:, H:2 * H], gx[:, 2 * H:]
            gh_r, gh_z, gh_n = gh[:, :H], gh[:, H:2 * H], gh[:, 2 * H:]
        else:
            gx_r = jnp.dot(xb, wih_r, preferred_element_type=jnp.float32) + bp_r
            gx_z = jnp.dot(xb, wih_z, preferred_element_type=jnp.float32) + bp_z
            gx_n = jnp.dot(xb, wih_n, preferred_element_type=jnp.float32) + bp_n
            gh_r = jnp.dot(hb, whh_r, preferred_element_type=jnp.float32)
            gh_z = jnp.dot(hb, whh_z, preferred_element_type=jnp.float32)
            gh_n = jnp.dot(hb, whh_n, preferred_element_type=jnp.float32)
        # b_ih + b_hh are pre-folded into gx_r / gx_z; b_hh_n stays inside r*().
        r = jax.nn.sigmoid(gx_r + gh_r)
        z = jax.nn.sigmoid(gx_z + gh_z)
        n = jnp.tanh(gx_n + r * (gh_n + bhn))
        h_new = (1.0 - z) * n + z * h
        if masked:                                       # static flag
            h_new = jnp.where(base + i < t_true, h_new, h)
        h_ref[...] = h_new
        if out_ref is not None:
            out_ref[i] = h_new.astype(out_ref.dtype)
        return carry

    lax.fori_loop(0, tt, step, 0, unroll=unroll)


def gru_seq_kernel(x_ref, wih_ref, bproj_ref, whh_ref, bhn_ref, out_ref, h_ref,
                   *, tt, t_true, fused, masked, unroll):
    @pl.when(pl.program_id(1) == 0)
    def _():
        h_ref[...] = jnp.zeros_like(h_ref)

    _gru_chunk(x_ref, wih_ref, bproj_ref, whh_ref, bhn_ref, h_ref, out_ref,
               tt=tt, t_true=t_true, fused=fused, masked=masked, unroll=unroll)


def gru_last_fc_kernel(x_ref, wih_ref, bproj_ref, whh_ref, bhn_ref,
                       fcw_ref, fcb_ref, out_ref, h_ref,
                       *, tt, t_true, fused, masked, unroll):
    tc = pl.program_id(1)

    @pl.when(tc == 0)
    def _():
        h_ref[...] = jnp.zeros_like(h_ref)

    _gru_chunk(x_ref, wih_ref, bproj_ref, whh_ref, bhn_ref, h_ref, None,
               tt=tt, t_true=t_true, fused=fused, masked=masked, unroll=unroll)

    # NOTE: the out BlockSpec index map ignores the time axis, so this (BB, O)
    # block stays VMEM-resident across all time chunks and is written exactly
    # once here.  The time axis MUST remain the innermost grid axis and MUST
    # stay "arbitrary" for this to hold.
    @pl.when(tc == pl.num_programs(1) - 1)
    def _():
        out_ref[...] = (jnp.dot(h_ref[...].astype(jnp.bfloat16), fcw_ref[...],
                                preferred_element_type=jnp.float32)
                        + fcb_ref[...]).astype(out_ref.dtype)


# ----------------------------------------------------------------------------
# Per-layer wrapper.
# ----------------------------------------------------------------------------
def gru_layer(x, lw, *, t_true, last=False, fc_wT=None, fc_b=None,
              seq_dtype=jnp.bfloat16, final_dtype=jnp.float32):
    """One GRU layer.  x: (T, B, D) sequence-major.

    last=False -> full hidden sequence (T_pad, B, H) in seq_dtype (bf16).
    last=True  -> fc(final hidden state): (B, O) in final_dtype.
    """
    T_in, B, D = x.shape
    H, fused = _layer_dims(lw)
    BB = _choose_batch_tile(B)
    NB = B // BB
    x_b = jnp.dtype(x.dtype).itemsize

    w_bytes = 2 * 2 * (lw["w_ihT"].size + lw["w_hhT"].size)   # bf16, double-buffered
    tt, T_pad = _choose_time_chunk(T_in, BB, D, H, x_b, 2, w_bytes)
    if T_pad != T_in:
        x = jnp.pad(x, ((0, T_pad - T_in), (0, 0), (0, 0)))
    NT = T_pad // tt
    masked = T_pad > t_true
    unroll = _choose_unroll(tt, BB, H)
    vmem_limit = _vmem_limit_bytes(tt, BB, D, H, x_b, 2, w_bytes)

    x_spec = pl.BlockSpec((tt, BB, D), lambda b, tc: (tc, b, 0))
    in_specs = [x_spec, _full_spec(lw["w_ihT"]), _full_spec(lw["b_proj"]),
                _full_spec(lw["w_hhT"]), _full_spec(lw["b_hh_n"])]
    operands = [x, lw["w_ihT"], lw["b_proj"], lw["w_hhT"], lw["b_hh_n"]]

    flops = 2 * T_pad * B * 3 * H * (D + H)
    trans = 3 * T_pad * B * H
    bytes_acc = x.size * x_b + 2 * (lw["w_ihT"].size + lw["w_hhT"].size)

    if last:
        O = fc_wT.shape[1]
        in_specs += [_full_spec(fc_wT), _full_spec(fc_b)]
        operands += [fc_wT, fc_b]
        kernel = functools.partial(gru_last_fc_kernel, tt=tt, t_true=t_true,
                                   fused=fused, masked=masked, unroll=unroll)
        out_shape = jax.ShapeDtypeStruct((B, O), final_dtype)
        out_spec = pl.BlockSpec((BB, O), lambda b, tc: (b, 0))
        flops += 2 * B * H * O
        bytes_acc += 2 * H * O + 4 * B * O
    else:
        kernel = functools.partial(gru_seq_kernel, tt=tt, t_true=t_true,
                                   fused=fused, masked=masked, unroll=unroll)
        out_shape = jax.ShapeDtypeStruct((T_pad, B, H), seq_dtype)
        out_spec = pl.BlockSpec((tt, BB, H), lambda b, tc: (tc, b, 0))
        bytes_acc += T_pad * B * H * 2

    cost = pl.CostEstimate(flops=int(flops), transcendentals=int(trans),
                           bytes_accessed=int(bytes_acc))

    return pl.pallas_call(
        kernel,
        out_shape=out_shape,
        grid_spec=pltpu.PrefetchScalarGridSpec(
            num_scalar_prefetch=0,
            # batch tiles on the "parallel" axis (megacore), time chunks
            # innermost and "arbitrary" (serial recurrence).
            grid=(NB, NT),
            in_specs=in_specs,
            out_specs=out_spec,
            scratch_shapes=[pltpu.VMEM((BB, H), jnp.float32)],
        ),
        compiler_params=pltpu.CompilerParams(
            dimension_semantics=("parallel", "arbitrary"),
            vmem_limit_bytes=vmem_limit),
        cost_estimate=cost,
    )(*operands)


# ----------------------------------------------------------------------------
# Full module forward (GRU stack + last-timestep Linear), bidirectional=False.
# ----------------------------------------------------------------------------
def gru_forward(X_btd, params):
    """X_btd: (B, T, D) batch_first, like PyTorch. Returns (B, output_size)."""
    x = jnp.transpose(X_btd, (1, 0, 2))           # (T, B, D) sequence-major
    T = x.shape[0]
    layers = params["layers"]
    n_layers = len(layers)
    out = None
    for li, lw in enumerate(layers):
        if li == n_layers - 1:
            out = gru_layer(x, lw, t_true=T, last=True,
                            fc_wT=params["fc_wT"],
                            fc_b=params["fc_b"].reshape(1, -1),
                            final_dtype=X_btd.dtype)
        else:
            x = gru_layer(x, lw, t_true=T, last=False)
    return out


# ----------------------------------------------------------------------------
# Parameter prep / init (PyTorch shapes; U(-1/sqrt(H), 1/sqrt(H)); gates r,z,n).
# ----------------------------------------------------------------------------
def prepare_gru_layer(w_ih, w_hh, b_ih, b_hh):
    """PyTorch layout: w_ih (3H, D), w_hh (3H, H), b_* (3H,)."""
    H = w_hh.shape[1]
    D = w_ih.shape[1]
    fused = (H % 128 == 0)   # lane-aligned gate slices only when H is 128-aligned
    # Fold b_ih into the projection; also fold b_hh for r/z (n keeps b_hh apart
    # because it is multiplied by r inside the recurrence).
    b_proj_flat = jnp.concatenate(
        [b_ih[:2 * H] + b_hh[:2 * H], b_ih[2 * H:]]).astype(jnp.float32)
    if fused:
        w_ihT = w_ih.T.astype(jnp.bfloat16)                              # (D, 3H)
        w_hhT = w_hh.T.astype(jnp.bfloat16)                              # (H, 3H)
        b_proj = b_proj_flat.reshape(1, 3 * H)
    else:
        w_ihT = jnp.transpose(w_ih.reshape(3, H, D), (0, 2, 1)).astype(jnp.bfloat16)  # (3, D, H)
        w_hhT = jnp.transpose(w_hh.reshape(3, H, H), (0, 2, 1)).astype(jnp.bfloat16)  # (3, H, H)
        b_proj = b_proj_flat.reshape(3, 1, H)
    b_hh_n = b_hh[2 * H:].reshape(1, H).astype(jnp.float32)
    return dict(w_ihT=w_ihT, w_hhT=w_hhT, b_proj=b_proj, b_hh_n=b_hh_n)


def init_params(key, input_size, hidden_dim, n_layers, output_size):
    k = 1.0 / math.sqrt(hidden_dim)
    layers, raw_layers = [], []
    for l in range(n_layers):
        d_in = input_size if l == 0 else hidden_dim
        key, k1, k2, k3, k4 = jax.random.split(key, 5)
        w_ih = jax.random.uniform(k1, (3 * hidden_dim, d_in), jnp.float32, -k, k)
        w_hh = jax.random.uniform(k2, (3 * hidden_dim, hidden_dim), jnp.float32, -k, k)
        b_ih = jax.random.uniform(k3, (3 * hidden_dim,), jnp.float32, -k, k)
        b_hh = jax.random.uniform(k4, (3 * hidden_dim,), jnp.float32, -k, k)
        raw_layers.append(dict(w_ih=w_ih, w_hh=w_hh, b_ih=b_ih, b_hh=b_hh))
        layers.append(prepare_gru_layer(w_ih, w_hh, b_ih, b_hh))
    key, k5, k6 = jax.random.split(key, 3)
    fc_w = jax.random.uniform(k5, (output_size, hidden_dim), jnp.float32, -k, k)
    fc_b = jax.random.uniform(k6, (output_size,), jnp.float32, -k, k)
    return dict(layers=layers, raw_layers=raw_layers,
                fc_wT=fc_w.T.astype(jnp.bfloat16), fc_w_raw=fc_w, fc_b=fc_b)


# ----------------------------------------------------------------------------
# References for verification.
# ----------------------------------------------------------------------------
def _ref_layer_weights(lw):
    H, fused = _layer_dims(lw)
    if fused:
        wih = [lw["w_ihT"][:, g * H:(g + 1) * H] for g in range(3)]
        whh = [lw["w_hhT"][:, g * H:(g + 1) * H] for g in range(3)]
        bp = [lw["b_proj"][:, g * H:(g + 1) * H] for g in range(3)]
    else:
        wih = [lw["w_ihT"][g] for g in range(3)]
        whh = [lw["w_hhT"][g] for g in range(3)]
        bp = [lw["b_proj"][g] for g in range(3)]
    return H, wih, whh, bp


def gru_forward_ref_bf16(X_btd, params):
    """Pure-JAX reference using the same bf16-operand / f32-accum math as the kernels."""
    x = jnp.transpose(X_btd, (1, 0, 2))
    h = None
    for lw in params["layers"]:
        T, B, _ = x.shape
        H, wih, whh, bp = _ref_layer_weights(lw)
        h = jnp.zeros((B, H), jnp.float32)
        outs = []
        for t in range(T):
            xb = x[t].astype(jnp.bfloat16)
            hb = h.astype(jnp.bfloat16)
            gx_r = jnp.dot(xb, wih[0], preferred_element_type=jnp.float32) + bp[0]
            gx_z = jnp.dot(xb, wih[1], preferred_element_type=jnp.float32) + bp[1]
            gx_n = jnp.dot(xb, wih[2], preferred_element_type=jnp.float32) + bp[2]
            gh_r = jnp.dot(hb, whh[0], preferred_element_type=jnp.float32)
            gh_z = jnp.dot(hb, whh[1], preferred_element_type=jnp.float32)
            gh_n = jnp.dot(hb, whh[2], preferred_element_type=jnp.float32)
            r = jax.nn.sigmoid(gx_r + gh_r)
            z = jax.nn.sigmoid(gx_z + gh_z)
            n = jnp.tanh(gx_n + r * (gh_n + lw["b_hh_n"]))
            h = (1.0 - z) * n + z * h
            outs.append(h)
        x = jnp.stack(outs, 0).astype(jnp.bfloat16)
    return (jnp.dot(h.astype(jnp.bfloat16), params["fc_wT"],
                    preferred_element_type=jnp.float32) + params["fc_b"])


def gru_forward_ref_f32(X_btd, params):
    """Pure-f32 reference matching PyTorch nn.GRU semantics exactly."""
    x = jnp.transpose(X_btd, (1, 0, 2))
    for lw in params["raw_layers"]:
        T, B, _ = x.shape
        H = lw["w_hh"].shape[1]
        h = jnp.zeros((B, H), jnp.float32)
        outs = []
        for t in range(T):
            gx = x[t] @ lw["w_ih"].T + lw["b_ih"]
            gh = h @ lw["w_hh"].T + lw["b_hh"]
            r = jax.nn.sigmoid(gx[:, :H] + gh[:, :H])
            z = jax.nn.sigmoid(gx[:, H:2 * H] + gh[:, H:2 * H])
            n = jnp.tanh(gx[:, 2 * H:] + r * gh[:, 2 * H:])
            h = (1.0 - z) * n + z * h
            outs.append(h)
        x = jnp.stack(outs, 0)
    return x[-1] @ params["fc_w_raw"].T + params["fc_b"]


if __name__ == "__main__":
    batch, seq, input_size = 2, 8, 16
    hidden_dim, n_layers, output_size = 32, 2, 4

    key = jax.random.PRNGKey(0)
    kx, kp = jax.random.split(key)
    X = jax.random.normal(kx, (batch, seq, input_size), jnp.float32)
    params = init_params(kp, input_size, hidden_dim, n_layers, output_size)

    out = jax.block_until_ready(jax.jit(gru_forward)(X, params))
    ref_b = jax.block_until_ready(gru_forward_ref_bf16(X, params))
    ref_f = jax.block_until_ready(gru_forward_ref_f32(X, params))

    err_b = float(jnp.max(jnp.abs(out - ref_b)))   # vs numerics-matched reference
    err_f = float(jnp.max(jnp.abs(out - ref_f)))   # vs pure-f32 PyTorch semantics
    ok = (out.shape == (batch, output_size) and np.isfinite(err_b)
          and np.isfinite(err_f) and err_b < 5e-3 and err_f < 5e-2)
    if not ok:
        raise RuntimeError(
            f"mismatch: shape={out.shape}, err_vs_bf16_ref={err_b}, err_vs_f32_ref={err_f}")
    print("KERNEL_OK")
</pallas_src>

<mosaic_0001>
module attributes {stable_mosaic.version = 11 : i64} {
  func.func @gru_last_fc_kernel(%arg0: i32, %arg1: i32, %arg2: memref<8x2x32xbf16, #tpu.memory_space<vmem>>, %arg3: memref<3x32x32xbf16, #tpu.memory_space<vmem>>, %arg4: memref<3x1x32xf32, #tpu.memory_space<vmem>>, %arg5: memref<3x32x32xbf16, #tpu.memory_space<vmem>>, %arg6: memref<1x32xf32, #tpu.memory_space<vmem>>, %arg7: memref<32x4xbf16, #tpu.memory_space<vmem>>, %arg8: memref<1x4xf32, #tpu.memory_space<vmem>>, %arg9: memref<2x4xf32, #tpu.memory_space<vmem>>, %arg10: memref<2x32xf32, #tpu.memory_space<vmem>>) attributes {dimension_semantics = [#tpu.dimension_semantics<parallel>, #tpu.dimension_semantics<arbitrary>], iteration_bounds = array<i64: 1, 1>, scalar_prefetch = 0 : i64, scratch_operands = 1 : i64, tpu.core_type = #tpu.core_type<tc>, window_params = [{transform_indices = @transform_0, window_bounds = array<i64: 8, 2, 32>}, {pipeline_mode = #tpu.pipeline_mode<synchronous>, transform_indices = @transform_1, window_bounds = array<i64: 3, 32, 32>}, {pipeline_mode = #tpu.pipeline_mode<synchronous>, transform_indices = @transform_2, window_bounds = array<i64: 3, 1, 32>}, {pipeline_mode = #tpu.pipeline_mode<synchronous>, transform_indices = @transform_3, window_bounds = array<i64: 3, 32, 32>}, {pipeline_mode = #tpu.pipeline_mode<synchronous>, transform_indices = @transform_4, window_bounds = array<i64: 1, 32>}, {pipeline_mode = #tpu.pipeline_mode<synchronous>, transform_indices = @transform_5, window_bounds = array<i64: 32, 4>}, {pipeline_mode = #tpu.pipeline_mode<synchronous>, transform_indices = @transform_6, window_bounds = array<i64: 1, 4>}, {transform_indices = @transform_7, window_bounds = array<i64: 2, 4>}]} {
    %c0_i32 = arith.constant 0 : i32
    %0 = arith.cmpi eq, %arg1, %c0_i32 : i32
    %1 = arith.extui %0 : i1 to i32
    %c0_i32_0 = arith.constant 0 : i32
    %2 = arith.cmpi ne, %1, %c0_i32_0 : i32
    scf.if %2 {
      %cst_149 = arith.constant 0.000000e+00 : f32
      %345 = vector.broadcast %cst_149 : f32 to vector<2x32xf32>
      %c0_150 = arith.constant 0 : index
      %c0_151 = arith.constant 0 : index
      %346 = vector.load %arg10[%c0_150, %c0_151] : memref<2x32xf32, #tpu.memory_space<vmem>>, vector<2x32xf32>
      tpu.vector_store %arg10[%c0_150, %c0_151], %345 {strides = array<i32>} : memref<2x32xf32, #tpu.memory_space<vmem>>, vector<2x32xf32>,
    } else {
    }
    %c0 = arith.constant 0 : index
    %c0_1 = arith.constant 0 : index
    %3 = vector.load %arg6[%c0, %c0_1] : memref<1x32xf32, #tpu.memory_space<vmem>>, vector<1x32xf32>
    %c0_2 = arith.constant 0 : index
    %c0_3 = arith.constant 0 : index
    %c0_4 = arith.constant 0 : index
    %4 = vector.load %arg3[%c0_2, %c0_3, %c0_4] : memref<3x32x32xbf16, #tpu.memory_space<vmem>>, vector<1x32x32xbf16>
    %5 = vector.shape_cast %4 : vector<1x32x32xbf16> to vector<32x32xbf16>
    %c1 = arith.constant 1 : index
    %c0_5 = arith.constant 0 : index
    %c0_6 = arith.constant 0 : index
    %6 = vector.load %arg3[%c1, %c0_5, %c0_6] : memref<3x32x32xbf16, #tpu.memory_space<vmem>>, vector<1x32x32xbf16>
    %7 = vector.shape_cast %6 : vector<1x32x32xbf16> to vector<32x32xbf16>
    %c2 = arith.constant 2 : index
    %c0_7 = arith.constant 0 : index
    %c0_8 = arith.constant 0 : index
    %8 = vector.load %arg3[%c2, %c0_7, %c0_8] : memref<3x32x32xbf16, #tpu.memory_space<vmem>>, vector<1x32x32xbf16>
    %9 = vector.shape_cast %8 : vector<1x32x32xbf16> to vector<32x32xbf16>
    %c0_9 = arith.constant 0 : index
    %c0_10 = arith.constant 0 : index
    %c0_11 = arith.constant 0 : index
    %10 = vector.load %arg5[%c0_9, %c0_10, %c0_11] : memref<3x32x32xbf16, #tpu.memory_space<vmem>>, vector<1x32x32xbf16>
    %11 = vector.shape_cast %10 : vector<1x32x32xbf16> to vector<32x32xbf16>
    %c1_12 = arith.constant 1 : index
    %c0_13 = arith.constant 0 : index
    %c0_14 = arith.constant 0 : index
    %12 = vector.load %arg5[%c1_12, %c0_13, %c0_14] : memref<3x32x32xbf16, #tpu.memory_space<vmem>>, vector<1x32x32xbf16>
    %13 = vector.shape_cast %12 : vector<1x32x32xbf16> to vector<32x32xbf16>
    %c2_15 = arith.constant 2 : index
    %c0_16 = arith.constant 0 : index
    %c0_17 = arith.constant 0 : index
    %14 = vector.load %arg5[%c2_15, %c0_16, %c0_17] : memref<3x32x32xbf16, #tpu.memory_space<vmem>>, vector<1x32x32xbf16>
    %15 = vector.shape_cast %14 : vector<1x32x32xbf16> to vector<32x32xbf16>
    %c0_18 = arith.constant 0 : index
    %c0_19 = arith.constant 0 : index
    %c0_20 = arith.constant 0 : index
    %16 = vector.load %arg4[%c0_18, %c0_19, %c0_20] : memref<3x1x32xf32, #tpu.memory_space<vmem>>, vector<1x1x32xf32>
    %17 = vector.shape_cast %16 : vector<1x1x32xf32> to vector<1x32xf32>
    %c1_21 = arith.constant 1 : index
    %c0_22 = arith.constant 0 : index
    %c0_23 = arith.constant 0 : index
    %18 = vector.load %arg4[%c1_21, %c0_22, %c0_23] : memref<3x1x32xf32, #tpu.memory_space<vmem>>, vector<1x1x32xf32>
    %19 = vector.shape_cast %18 : vector<1x1x32xf32> to vector<1x32xf32>
    %c2_24 = arith.constant 2 : index
    %c0_25 = arith.constant 0 : index
    %c0_26 = arith.constant 0 : index
    %20 = vector.load %arg4[%c2_24, %c0_25, %c0_26] : memref<3x1x32xf32, #tpu.memory_space<vmem>>, vector<1x1x32xf32>
    %21 = vector.shape_cast %20 : vector<1x1x32xf32> to vector<1x32xf32>
    %c0_i32_27 = arith.constant 0 : i32
    %c0_28 = arith.constant 0 : index
    %c0_29 = arith.constant 0 : index
    %22 = vector.load %arg10[%c0_28, %c0_29] : memref<2x32xf32, #tpu.memory_space<vmem>>, vector<2x32xf32>
    %23 = arith.index_cast %c0_i32_27 : i32 to index
    %c0_30 = arith.constant 0 : index
    %c0_31 = arith.constant 0 : index
    %24 = vector.load %arg2[%23, %c0_30, %c0_31] : memref<8x2x32xbf16, #tpu.memory_space<vmem>>, vector<1x2x32xbf16>
    %25 = vector.shape_cast %24 : vector<1x2x32xbf16> to vector<2x32xbf16>
    %26 = arith.truncf %22 : vector<2x32xf32> to vector<2x32xbf16>
    %cst = arith.constant dense<0.000000e+00> : vector<2x32xf32>
    %27 = tpu.matmul %25, %5, %cst {dimension_numbers = #tpu.dot_dimension_numbers<[1], [0], [0], [1], [0, 0, 1, 1], [], []>} : vector<2x32xbf16>, vector<32x32xbf16>, vector<2x32xf32> -> vector<2x32xf32>
    %28 = vector.broadcast %17 : vector<1x32xf32> to vector<2x32xf32>
    %29 = arith.addf %27, %28 : vector<2x32xf32>
    %cst_32 = arith.constant dense<0.000000e+00> : vector<2x32xf32>
    %30 = tpu.matmul %25, %7, %cst_32 {dimension_numbers = #tpu.dot_dimension_numbers<[1], [0], [0], [1], [0, 0, 1, 1], [], []>} : vector<2x32xbf16>, vector<32x32xbf16>, vector<2x32xf32> -> vector<2x32xf32>
    %31 = vector.broadcast %19 : vector<1x32xf32> to vector<2x32xf32>
    %32 = arith.addf %30, %31 : vector<2x32xf32>
    %cst_33 = arith.constant dense<0.000000e+00> : vector<2x32xf32>
    %33 = tpu.matmul %25, %9, %cst_33 {dimension_numbers = #tpu.dot_dimension_numbers<[1], [0], [0], [1], [0, 0, 1, 1], [], []>} : vector<2x32xbf16>, vector<32x32xbf16>, vector<2x32xf32> -> vector<2x32xf32>
    %34 = vector.broadcast %21 : vector<1x32xf32> to vector<2x32xf32>
    %35 = arith.addf %33, %34 : vector<2x32xf32>
    %cst_34 = arith.constant dense<0.000000e+00> : vector<2x32xf32>
    %36 = tpu.matmul %26, %11, %cst_34 {dimension_numbers = #tpu.dot_dimension_numbers<[1], [0], [0], [1], [0, 0, 1, 1], [], []>} : vector<2x32xbf16>, vector<32x32xbf16>, vector<2x32xf32> -> vector<2x32xf32>
    %cst_35 = arith.constant dense<0.000000e+00> : vector<2x32xf32>
    %37 = tpu.matmul %26, %13, %cst_35 {dimension_numbers = #tpu.dot_dimension_numbers<[1], [0], [0], [1], [0, 0, 1, 1], [], []>} : vector<2x32xbf16>, vector<32x32xbf16>, vector<2x32xf32> -> vector<2x32xf32>
    %cst_36 = arith.constant dense<0.000000e+00> : vector<2x32xf32>
    %38 = tpu.matmul %26, %15, %cst_36 {dimension_numbers = #tpu.dot_dimension_numbers<[1], [0], [0], [1], [0, 0, 1, 1], [], []>} : vector<2x32xbf16>, vector<32x32xbf16>, vector<2x32xf32> -> vector<2x32xf32>
    %39 = arith.addf %29, %36 : vector<2x32xf32>
    %40 = arith.negf %39 : vector<2x32xf32>
    %41 = math.exp %40 : vector<2x32xf32>
    %cst_37 = arith.constant 1.000000e+00 : f32
    %42 = vector.broadcast %cst_37 : f32 to vector<2x32xf32>
    %43 = arith.addf %42, %41 : vector<2x32xf32>
    %44 = arith.divf %42, %43 : vector<2x32xf32>
    %45 = arith.addf %32, %37 : vector<2x32xf32>
    %46 = arith.negf %45 : vector<2x32xf32>
    %47 = math.exp %46 : vector<2x32xf32>
    %cst_38 = arith.constant 1.000000e+00 : f32
    %48 = vector.broadcast %cst_38 : f32 to vector<2x32xf32>
    %49 = arith.addf %48, %47 : vector<2x32xf32>
    %50 = arith.divf %48, %49 : vector<2x32xf32>
    %51 = vector.broadcast %3 : vector<1x32xf32> to vector<2x32xf32>
    %52 = arith.addf %38, %51 : vector<2x32xf32>
    %53 = arith.mulf %44, %52 : vector<2x32xf32>
    %54 = arith.addf %35, %53 : vector<2x32xf32>
    %55 = math.tanh %54 : vector<2x32xf32>
    %cst_39 = arith.constant 1.000000e+00 : f32
    %56 = vector.broadcast %cst_39 : f32 to vector<2x32xf32>
    %57 = arith.subf %56, %50 : vector<2x32xf32>
    %58 = arith.mulf %57, %55 : vector<2x32xf32>
    %59 = arith.mulf %50, %22 : vector<2x32xf32>
    %60 = arith.addf %58, %59 : vector<2x32xf32>
    %c0_40 = arith.constant 0 : index
    %c0_41 = arith.constant 0 : index
    %61 = vector.load %arg10[%c0_40, %c0_41] : memref<2x32xf32, #tpu.memory_space<vmem>>, vector<2x32xf32>
    tpu.vector_store %arg10[%c0_40, %c0_41], %60 {strides = array<i32>} : memref<2x32xf32, #tpu.memory_space<vmem>>, vector<2x32xf32>,
    %c1_i32 = arith.constant 1 : i32
    %c0_42 = arith.constant 0 : index
    %c0_43 = arith.constant 0 : index
    %62 = vector.load %arg10[%c0_42, %c0_43] : memref<2x32xf32, #tpu.memory_space<vmem>>, vector<2x32xf32>
    %63 = arith.index_cast %c1_i32 : i32 to index
    %c0_44 = arith.constant 0 : index
    %c0_45 = arith.constant 0 : index
    %64 = vector.load %arg2[%63, %c0_44, %c0_45] : memref<8x2x32xbf16, #tpu.memory_space<vmem>>, vector<1x2x32xbf16>
    %65 = vector.shape_cast %64 : vector<1x2x32xbf16> to vector<2x32xbf16>
    %66 = arith.truncf %62 : vector<2x32xf32> to vector<2x32xbf16>
    %cst_46 = arith.constant dense<0.000000e+00> : vector<2x32xf32>
    %67 = tpu.matmul %65, %5, %cst_46 {dimension_numbers = #tpu.dot_dimension_numbers<[1], [0], [0], [1], [0, 0, 1, 1], [], []>} : vector<2x32xbf16>, vector<32x32xbf16>, vector<2x32xf32> -> vector<2x32xf32>
    %68 = vector.broadcast %17 : vector<1x32xf32> to vector<2x32xf32>
    %69 = arith.addf %67, %68 : vector<2x32xf32>
    %cst_47 = arith.constant dense<0.000000e+00> : vector<2x32xf32>
    %70 = tpu.matmul %65, %7, %cst_47 {dimension_numbers = #tpu.dot_dimension_numbers<[1], [0], [0], [1], [0, 0, 1, 1], [], []>} : vector<2x32xbf16>, vector<32x32xbf16>, vector<2x32xf32> -> vector<2x32xf32>
    %71 = vector.broadcast %19 : vector<1x32xf32> to vector<2x32xf32>
    %72 = arith.addf %70, %71 : vector<2x32xf32>
    %cst_48 = arith.constant dense<0.000000e+00> : vector<2x32xf32>
    %73 = tpu.matmul %65, %9, %cst_48 {dimension_numbers = #tpu.dot_dimension_numbers<[1], [0], [0], [1], [0, 0, 1, 1], [], []>} : vector<2x32xbf16>, vector<32x32xbf16>, vector<2x32xf32> -> vector<2x32xf32>
    %74 = vector.broadcast %21 : vector<1x32xf32> to vector<2x32xf32>
    %75 = arith.addf %73, %74 : vector<2x32xf32>
    %cst_49 = arith.constant dense<0.000000e+00> : vector<2x32xf32>
    %76 = tpu.matmul %66, %11, %cst_49 {dimension_numbers = #tpu.dot_dimension_numbers<[1], [0], [0], [1], [0, 0, 1, 1], [], []>} : vector<2x32xbf16>, vector<32x32xbf16>, vector<2x32xf32> -> vector<2x32xf32>
    %cst_50 = arith.constant dense<0.000000e+00> : vector<2x32xf32>
    %77 = tpu.matmul %66, %13, %cst_50 {dimension_numbers = #tpu.dot_dimension_numbers<[1], [0], [0], [1], [0, 0, 1, 1], [], []>} : vector<2x32xbf16>, vector<32x32xbf16>, vector<2x32xf32> -> vector<2x32xf32>
    %cst_51 = arith.constant dense<0.000000e+00> : vector<2x32xf32>
    %78 = tpu.matmul %66, %15, %cst_51 {dimension_numbers = #tpu.dot_dimension_numbers<[1], [0], [0], [1], [0, 0, 1, 1], [], []>} : vector<2x32xbf16>, vector<32x32xbf16>, vector<2x32xf32> -> vector<2x32xf32>
    %79 = arith.addf %69, %76 : vector<2x32xf32>
    %80 = arith.negf %79 : vector<2x32xf32>
    %81 = math.exp %80 : vector<2x32xf32>
    %cst_52 = arith.constant 1.000000e+00 : f32
    %82 = vector.broadcast %cst_52 : f32 to vector<2x32xf32>
    %83 = arith.addf %82, %81 : vector<2x32xf32>
    %84 = arith.divf %82, %83 : vector<2x32xf32>
    %85 = arith.addf %72, %77 : vector<2x32xf32>
    %86 = arith.negf %85 : vector<2x32xf32>
    %87 = math.exp %86 : vector<2x32xf32>
    %cst_53 = arith.constant 1.000000e+00 : f32
    %88 = vector.broadcast %cst_53 : f32 to vector<2x32xf32>
    %89 = arith.addf %88, %87 : vector<2x32xf32>
    %90 = arith.divf %88, %89 : vector<2x32xf32>
    %91 = vector.broadcast %3 : vector<1x32xf32> to vector<2x32xf32>
    %92 = arith.addf %78, %91 : vector<2x32xf32>
    %93 = arith.mulf %84, %92 : vector<2x32xf32>
    %94 = arith.addf %75, %93 : vector<2x32xf32>
    %95 = math.tanh %94 : vector<2x32xf32>
    %cst_54 = arith.constant 1.000000e+00 : f32
    %96 = vector.broadcast %cst_54 : f32 to vector<2x32xf32>
    %97 = arith.subf %96, %90 : vector<2x32xf32>
    %98 = arith.mulf %97, %95 : vector<2x32xf32>
    %99 = arith.mulf %90, %62 : vector<2x32xf32>
    %100 = arith.addf %98, %99 : vector<2x32xf32>
    %c0_55 = arith.constant 0 : index
    %c0_56 = arith.constant 0 : index
    %101 = vector.load %arg10[%c0_55, %c0_56] : memref<2x32xf32, #tpu.memory_space<vmem>>, vector<2x32xf32>
    tpu.vector_store %arg10[%c0_55, %c0_56], %100 {strides = array<i32>} : memref<2x32xf32, #tpu.memory_space<vmem>>, vector<2x32xf32>,
    %c2_i32 = arith.constant 2 : i32
    %c0_57 = arith.constant 0 : index
    %c0_58 = arith.constant 0 : index
    %102 = vector.load %arg10[%c0_57, %c0_58] : memref<2x32xf32, #tpu.memory_space<vmem>>, vector<2x32xf32>
    %103 = arith.index_cast %c2_i32 : i32 to index
    %c0_59 = arith.constant 0 : index
    %c0_60 = arith.constant 0 : index
    %104 = vector.load %arg2[%103, %c0_59, %c0_60] : memref<8x2x32xbf16, #tpu.memory_space<vmem>>, vector<1x2x32xbf16>
    %105 = vector.shape_cast %104 : vector<1x2x32xbf16> to vector<2x32xbf16>
    %106 = arith.truncf %102 : vector<2x32xf32> to vector<2x32xbf16>
    %cst_61 = arith.constant dense<0.000000e+00> : vector<2x32xf32>
    %107 = tpu.matmul %105, %5, %cst_61 {dimension_numbers = #tpu.dot_dimension_numbers<[1], [0], [0], [1], [0, 0, 1, 1], [], []>} : vector<2x32xbf16>, vector<32x32xbf16>, vector<2x32xf32> -> vector<2x32xf32>
    %108 = vector.broadcast %17 : vector<1x32xf32> to vector<2x32xf32>
    %109 = arith.addf %107, %108 : vector<2x32xf32>
    %cst_62 = arith.constant dense<0.000000e+00> : vector<2x32xf32>
    %110 = tpu.matmul %105, %7, %cst_62 {dimension_numbers = #tpu.dot_dimension_numbers<[1], [0], [0], [1], [0, 0, 1, 1], [], []>} : vector<2x32xbf16>, vector<32x32xbf16>, vector<2x32xf32> -> vector<2x32xf32>
    %111 = vector.broadcast %19 : vector<1x32xf32> to vector<2x32xf32>
    %112 = arith.addf %110, %111 : vector<2x32xf32>
    %cst_63 = arith.constant dense<0.000000e+00> : vector<2x32xf32>
    %113 = tpu.matmul %105, %9, %cst_63 {dimension_numbers = #tpu.dot_dimension_numbers<[1], [0], [0], [1], [0, 0, 1, 1], [], []>} : vector<2x32xbf16>, vector<32x32xbf16>, vector<2x32xf32> -> vector<2x32xf32>
    %114 = vector.broadcast %21 : vector<1x32xf32> to vector<2x32xf32>
    %115 = arith.addf %113, %114 : vector<2x32xf32>
    %cst_64 = arith.constant dense<0.000000e+00> : vector<2x32xf32>
    %116 = tpu.matmul %106, %11, %cst_64 {dimension_numbers = #tpu.dot_dimension_numbers<[1], [0], [0], [1], [0, 0, 1, 1], [], []>} : vector<2x32xbf16>, vector<32x32xbf16>, vector<2x32xf32> -> vector<2x32xf32>
    %cst_65 = arith.constant dense<0.000000e+00> : vector<2x32xf32>
    %117 = tpu.matmul %106, %13, %cst_65 {dimension_numbers = #tpu.dot_dimension_numbers<[1], [0], [0], [1], [0, 0, 1, 1], [], []>} : vector<2x32xbf16>, vector<32x32xbf16>, vector<2x32xf32> -> vector<2x32xf32>
    %cst_66 = arith.constant dense<0.000000e+00> : vector<2x32xf32>
    %118 = tpu.matmul %106, %15, %cst_66 {dimension_numbers = #tpu.dot_dimension_numbers<[1], [0], [0], [1], [0, 0, 1, 1], [], []>} : vector<2x32xbf16>, vector<32x32xbf16>, vector<2x32xf32> -> vector<2x32xf32>
    %119 = arith.addf %109, %116 : vector<2x32xf32>
    %120 = arith.negf %119 : vector<2x32xf32>
    %121 = math.exp %120 : vector<2x32xf32>
    %cst_67 = arith.constant 1.000000e+00 : f32
    %122 = vector.broadcast %cst_67 : f32 to vector<2x32xf32>
    %123 = arith.addf %122, %121 : vector<2x32xf32>
    %124 = arith.divf %122, %123 : vector<2x32xf32>
    %125 = arith.addf %112, %117 : vector<2x32xf32>
    %126 = arith.negf %125 : vector<2x32xf32>
    %127 = math.exp %126 : vector<2x32xf32>
    %cst_68 = arith.constant 1.000000e+00 : f32
    %128 = vector.broadcast %cst_68 : f32 to vector<2x32xf32>
    %129 = arith.addf %128, %127 : vector<2x32xf32>
    %130 = arith.divf %128, %129 : vector<2x32xf32>
    %131 = vector.broadcast %3 : vector<1x32xf32> to vector<2x32xf32>
    %132 = arith.addf %118, %131 : vector<2x32xf32>
    %133 = arith.mulf %124, %132 : vector<2x32xf32>
    %134 = arith.addf %115, %133 : vector<2x32xf32>
    %135 = math.tanh %134 : vector<2x32xf32>
    %cst_69 = arith.constant 1.000000e+00 : f32
    %136 = vector.broadcast %cst_69 : f32 to vector<2x32xf32>
    %137 = arith.subf %136, %130 : vector<2x32xf32>
    %138 = arith.mulf %137, %135 : vector<2x32xf32>
    %139 = arith.mulf %130, %102 : vector<2x32xf32>
    %140 = arith.addf %138, %139 : vector<2x32xf32>
    %c0_70 = arith.constant 0 : index
    %c0_71 = arith.constant 0 : index
    %141 = vector.load %arg10[%c0_70, %c0_71] : memref<2x32xf32, #tpu.memory_space<vmem>>, vector<2x32xf32>
    tpu.vector_store %arg10[%c0_70, %c0_71], %140 {strides = array<i32>} : memref<2x32xf32, #tpu.memory_space<vmem>>, vector<2x32xf32>,
    %c3_i32 = arith.constant 3 : i32
    %c0_72 = arith.constant 0 : index
    %c0_73 = arith.constant 0 : index
    %142 = vector.load %arg10[%c0_72, %c0_73] : memref<2x32xf32, #tpu.memory_space<vmem>>, vector<2x32xf32>
    %143 = arith.index_cast %c3_i32 : i32 to index
    %c0_74 = arith.constant 0 : index
    %c0_75 = arith.constant 0 : index
    %144 = vector.load %arg2[%143, %c0_74, %c0_75] : memref<8x2x32xbf16, #tpu.memory_space<vmem>>, vector<1x2x32xbf16>
    %145 = vector.shape_cast %144 : vector<1x2x32xbf16> to vector<2x32xbf16>
    %146 = arith.truncf %142 : vector<2x32xf32> to vector<2x32xbf16>
    %cst_76 = arith.constant dense<0.000000e+00> : vector<2x32xf32>
    %147 = tpu.matmul %145, %5, %cst_76 {dimension_numbers = #tpu.dot_dimension_numbers<[1], [0], [0], [1], [0, 0, 1, 1], [], []>} : vector<2x32xbf16>, vector<32x32xbf16>, vector<2x32xf32> -> vector<2x32xf32>
    %148 = vector.broadcast %17 : vector<1x32xf32> to vector<2x32xf32>
    %149 = arith.addf %147, %148 : vector<2x32xf32>
    %cst_77 = arith.constant dense<0.000000e+00> : vector<2x32xf32>
    %150 = tpu.matmul %145, %7, %cst_77 {dimension_numbers = #tpu.dot_dimension_numbers<[1], [0], [0], [1], [0, 0, 1, 1], [], []>} : vector<2x32xbf16>, vector<32x32xbf16>, vector<2x32xf32> -> vector<2x32xf32>
    %151 = vector.broadcast %19 : vector<1x32xf32> to vector<2x32xf32>
    %152 = arith.addf %150, %151 : vector<2x32xf32>
    %cst_78 = arith.constant dense<0.000000e+00> : vector<2x32xf32>
    %153 = tpu.matmul %145, %9, %cst_78 {dimension_numbers = #tpu.dot_dimension_numbers<[1], [0], [0], [1], [0, 0, 1, 1], [], []>} : vector<2x32xbf16>, vector<32x32xbf16>, vector<2x32xf32> -> vector<2x32xf32>
    %154 = vector.broadcast %21 : vector<1x32xf32> to vector<2x32xf32>
    %155 = arith.addf %153, %154 : vector<2x32xf32>
    %cst_79 = arith.constant dense<0.000000e+00> : vector<2x32xf32>
    %156 = tpu.matmul %146, %11, %cst_79 {dimension_numbers = #tpu.dot_dimension_numbers<[1], [0], [0], [1], [0, 0, 1, 1], [], []>} : vector<2x32xbf16>, vector<32x32xbf16>, vector<2x32xf32> -> vector<2x32xf32>
    %cst_80 = arith.constant dense<0.000000e+00> : vector<2x32xf32>
    %157 = tpu.matmul %146, %13, %cst_80 {dimension_numbers = #tpu.dot_dimension_numbers<[1], [0], [0], [1], [0, 0, 1, 1], [], []>} : vector<2x32xbf16>, vector<32x32xbf16>, vector<2x32xf32> -> vector<2x32xf32>
    %cst_81 = arith.constant dense<0.000000e+00> : vector<2x32xf32>
    %158 = tpu.matmul %146, %15, %cst_81 {dimension_numbers = #tpu.dot_dimension_numbers<[1], [0], [0], [1], [0, 0, 1, 1], [], []>} : vector<2x32xbf16>, vector<32x32xbf16>, vector<2x32xf32> -> vector<2x32xf32>
    %159 = arith.addf %149, %156 : vector<2x32xf32>
    %160 = arith.negf %159 : vector<2x32xf32>
    %161 = math.exp %160 : vector<2x32xf32>
    %cst_82 = arith.constant 1.000000e+00 : f32
    %162 = vector.broadcast %cst_82 : f32 to vector<2x32xf32>
    %163 = arith.addf %162, %161 : vector<2x32xf32>
    %164 = arith.divf %162, %163 : vector<2x32xf32>
    %165 = arith.addf %152, %157 : vector<2x32xf32>
    %166 = arith.negf %165 : vector<2x32xf32>
    %167 = math.exp %166 : vector<2x32xf32>
    %cst_83 = arith.constant 1.000000e+00 : f32
    %168 = vector.broadcast %cst_83 : f32 to vector<2x32xf32>
    %169 = arith.addf %168, %167 : vector<2x32xf32>
    %170 = arith.divf %168, %169 : vector<2x32xf32>
    %171 = vector.broadcast %3 : vector<1x32xf32> to vector<2x32xf32>
    %172 = arith.addf %158, %171 : vector<2x32xf32>
    %173 = arith.mulf %164, %172 : vector<2x32xf32>
    %174 = arith.addf %155, %173 : vector<2x32xf32>
    %175 = math.tanh %174 : vector<2x32xf32>
    %cst_84 = arith.constant 1.000000e+00 : f32
    %176 = vector.broadcast %cst_84 : f32 to vector<2x32xf32>
    %177 = arith.subf %176, %170 : vector<2x32xf32>
    %178 = arith.mulf %177, %175 : vector<2x32xf32>
    %179 = arith.mulf %170, %142 : vector<2x32xf32>
    %180 = arith.addf %178, %179 : vector<2x32xf32>
    %c0_85 = arith.constant 0 : index
    %c0_86 = arith.constant 0 : index
    %181 = vector.load %arg10[%c0_85, %c0_86] : memref<2x32xf32, #tpu.memory_space<vmem>>, vector<2x32xf32>
    tpu.vector_store %arg10[%c0_85, %c0_86], %180 {strides = array<i32>} : memref<2x32xf32, #tpu.memory_space<vmem>>, vector<2x32xf32>,
    %c4_i32 = arith.constant 4 : i32
    %c0_87 = arith.constant 0 : index
    %c0_88 = arith.constant 0 : index
    %182 = vector.load %arg10[%c0_87, %c0_88] : memref<2x32xf32, #tpu.memory_space<vmem>>, vector<2x32xf32>
    %183 = arith.index_cast %c4_i32 : i32 to index
    %c0_89 = arith.constant 0 : index
    %c0_90 = arith.constant 0 : index
    %184 = vector.load %arg2[%183, %c0_89, %c0_90] : memref<8x2x32xbf16, #tpu.memory_space<vmem>>, vector<1x2x32xbf16>
    %185 = vector.shape_cast %184 : vector<1x2x32xbf16> to vector<2x32xbf16>
    %186 = arith.truncf %182 : vector<2x32xf32> to vector<2x32xbf16>
    %cst_91 = arith.constant dense<0.000000e+00> : vector<2x32xf32>
    %187 = tpu.matmul %185, %5, %cst_91 {dimension_numbers = #tpu.dot_dimension_numbers<[1], [0], [0], [1], [0, 0, 1, 1], [], []>} : vector<2x32xbf16>, vector<32x32xbf16>, vector<2x32xf32> -> vector<2x32xf32>
    %188 = vector.broadcast %17 : vector<1x32xf32> to vector<2x32xf32>
    %189 = arith.addf %187, %188 : vector<2x32xf32>
    %cst_92 = arith.constant dense<0.000000e+00> : vector<2x32xf32>
    %190 = tpu.matmul %185, %7, %cst_92 {dimension_numbers = #tpu.dot_dimension_numbers<[1], [0], [0], [1], [0, 0, 1, 1], [], []>} : vector<2x32xbf16>, vector<32x32xbf16>, vector<2x32xf32> -> vector<2x32xf32>
    %191 = vector.broadcast %19 : vector<1x32xf32> to vector<2x32xf32>
    %192 = arith.addf %190, %191 : vector<2x32xf32>
    %cst_93 = arith.constant dense<0.000000e+00> : vector<2x32xf32>
    %193 = tpu.matmul %185, %9, %cst_93 {dimension_numbers = #tpu.dot_dimension_numbers<[1], [0], [0], [1], [0, 0, 1, 1], [], []>} : vector<2x32xbf16>, vector<32x32xbf16>, vector<2x32xf32> -> vector<2x32xf32>
    %194 = vector.broadcast %21 : vector<1x32xf32> to vector<2x32xf32>
    %195 = arith.addf %193, %194 : vector<2x32xf32>
    %cst_94 = arith.constant dense<0.000000e+00> : vector<2x32xf32>
    %196 = tpu.matmul %186, %11, %cst_94 {dimension_numbers = #tpu.dot_dimension_numbers<[1], [0], [0], [1], [0, 0, 1, 1], [], []>} : vector<2x32xbf16>, vector<32x32xbf16>, vector<2x32xf32> -> vector<2x32xf32>
    %cst_95 = arith.constant dense<0.000000e+00> : vector<2x32xf32>
    %197 = tpu.matmul %186, %13, %cst_95 {dimension_numbers = #tpu.dot_dimension_numbers<[1], [0], [0], [1], [0, 0, 1, 1], [], []>} : vector<2x32xbf16>, vector<32x32xbf16>, vector<2x32xf32> -> vector<2x32xf32>
    %cst_96 = arith.constant dense<0.000000e+00> : vector<2x32xf32>
    %198 = tpu.matmul %186, %15, %cst_96 {dimension_numbers = #tpu.dot_dimension_numbers<[1], [0], [0], [1], [0, 0, 1, 1], [], []>} : vector<2x32xbf16>, vector<32x32xbf16>, vector<2x32xf32> -> vector<2x32xf32>
    %199 = arith.addf %189, %196 : vector<2x32xf32>
    %200 = arith.negf %199 : vector<2x32xf32>
    %201 = math.exp %200 : vector<2x32xf32>
    %cst_97 = arith.constant 1.000000e+00 : f32
    %202 = vector.broadcast %cst_97 : f32 to vector<2x32xf32>
    %203 = arith.addf %202, %201 : vector<2x32xf32>
    %204 = arith.divf %202, %203 : vector<2x32xf32>
    %205 = arith.addf %192, %197 : vector<2x32xf32>
    %206 = arith.negf %205 : vector<2x32xf32>
    %207 = math.exp %206 : vector<2x32xf32>
    %cst_98 = arith.constant 1.000000e+00 : f32
    %208 = vector.broadcast %cst_98 : f32 to vector<2x32xf32>
    %209 = arith.addf %208, %207 : vector<2x32xf32>
    %210 = arith.divf %208, %209 : vector<2x32xf32>
    %211 = vector.broadcast %3 : vector<1x32xf32> to vector<2x32xf32>
    %212 = arith.addf %198, %211 : vector<2x32xf32>
    %213 = arith.mulf %204, %212 : vector<2x32xf32>
    %214 = arith.addf %195, %213 : vector<2x32xf32>
    %215 = math.tanh %214 : vector<2x32xf32>
    %cst_99 = arith.constant 1.000000e+00 : f32
    %216 = vector.broadcast %cst_99 : f32 to vector<2x32xf32>
    %217 = arith.subf %216, %210 : vector<2x32xf32>
    %218 = arith.mulf %217, %215 : vector<2x32xf32>
    %219 = arith.mulf %210, %182 : vector<2x32xf32>
    %220 = arith.addf %218, %219 : vector<2x32xf32>
    %c0_100 = arith.constant 0 : index
    %c0_101 = arith.constant 0 : index
    %221 = vector.load %arg10[%c0_100, %c0_101] : memref<2x32xf32, #tpu.memory_space<vmem>>, vector<2x32xf32>
    tpu.vector_store %arg10[%c0_100, %c0_101], %220 {strides = array<i32>} : memref<2x32xf32, #tpu.memory_space<vmem>>, vector<2x32xf32>,
    %c5_i32 = arith.constant 5 : i32
    %c0_102 = arith.constant 0 : index
    %c0_103 = arith.constant 0 : index
    %222 = vector.load %arg10[%c0_102, %c0_103] : memref<2x32xf32, #tpu.memory_space<vmem>>, vector<2x32xf32>
    %223 = arith.index_cast %c5_i32 : i32 to index
    %c0_104 = arith.constant 0 : index
    %c0_105 = arith.constant 0 : index
    %224 = vector.load %arg2[%223, %c0_104, %c0_105] : memref<8x2x32xbf16, #tpu.memory_space<vmem>>, vector<1x2x32xbf16>
    %225 = vector.shape_cast %224 : vector<1x2x32xbf16> to vector<2x32xbf16>
    %226 = arith.truncf %222 : vector<2x32xf32> to vector<2x32xbf16>
    %cst_106 = arith.constant dense<0.000000e+00> : vector<2x32xf32>
    %227 = tpu.matmul %225, %5, %cst_106 {dimension_numbers = #tpu.dot_dimension_numbers<[1], [0], [0], [1], [0, 0, 1, 1], [], []>} : vector<2x32xbf16>, vector<32x32xbf16>, vector<2x32xf32> -> vector<2x32xf32>
    %228 = vector.broadcast %17 : vector<1x32xf32> to vector<2x32xf32>
    %229 = arith.addf %227, %228 : vector<2x32xf32>
    %cst_107 = arith.constant dense<0.000000e+00> : vector<2x32xf32>
    %230 = tpu.matmul %225, %7, %cst_107 {dimension_numbers = #tpu.dot_dimension_numbers<[1], [0], [0], [1], [0, 0, 1, 1], [], []>} : vector<2x32xbf16>, vector<32x32xbf16>, vector<2x32xf32> -> vector<2x32xf32>
    %231 = vector.broadcast %19 : vector<1x32xf32> to vector<2x32xf32>
    %232 = arith.addf %230, %231 : vector<2x32xf32>
    %cst_108 = arith.constant dense<0.000000e+00> : vector<2x32xf32>
    %233 = tpu.matmul %225, %9, %cst_108 {dimension_numbers = #tpu.dot_dimension_numbers<[1], [0], [0], [1], [0, 0, 1, 1], [], []>} : vector<2x32xbf16>, vector<32x32xbf16>, vector<2x32xf32> -> vector<2x32xf32>
    %234 = vector.broadcast %21 : vector<1x32xf32> to vector<2x32xf32>
    %235 = arith.addf %233, %234 : vector<2x32xf32>
    %cst_109 = arith.constant dense<0.000000e+00> : vector<2x32xf32>
    %236 = tpu.matmul %226, %11, %cst_109 {dimension_numbers = #tpu.dot_dimension_numbers<[1], [0], [0], [1], [0, 0, 1, 1], [], []>} : vector<2x32xbf16>, vector<32x32xbf16>, vector<2x32xf32> -> vector<2x32xf32>
    %cst_110 = arith.constant dense<0.000000e+00> : vector<2x32xf32>
    %237 = tpu.matmul %226, %13, %cst_110 {dimension_numbers = #tpu.dot_dimension_numbers<[1], [0], [0], [1], [0, 0, 1, 1], [], []>} : vector<2x32xbf16>, vector<32x32xbf16>, vector<2x32xf32> -> vector<2x32xf32>
    %cst_111 = arith.constant dense<0.000000e+00> : vector<2x32xf32>
    %238 = tpu.matmul %226, %15, %cst_111 {dimension_numbers = #tpu.dot_dimension_numbers<[1], [0], [0], [1], [0, 0, 1, 1], [], []>} : vector<2x32xbf16>, vector<32x32xbf16>, vector<2x32xf32> -> vector<2x32xf32>
    %239 = arith.addf %229, %236 : vector<2x32xf32>
    %240 = arith.negf %239 : vector<2x32xf32>
    %241 = math.exp %240 : vector<2x32xf32>
    %cst_112 = arith.constant 1.000000e+00 : f32
    %242 = vector.broadcast %cst_112 : f32 to vector<2x32xf32>
    %243 = arith.addf %242, %241 : vector<2x32xf32>
    %244 = arith.divf %242, %243 : vector<2x32xf32>
    %245 = arith.addf %232, %237 : vector<2x32xf32>
    %246 = arith.negf %245 : vector<2x32xf32>
    %247 = math.exp %246 : vector<2x32xf32>
    %cst_113 = arith.constant 1.000000e+00 : f32
    %248 = vector.broadcast %cst_113 : f32 to vector<2x32xf32>
    %249 = arith.addf %248, %247 : vector<2x32xf32>
    %250 = arith.divf %248, %249 : vector<2x32xf32>
    %251 = vector.broadcast %3 : vector<1x32xf32> to vector<2x32xf32>
    %252 = arith.addf %238, %251 : vector<2x32xf32>
    %253 = arith.mulf %244, %252 : vector<2x32xf32>
    %254 = arith.addf %235, %253 : vector<2x32xf32>
    %255 = math.tanh %254 : vector<2x32xf32>
    %cst_114 = arith.constant 1.000000e+00 : f32
    %256 = vector.broadcast %cst_114 : f32 to vector<2x32xf32>
    %257 = arith.subf %256, %250 : vector<2x32xf32>
    %258 = arith.mulf %257, %255 : vector<2x32xf32>
    %259 = arith.mulf %250, %222 : vector<2x32xf32>
    %260 = arith.addf %258, %259 : vector<2x32xf32>
    %c0_115 = arith.constant 0 : index
    %c0_116 = arith.constant 0 : index
    %261 = vector.load %arg10[%c0_115, %c0_116] : memref<2x32xf32, #tpu.memory_space<vmem>>, vector<2x32xf32>
    tpu.vector_store %arg10[%c0_115, %c0_116], %260 {strides = array<i32>} : memref<2x32xf32, #tpu.memory_space<vmem>>, vector<2x32xf32>,
    %c6_i32 = arith.constant 6 : i32
    %c0_117 = arith.constant 0 : index
    %c0_118 = arith.constant 0 : index
    %262 = vector.load %arg10[%c0_117, %c0_118] : memref<2x32xf32, #tpu.memory_space<vmem>>, vector<2x32xf32>
    %263 = arith.index_cast %c6_i32 : i32 to index
    %c0_119 = arith.constant 0 : index
    %c0_120 = arith.constant 0 : index
    %264 = vector.load %arg2[%263, %c0_119, %c0_120] : memref<8x2x32xbf16, #tpu.memory_space<vmem>>, vector<1x2x32xbf16>
    %265 = vector.shape_cast %264 : vector<1x2x32xbf16> to vector<2x32xbf16>
    %266 = arith.truncf %262 : vector<2x32xf32> to vector<2x32xbf16>
    %cst_121 = arith.constant dense<0.000000e+00> : vector<2x32xf32>
    %267 = tpu.matmul %265, %5, %cst_121 {dimension_numbers = #tpu.dot_dimension_numbers<[1], [0], [0], [1], [0, 0, 1, 1], [], []>} : vector<2x32xbf16>, vector<32x32xbf16>, vector<2x32xf32> -> vector<2x32xf32>
    %268 = vector.broadcast %17 : vector<1x32xf32> to vector<2x32xf32>
    %269 = arith.addf %267, %268 : vector<2x32xf32>
    %cst_122 = arith.constant dense<0.000000e+00> : vector<2x32xf32>
    %270 = tpu.matmul %265, %7, %cst_122 {dimension_numbers = #tpu.dot_dimension_numbers<[1], [0], [0], [1], [0, 0, 1, 1], [], []>} : vector<2x32xbf16>, vector<32x32xbf16>, vector<2x32xf32> -> vector<2x32xf32>
    %271 = vector.broadcast %19 : vector<1x32xf32> to vector<2x32xf32>
    %272 = arith.addf %270, %271 : vector<2x32xf32>
    %cst_123 = arith.constant dense<0.000000e+00> : vector<2x32xf32>
    %273 = tpu.matmul %265, %9, %cst_123 {dimension_numbers = #tpu.dot_dimension_numbers<[1], [0], [0], [1], [0, 0, 1, 1], [], []>} : vector<2x32xbf16>, vector<32x32xbf16>, vector<2x32xf32> -> vector<2x32xf32>
    %274 = vector.broadcast %21 : vector<1x32xf32> to vector<2x32xf32>
    %275 = arith.addf %273, %274 : vector<2x32xf32>
    %cst_124 = arith.constant dense<0.000000e+00> : vector<2x32xf32>
    %276 = tpu.matmul %266, %11, %cst_124 {dimension_numbers = #tpu.dot_dimension_numbers<[1], [0], [0], [1], [0, 0, 1, 1], [], []>} : vector<2x32xbf16>, vector<32x32xbf16>, vector<2x32xf32> -> vector<2x32xf32>
    %cst_125 = arith.constant dense<0.000000e+00> : vector<2x32xf32>
    %277 = tpu.matmul %266, %13, %cst_125 {dimension_numbers = #tpu.dot_dimension_numbers<[1], [0], [0], [1], [0, 0, 1, 1], [], []>} : vector<2x32xbf16>, vector<32x32xbf16>, vector<2x32xf32> -> vector<2x32xf32>
    %cst_126 = arith.constant dense<0.000000e+00> : vector<2x32xf32>
    %278 = tpu.matmul %266, %15, %cst_126 {dimension_numbers = #tpu.dot_dimension_numbers<[1], [0], [0], [1], [0, 0, 1, 1], [], []>} : vector<2x32xbf16>, vector<32x32xbf16>, vector<2x32xf32> -> vector<2x32xf32>
    %279 = arith.addf %269, %276 : vector<2x32xf32>
    %280 = arith.negf %279 : vector<2x32xf32>
    %281 = math.exp %280 : vector<2x32xf32>
    %cst_127 = arith.constant 1.000000e+00 : f32
    %282 = vector.broadcast %cst_127 : f32 to vector<2x32xf32>
    %283 = arith.addf %282, %281 : vector<2x32xf32>
    %284 = arith.divf %282, %283 : vector<2x32xf32>
    %285 = arith.addf %272, %277 : vector<2x32xf32>
    %286 = arith.negf %285 : vector<2x32xf32>
    %287 = math.exp %286 : vector<2x32xf32>
    %cst_128 = arith.constant 1.000000e+00 : f32
    %288 = vector.broadcast %cst_128 : f32 to vector<2x32xf32>
    %289 = arith.addf %288, %287 : vector<2x32xf32>
    %290 = arith.divf %288, %289 : vector<2x32xf32>
    %291 = vector.broadcast %3 : vector<1x32xf32> to vector<2x32xf32>
    %292 = arith.addf %278, %291 : vector<2x32xf32>
    %293 = arith.mulf %284, %292 : vector<2x32xf32>
    %294 = arith.addf %275, %293 : vector<2x32xf32>
    %295 = math.tanh %294 : vector<2x32xf32>
    %cst_129 = arith.constant 1.000000e+00 : f32
    %296 = vector.broadcast %cst_129 : f32 to vector<2x32xf32>
    %297 = arith.subf %296, %290 : vector<2x32xf32>
    %298 = arith.mulf %297, %295 : vector<2x32xf32>
    %299 = arith.mulf %290, %262 : vector<2x32xf32>
    %300 = arith.addf %298, %299 : vector<2x32xf32>
    %c0_130 = arith.constant 0 : index
    %c0_131 = arith.constant 0 : index
    %301 = vector.load %arg10[%c0_130, %c0_131] : memref<2x32xf32, #tpu.memory_space<vmem>>, vector<2x32xf32>
    tpu.vector_store %arg10[%c0_130, %c0_131], %300 {strides = array<i32>} : memref<2x32xf32, #tpu.memory_space<vmem>>, vector<2x32xf32>,
    %c7_i32 = arith.constant 7 : i32
    %c0_132 = arith.constant 0 : index
    %c0_133 = arith.constant 0 : index
    %302 = vector.load %arg10[%c0_132, %c0_133] : memref<2x32xf32, #tpu.memory_space<vmem>>, vector<2x32xf32>
    %303 = arith.index_cast %c7_i32 : i32 to index
    %c0_134 = arith.constant 0 : index
    %c0_135 = arith.constant 0 : index
    %304 = vector.load %arg2[%303, %c0_134, %c0_135] : memref<8x2x32xbf16, #tpu.memory_space<vmem>>, vector<1x2x32xbf16>
    %305 = vector.shape_cast %304 : vector<1x2x32xbf16> to vector<2x32xbf16>
    %306 = arith.truncf %302 : vector<2x32xf32> to vector<2x32xbf16>
    %cst_136 = arith.constant dense<0.000000e+00> : vector<2x32xf32>
    %307 = tpu.matmul %305, %5, %cst_136 {dimension_numbers = #tpu.dot_dimension_numbers<[1], [0], [0], [1], [0, 0, 1, 1], [], []>} : vector<2x32xbf16>, vector<32x32xbf16>, vector<2x32xf32> -> vector<2x32xf32>
    %308 = vector.broadcast %17 : vector<1x32xf32> to vector<2x32xf32>
    %309 = arith.addf %307, %308 : vector<2x32xf32>
    %cst_137 = arith.constant dense<0.000000e+00> : vector<2x32xf32>
    %310 = tpu.matmul %305, %7, %cst_137 {dimension_numbers = #tpu.dot_dimension_numbers<[1], [0], [0], [1], [0, 0, 1, 1], [], []>} : vector<2x32xbf16>, vector<32x32xbf16>, vector<2x32xf32> -> vector<2x32xf32>
    %311 = vector.broadcast %19 : vector<1x32xf32> to vector<2x32xf32>
    %312 = arith.addf %310, %311 : vector<2x32xf32>
    %cst_138 = arith.constant dense<0.000000e+00> : vector<2x32xf32>
    %313 = tpu.matmul %305, %9, %cst_138 {dimension_numbers = #tpu.dot_dimension_numbers<[1], [0], [0], [1], [0, 0, 1, 1], [], []>} : vector<2x32xbf16>, vector<32x32xbf16>, vector<2x32xf32> -> vector<2x32xf32>
    %314 = vector.broadcast %21 : vector<1x32xf32> to vector<2x32xf32>
    %315 = arith.addf %313, %314 : vector<2x32xf32>
    %cst_139 = arith.constant dense<0.000000e+00> : vector<2x32xf32>
    %316 = tpu.matmul %306, %11, %cst_139 {dimension_numbers = #tpu.dot_dimension_numbers<[1], [0], [0], [1], [0, 0, 1, 1], [], []>} : vector<2x32xbf16>, vector<32x32xbf16>, vector<2x32xf32> -> vector<2x32xf32>
    %cst_140 = arith.constant dense<0.000000e+00> : vector<2x32xf32>
    %317 = tpu.matmul %306, %13, %cst_140 {dimension_numbers = #tpu.dot_dimension_numbers<[1], [0], [0], [1], [0, 0, 1, 1], [], []>} : vector<2x32xbf16>, vector<32x32xbf16>, vector<2x32xf32> -> vector<2x32xf32>
    %cst_141 = arith.constant dense<0.000000e+00> : vector<2x32xf32>
    %318 = tpu.matmul %306, %15, %cst_141 {dimension_numbers = #tpu.dot_dimension_numbers<[1], [0], [0], [1], [0, 0, 1, 1], [], []>} : vector<2x32xbf16>, vector<32x32xbf16>, vector<2x32xf32> -> vector<2x32xf32>
    %319 = arith.addf %309, %316 : vector<2x32xf32>
    %320 = arith.negf %319 : vector<2x32xf32>
    %321 = math.exp %320 : vector<2x32xf32>
    %cst_142 = arith.constant 1.000000e+00 : f32
    %322 = vector.broadcast %cst_142 : f32 to vector<2x32xf32>
    %323 = arith.addf %322, %321 : vector<2x32xf32>
    %324 = arith.divf %322, %323 : vector<2x32xf32>
    %325 = arith.addf %312, %317 : vector<2x32xf32>
    %326 = arith.negf %325 : vector<2x32xf32>
    %327 = math.exp %326 : vector<2x32xf32>
    %cst_143 = arith.constant 1.000000e+00 : f32
    %328 = vector.broadcast %cst_143 : f32 to vector<2x32xf32>
    %329 = arith.addf %328, %327 : vector<2x32xf32>
    %330 = arith.divf %328, %329 : vector<2x32xf32>
    %331 = vector.broadcast %3 : vector<1x32xf32> to vector<2x32xf32>
    %332 = arith.addf %318, %331 : vector<2x32xf32>
    %333 = arith.mulf %324, %332 : vector<2x32xf32>
    %334 = arith.addf %315, %333 : vector<2x32xf32>
    %335 = math.tanh %334 : vector<2x32xf32>
    %cst_144 = arith.constant 1.000000e+00 : f32
    %336 = vector.broadcast %cst_144 : f32 to vector<2x32xf32>
    %337 = arith.subf %336, %330 : vector<2x32xf32>
    %338 = arith.mulf %337, %335 : vector<2x32xf32>
    %339 = arith.mulf %330, %302 : vector<2x32xf32>
    %340 = arith.addf %338, %339 : vector<2x32xf32>
    %c0_145 = arith.constant 0 : index
    %c0_146 = arith.constant 0 : index
    %341 = vector.load %arg10[%c0_145, %c0_146] : memref<2x32xf32, #tpu.memory_space<vmem>>, vector<2x32xf32>
    tpu.vector_store %arg10[%c0_145, %c0_146], %340 {strides = array<i32>} : memref<2x32xf32, #tpu.memory_space<vmem>>, vector<2x32xf32>,
    %c8_i32 = arith.constant 8 : i32
    %c0_i32_147 = arith.constant 0 : i32
    %342 = arith.cmpi eq, %arg1, %c0_i32_147 : i32
    %343 = arith.extui %342 : i1 to i32
    %c0_i32_148 = arith.constant 0 : i32
    %344 = arith.cmpi ne, %343, %c0_i32_148 : i32
    scf.if %344 {
      %c0_149 = arith.constant 0 : index
      %c0_150 = arith.constant 0 : index
      %345 = vector.load %arg10[%c0_149, %c0_150] : memref<2x32xf32, #tpu.memory_space<vmem>>, vector<2x32xf32>
      %346 = arith.truncf %345 : vector<2x32xf32> to vector<2x32xbf16>
      %c0_151 = arith.constant 0 : index
      %c0_152 = arith.constant 0 : index
      %347 = vector.load %arg7[%c0_151, %c0_152] : memref<32x4xbf16, #tpu.memory_space<vmem>>, vector<32x4xbf16>
      %cst_153 = arith.constant dense<0.000000e+00> : vector<2x4xf32>
      %348 = tpu.matmul %346, %347, %cst_153 {dimension_numbers = #tpu.dot_dimension_numbers<[1], [0], [0], [1], [0, 0, 1, 1], [], []>} : vector<2x32xbf16>, vector<32x4xbf16>, vector<2x4xf32> -> vector<2x4xf32>
      %c0_154 = arith.constant 0 : index
      %c0_155 = arith.constant 0 : index
      %349 = vector.load %arg8[%c0_154, %c0_155] : memref<1x4xf32, #tpu.memory_space<vmem>>, vector<1x4xf32>
      %350 = vector.broadcast %349 : vector<1x4xf32> to vector<2x4xf32>
      %351 = arith.addf %348, %350 : vector<2x4xf32>
      %c0_156 = arith.constant 0 : index
      %c0_157 = arith.constant 0 : index
      %352 = vector.load %arg9[%c0_156, %c0_157] : memref<2x4xf32, #tpu.memory_space<vmem>>, vector<2x4xf32>
      tpu.vector_store %arg9[%c0_156, %c0_157], %351 {strides = array<i32>} : memref<2x4xf32, #tpu.memory_space<vmem>>, vector<2x4xf32>,
    } else {
    }
    return
  }
  func.func @transform_0(%arg0: i32, %arg1: i32) -> (i32, i32, i32) {
    %c0_i32 = arith.constant 0 : i32
    %c0_i32_0 = arith.constant 0 : i32
    return %arg1, %arg0, %c0_i32 : i32, i32, i32
  }
  func.func @transform_1(%arg0: i32, %arg1: i32) -> (i32, i32, i32) {
    %c0_i32 = arith.constant 0 : i32
    %c0_i32_0 = arith.constant 0 : i32
    %c0_i32_1 = arith.constant 0 : i32
    %c0_i32_2 = arith.constant 0 : i32
    return %c0_i32, %c0_i32_0, %c0_i32_1 : i32, i32, i32
  }
  func.func @transform_2(%arg0: i32, %arg1: i32) -> (i32, i32, i32) {
    %c0_i32 = arith.constant 0 : i32
    %c0_i32_0 = arith.constant 0 : i32
    %c0_i32_1 = arith.constant 0 : i32
    %c0_i32_2 = arith.constant 0 : i32
    return %c0_i32, %c0_i32_0, %c0_i32_1 : i32, i32, i32
  }
  func.func @transform_3(%arg0: i32, %arg1: i32) -> (i32, i32, i32) {
    %c0_i32 = arith.constant 0 : i32
    %c0_i32_0 = arith.constant 0 : i32
    %c0_i32_1 = arith.constant 0 : i32
    %c0_i32_2 = arith.constant 0 : i32
    return %c0_i32, %c0_i32_0, %c0_i32_1 : i32, i32, i32
  }
  func.func @transform_4(%arg0: i32, %arg1: i32) -> (i32, i32) {
    %c0_i32 = arith.constant 0 : i32
    %c0_i32_0 = arith.constant 0 : i32
    %c0_i32_1 = arith.constant 0 : i32
    return %c0_i32, %c0_i32_0 : i32, i32
  }
  func.func @transform_5(%arg0: i32, %arg1: i32) -> (i32, i32) {
    %c0_i32 = arith.constant 0 : i32
    %c0_i32_0 = arith.constant 0 : i32
    %c0_i32_1 = arith.constant 0 : i32
    return %c0_i32, %c0_i32_0 : i32, i32
  }
  func.func @transform_6(%arg0: i32, %arg1: i32) -> (i32, i32) {
    %c0_i32 = arith.constant 0 : i32
    %c0_i32_0 = arith.constant 0 : i32
    %c0_i32_1 = arith.constant 0 : i32
    return %c0_i32, %c0_i32_0 : i32, i32
  }
  func.func @transform_7(%arg0: i32, %arg1: i32) -> (i32, i32) {
    %c0_i32 = arith.constant 0 : i32
    %c0_i32_0 = arith.constant 0 : i32
    return %arg0, %c0_i32 : i32, i32
  }
}

module attributes {stable_mosaic.version = 11 : i64} {
  func.func @gru_seq_kernel(%arg0: i32, %arg1: i32, %arg2: memref<8x2x16xf32, #tpu.memory_space<vmem>>, %arg3: memref<3x16x32xbf16, #tpu.memory_space<vmem>>, %arg4: memref<3x1x32xf32, #tpu.memory_space<vmem>>, %arg5: memref<3x32x32xbf16, #tpu.memory_space<vmem>>, %arg6: memref<1x32xf32, #tpu.memory_space<vmem>>, %arg7: memref<8x2x32xbf16, #tpu.memory_space<vmem>>, %arg8: memref<2x32xf32, #tpu.memory_space<vmem>>) attributes {dimension_semantics = [#tpu.dimension_semantics<parallel>, #tpu.dimension_semantics<arbitrary>], iteration_bounds = array<i64: 1, 1>, scalar_prefetch = 0 : i64, scratch_operands = 1 : i64, tpu.core_type = #tpu.core_type<tc>, window_params = [{transform_indices = @transform_0, window_bounds = array<i64: 8, 2, 16>}, {pipeline_mode = #tpu.pipeline_mode<synchronous>, transform_indices = @transform_1, window_bounds = array<i64: 3, 16, 32>}, {pipeline_mode = #tpu.pipeline_mode<synchronous>, transform_indices = @transform_2, window_bounds = array<i64: 3, 1, 32>}, {pipeline_mode = #tpu.pipeline_mode<synchronous>, transform_indices = @transform_3, window_bounds = array<i64: 3, 32, 32>}, {pipeline_mode = #tpu.pipeline_mode<synchronous>, transform_indices = @transform_4, window_bounds = array<i64: 1, 32>}, {transform_indices = @transform_5, window_bounds = array<i64: 8, 2, 32>}]} {
    %c0_i32 = arith.constant 0 : i32
    %0 = arith.cmpi eq, %arg1, %c0_i32 : i32
    %1 = arith.extui %0 : i1 to i32
    %c0_i32_0 = arith.constant 0 : i32
    %2 = arith.cmpi ne, %1, %c0_i32_0 : i32
    scf.if %2 {
      %cst_163 = arith.constant 0.000000e+00 : f32
      %390 = vector.broadcast %cst_163 : f32 to vector<2x32xf32>
      %c0_164 = arith.constant 0 : index
      %c0_165 = arith.constant 0 : index
      %391 = vector.load %arg8[%c0_164, %c0_165] : memref<2x32xf32, #tpu.memory_space<vmem>>, vector<2x32xf32>
      tpu.vector_store %arg8[%c0_164, %c0_165], %390 {strides = array<i32>} : memref<2x32xf32, #tpu.memory_space<vmem>>, vector<2x32xf32>,
    } else {
    }
    %c0 = arith.constant 0 : index
    %c0_1 = arith.constant 0 : index
    %3 = vector.load %arg6[%c0, %c0_1] : memref<1x32xf32, #tpu.memory_space<vmem>>, vector<1x32xf32>
    %c0_2 = arith.constant 0 : index
    %c0_3 = arith.constant 0 : index
    %c0_4 = arith.constant 0 : index
    %4 = vector.load %arg3[%c0_2, %c0_3, %c0_4] : memref<3x16x32xbf16, #tpu.memory_space<vmem>>, vector<1x16x32xbf16>
    %5 = vector.shape_cast %4 : vector<1x16x32xbf16> to vector<16x32xbf16>
    %c1 = arith.constant 1 : index
    %c0_5 = arith.constant 0 : index
    %c0_6 = arith.constant 0 : index
    %6 = vector.load %arg3[%c1, %c0_5, %c0_6] : memref<3x16x32xbf16, #tpu.memory_space<vmem>>, vector<1x16x32xbf16>
    %7 = vector.shape_cast %6 : vector<1x16x32xbf16> to vector<16x32xbf16>
    %c2 = arith.constant 2 : index
    %c0_7 = arith.constant 0 : index
    %c0_8 = arith.constant 0 : index
    %8 = vector.load %arg3[%c2, %c0_7, %c0_8] : memref<3x16x32xbf16, #tpu.memory_space<vmem>>, vector<1x16x32xbf16>
    %9 = vector.shape_cast %8 : vector<1x16x32xbf16> to vector<16x32xbf16>
    %c0_9 = arith.constant 0 : index
    %c0_10 = arith.constant 0 : index
    %c0_11 = arith.constant 0 : index
    %10 = vector.load %arg5[%c0_9, %c0_10, %c0_11] : memref<3x32x32xbf16, #tpu.memory_space<vmem>>, vector<1x32x32xbf16>
    %11 = vector.shape_cast %10 : vector<1x32x32xbf16> to vector<32x32xbf16>
    %c1_12 = arith.constant 1 : index
    %c0_13 = arith.constant 0 : index
    %c0_14 = arith.constant 0 : index
    %12 = vector.load %arg5[%c1_12, %c0_13, %c0_14] : memref<3x32x32xbf16, #tpu.memory_space<vmem>>, vector<1x32x32xbf16>
    %13 = vector.shape_cast %12 : vector<1x32x32xbf16> to vector<32x32xbf16>
    %c2_15 = arith.constant 2 : index
    %c0_16 = arith.constant 0 : index
    %c0_17 = arith.constant 0 : index
    %14 = vector.load %arg5[%c2_15, %c0_16, %c0_17] : memref<3x32x32xbf16, #tpu.memory_space<vmem>>, vector<1x32x32xbf16>
    %15 = vector.shape_cast %14 : vector<1x32x32xbf16> to vector<32x32xbf16>
    %c0_18 = arith.constant 0 : index
    %c0_19 = arith.constant 0 : index
    %c0_20 = arith.constant 0 : index
    %16 = vector.load %arg4[%c0_18, %c0_19, %c0_20] : memref<3x1x32xf32, #tpu.memory_space<vmem>>, vector<1x1x32xf32>
    %17 = vector.shape_cast %16 : vector<1x1x32xf32> to vector<1x32xf32>
    %c1_21 = arith.constant 1 : index
    %c0_22 = arith.constant 0 : index
    %c0_23 = arith.constant 0 : index
    %18 = vector.load %arg4[%c1_21, %c0_22, %c0_23] : memref<3x1x32xf32, #tpu.memory_space<vmem>>, vector<1x1x32xf32>
    %19 = vector.shape_cast %18 : vector<1x1x32xf32> to vector<1x32xf32>
    %c2_24 = arith.constant 2 : index
    %c0_25 = arith.constant 0 : index
    %c0_26 = arith.constant 0 : index
    %20 = vector.load %arg4[%c2_24, %c0_25, %c0_26] : memref<3x1x32xf32, #tpu.memory_space<vmem>>, vector<1x1x32xf32>
    %21 = vector.shape_cast %20 : vector<1x1x32xf32> to vector<1x32xf32>
    %c0_i32_27 = arith.constant 0 : i32
    %c0_28 = arith.constant 0 : index
    %c0_29 = arith.constant 0 : index
    %22 = vector.load %arg8[%c0_28, %c0_29] : memref<2x32xf32, #tpu.memory_space<vmem>>, vector<2x32xf32>
    %23 = arith.index_cast %c0_i32_27 : i32 to index
    %c0_30 = arith.constant 0 : index
    %c0_31 = arith.constant 0 : index
    %24 = vector.load %arg2[%23, %c0_30, %c0_31] : memref<8x2x16xf32, #tpu.memory_space<vmem>>, vector<1x2x16xf32>
    %25 = vector.shape_cast %24 : vector<1x2x16xf32> to vector<2x16xf32>
    %26 = arith.truncf %25 : vector<2x16xf32> to vector<2x16xbf16>
    %27 = arith.truncf %22 : vector<2x32xf32> to vector<2x32xbf16>
    %cst = arith.constant dense<0.000000e+00> : vector<2x32xf32>
    %28 = tpu.matmul %26, %5, %cst {dimension_numbers = #tpu.dot_dimension_numbers<[1], [0], [0], [1], [0, 0, 1, 1], [], []>} : vector<2x16xbf16>, vector<16x32xbf16>, vector<2x32xf32> -> vector<2x32xf32>
    %29 = vector.broadcast %17 : vector<1x32xf32> to vector<2x32xf32>
    %30 = arith.addf %28, %29 : vector<2x32xf32>
    %cst_32 = arith.constant dense<0.000000e+00> : vector<2x32xf32>
    %31 = tpu.matmul %26, %7, %cst_32 {dimension_numbers = #tpu.dot_dimension_numbers<[1], [0], [0], [1], [0, 0, 1, 1], [], []>} : vector<2x16xbf16>, vector<16x32xbf16>, vector<2x32xf32> -> vector<2x32xf32>
    %32 = vector.broadcast %19 : vector<1x32xf32> to vector<2x32xf32>
    %33 = arith.addf %31, %32 : vector<2x32xf32>
    %cst_33 = arith.constant dense<0.000000e+00> : vector<2x32xf32>
    %34 = tpu.matmul %26, %9, %cst_33 {dimension_numbers = #tpu.dot_dimension_numbers<[1], [0], [0], [1], [0, 0, 1, 1], [], []>} : vector<2x16xbf16>, vector<16x32xbf16>, vector<2x32xf32> -> vector<2x32xf32>
    %35 = vector.broadcast %21 : vector<1x32xf32> to vector<2x32xf32>
    %36 = arith.addf %34, %35 : vector<2x32xf32>
    %cst_34 = arith.constant dense<0.000000e+00> : vector<2x32xf32>
    %37 = tpu.matmul %27, %11, %cst_34 {dimension_numbers = #tpu.dot_dimension_numbers<[1], [0], [0], [1], [0, 0, 1, 1], [], []>} : vector<2x32xbf16>, vector<32x32xbf16>, vector<2x32xf32> -> vector<2x32xf32>
    %cst_35 = arith.constant dense<0.000000e+00> : vector<2x32xf32>
    %38 = tpu.matmul %27, %13, %cst_35 {dimension_numbers = #tpu.dot_dimension_numbers<[1], [0], [0], [1], [0, 0, 1, 1], [], []>} : vector<2x32xbf16>, vector<32x32xbf16>, vector<2x32xf32> -> vector<2x32xf32>
    %cst_36 = arith.constant dense<0.000000e+00> : vector<2x32xf32>
    %39 = tpu.matmul %27, %15, %cst_36 {dimension_numbers = #tpu.dot_dimension_numbers<[1], [0], [0], [1], [0, 0, 1, 1], [], []>} : vector<2x32xbf16>, vector<32x32xbf16>, vector<2x32xf32> -> vector<2x32xf32>
    %40 = arith.addf %30, %37 : vector<2x32xf32>
    %41 = arith.negf %40 : vector<2x32xf32>
    %42 = math.exp %41 : vector<2x32xf32>
    %cst_37 = arith.constant 1.000000e+00 : f32
    %43 = vector.broadcast %cst_37 : f32 to vector<2x32xf32>
    %44 = arith.addf %43, %42 : vector<2x32xf32>
    %45 = arith.divf %43, %44 : vector<2x32xf32>
    %46 = arith.addf %33, %38 : vector<2x32xf32>
    %47 = arith.negf %46 : vector<2x32xf32>
    %48 = math.exp %47 : vector<2x32xf32>
    %cst_38 = arith.constant 1.000000e+00 : f32
    %49 = vector.broadcast %cst_38 : f32 to vector<2x32xf32>
    %50 = arith.addf %49, %48 : vector<2x32xf32>
    %51 = arith.divf %49, %50 : vector<2x32xf32>
    %52 = vector.broadcast %3 : vector<1x32xf32> to vector<2x32xf32>
    %53 = arith.addf %39, %52 : vector<2x32xf32>
    %54 = arith.mulf %45, %53 : vector<2x32xf32>
    %55 = arith.addf %36, %54 : vector<2x32xf32>
    %56 = math.tanh %55 : vector<2x32xf32>
    %cst_39 = arith.constant 1.000000e+00 : f32
    %57 = vector.broadcast %cst_39 : f32 to vector<2x32xf32>
    %58 = arith.subf %57, %51 : vector<2x32xf32>
    %59 = arith.mulf %58, %56 : vector<2x32xf32>
    %60 = arith.mulf %51, %22 : vector<2x32xf32>
    %61 = arith.addf %59, %60 : vector<2x32xf32>
    %c0_40 = arith.constant 0 : index
    %c0_41 = arith.constant 0 : index
    %62 = vector.load %arg8[%c0_40, %c0_41] : memref<2x32xf32, #tpu.memory_space<vmem>>, vector<2x32xf32>
    tpu.vector_store %arg8[%c0_40, %c0_41], %61 {strides = array<i32>} : memref<2x32xf32, #tpu.memory_space<vmem>>, vector<2x32xf32>,
    %63 = arith.truncf %61 : vector<2x32xf32> to vector<2x32xbf16>
    %64 = arith.index_cast %c0_i32_27 : i32 to index
    %c0_42 = arith.constant 0 : index
    %c0_43 = arith.constant 0 : index
    %65 = vector.load %arg7[%64, %c0_42, %c0_43] : memref<8x2x32xbf16, #tpu.memory_space<vmem>>, vector<1x2x32xbf16>
    %66 = vector.shape_cast %65 : vector<1x2x32xbf16> to vector<2x32xbf16>
    %67 = vector.shape_cast %63 : vector<2x32xbf16> to vector<1x2x32xbf16>
    tpu.vector_store %arg7[%64, %c0_42, %c0_43], %67 {strides = array<i32>} : memref<8x2x32xbf16, #tpu.memory_space<vmem>>, vector<1x2x32xbf16>,
    %c1_i32 = arith.constant 1 : i32
    %c0_44 = arith.constant 0 : index
    %c0_45 = arith.constant 0 : index
    %68 = vector.load %arg8[%c0_44, %c0_45] : memref<2x32xf32, #tpu.memory_space<vmem>>, vector<2x32xf32>
    %69 = arith.index_cast %c1_i32 : i32 to index
    %c0_46 = arith.constant 0 : index
    %c0_47 = arith.constant 0 : index
    %70 = vector.load %arg2[%69, %c0_46, %c0_47] : memref<8x2x16xf32, #tpu.memory_space<vmem>>, vector<1x2x16xf32>
    %71 = vector.shape_cast %70 : vector<1x2x16xf32> to vector<2x16xf32>
    %72 = arith.truncf %71 : vector<2x16xf32> to vector<2x16xbf16>
    %73 = arith.truncf %68 : vector<2x32xf32> to vector<2x32xbf16>
    %cst_48 = arith.constant dense<0.000000e+00> : vector<2x32xf32>
    %74 = tpu.matmul %72, %5, %cst_48 {dimension_numbers = #tpu.dot_dimension_numbers<[1], [0], [0], [1], [0, 0, 1, 1], [], []>} : vector<2x16xbf16>, vector<16x32xbf16>, vector<2x32xf32> -> vector<2x32xf32>
    %75 = vector.broadcast %17 : vector<1x32xf32> to vector<2x32xf32>
    %76 = arith.addf %74, %75 : vector<2x32xf32>
    %cst_49 = arith.constant dense<0.000000e+00> : vector<2x32xf32>
    %77 = tpu.matmul %72, %7, %cst_49 {dimension_numbers = #tpu.dot_dimension_numbers<[1], [0], [0], [1], [0, 0, 1, 1], [], []>} : vector<2x16xbf16>, vector<16x32xbf16>, vector<2x32xf32> -> vector<2x32xf32>
    %78 = vector.broadcast %19 : vector<1x32xf32> to vector<2x32xf32>
    %79 = arith.addf %77, %78 : vector<2x32xf32>
    %cst_50 = arith.constant dense<0.000000e+00> : vector<2x32xf32>
    %80 = tpu.matmul %72, %9, %cst_50 {dimension_numbers = #tpu.dot_dimension_numbers<[1], [0], [0], [1], [0, 0, 1, 1], [], []>} : vector<2x16xbf16>, vector<16x32xbf16>, vector<2x32xf32> -> vector<2x32xf32>
    %81 = vector.broadcast %21 : vector<1x32xf32> to vector<2x32xf32>
    %82 = arith.addf %80, %81 : vector<2x32xf32>
    %cst_51 = arith.constant dense<0.000000e+00> : vector<2x32xf32>
    %83 = tpu.matmul %73, %11, %cst_51 {dimension_numbers = #tpu.dot_dimension_numbers<[1], [0], [0], [1], [0, 0, 1, 1], [], []>} : vector<2x32xbf16>, vector<32x32xbf16>, vector<2x32xf32> -> vector<2x32xf32>
    %cst_52 = arith.constant dense<0.000000e+00> : vector<2x32xf32>
    %84 = tpu.matmul %73, %13, %cst_52 {dimension_numbers = #tpu.dot_dimension_numbers<[1], [0], [0], [1], [0, 0, 1, 1], [], []>} : vector<2x32xbf16>, vector<32x32xbf16>, vector<2x32xf32> -> vector<2x32xf32>
    %cst_53 = arith.constant dense<0.000000e+00> : vector<2x32xf32>
    %85 = tpu.matmul %73, %15, %cst_53 {dimension_numbers = #tpu.dot_dimension_numbers<[1], [0], [0], [1], [0, 0, 1, 1], [], []>} : vector<2x32xbf16>, vector<32x32xbf16>, vector<2x32xf32> -> vector<2x32xf32>
    %86 = arith.addf %76, %83 : vector<2x32xf32>
    %87 = arith.negf %86 : vector<2x32xf32>
    %88 = math.exp %87 : vector<2x32xf32>
    %cst_54 = arith.constant 1.000000e+00 : f32
    %89 = vector.broadcast %cst_54 : f32 to vector<2x32xf32>
    %90 = arith.addf %89, %88 : vector<2x32xf32>
    %91 = arith.divf %89, %90 : vector<2x32xf32>
    %92 = arith.addf %79, %84 : vector<2x32xf32>
    %93 = arith.negf %92 : vector<2x32xf32>
    %94 = math.exp %93 : vector<2x32xf32>
    %cst_55 = arith.constant 1.000000e+00 : f32
    %95 = vector.broadcast %cst_55 : f32 to vector<2x32xf32>
    %96 = arith.addf %95, %94 : vector<2x32xf32>
    %97 = arith.divf %95, %96 : vector<2x32xf32>
    %98 = vector.broadcast %3 : vector<1x32xf32> to vector<2x32xf32>
    %99 = arith.addf %85, %98 : vector<2x32xf32>
    %100 = arith.mulf %91, %99 : vector<2x32xf32>
    %101 = arith.addf %82, %100 : vector<2x32xf32>
    %102 = math.tanh %101 : vector<2x32xf32>
    %cst_56 = arith.constant 1.000000e+00 : f32
    %103 = vector.broadcast %cst_56 : f32 to vector<2x32xf32>
    %104 = arith.subf %103, %97 : vector<2x32xf32>
    %105 = arith.mulf %104, %102 : vector<2x32xf32>
    %106 = arith.mulf %97, %68 : vector<2x32xf32>
    %107 = arith.addf %105, %106 : vector<2x32xf32>
    %c0_57 = arith.constant 0 : index
    %c0_58 = arith.constant 0 : index
    %108 = vector.load %arg8[%c0_57, %c0_58] : memref<2x32xf32, #tpu.memory_space<vmem>>, vector<2x32xf32>
    tpu.vector_store %arg8[%c0_57, %c0_58], %107 {strides = array<i32>} : memref<2x32xf32, #tpu.memory_space<vmem>>, vector<2x32xf32>,
    %109 = arith.truncf %107 : vector<2x32xf32> to vector<2x32xbf16>
    %110 = arith.index_cast %c1_i32 : i32 to index
    %c0_59 = arith.constant 0 : index
    %c0_60 = arith.constant 0 : index
    %111 = vector.load %arg7[%110, %c0_59, %c0_60] : memref<8x2x32xbf16, #tpu.memory_space<vmem>>, vector<1x2x32xbf16>
    %112 = vector.shape_cast %111 : vector<1x2x32xbf16> to vector<2x32xbf16>
    %113 = vector.shape_cast %109 : vector<2x32xbf16> to vector<1x2x32xbf16>
    tpu.vector_store %arg7[%110, %c0_59, %c0_60], %113 {strides = array<i32>} : memref<8x2x32xbf16, #tpu.memory_space<vmem>>, vector<1x2x32xbf16>,
    %c2_i32 = arith.constant 2 : i32
    %c0_61 = arith.constant 0 : index
    %c0_62 = arith.constant 0 : index
    %114 = vector.load %arg8[%c0_61, %c0_62] : memref<2x32xf32, #tpu.memory_space<vmem>>, vector<2x32xf32>
    %115 = arith.index_cast %c2_i32 : i32 to index
    %c0_63 = arith.constant 0 : index
    %c0_64 = arith.constant 0 : index
    %116 = vector.load %arg2[%115, %c0_63, %c0_64] : memref<8x2x16xf32, #tpu.memory_space<vmem>>, vector<1x2x16xf32>
    %117 = vector.shape_cast %116 : vector<1x2x16xf32> to vector<2x16xf32>
    %118 = arith.truncf %117 : vector<2x16xf32> to vector<2x16xbf16>
    %119 = arith.truncf %114 : vector<2x32xf32> to vector<2x32xbf16>
    %cst_65 = arith.constant dense<0.000000e+00> : vector<2x32xf32>
    %120 = tpu.matmul %118, %5, %cst_65 {dimension_numbers = #tpu.dot_dimension_numbers<[1], [0], [0], [1], [0, 0, 1, 1], [], []>} : vector<2x16xbf16>, vector<16x32xbf16>, vector<2x32xf32> -> vector<2x32xf32>
    %121 = vector.broadcast %17 : vector<1x32xf32> to vector<2x32xf32>
    %122 = arith.addf %120, %121 : vector<2x32xf32>
    %cst_66 = arith.constant dense<0.000000e+00> : vector<2x32xf32>
    %123 = tpu.matmul %118, %7, %cst_66 {dimension_numbers = #tpu.dot_dimension_numbers<[1], [0], [0], [1], [0, 0, 1, 1], [], []>} : vector<2x16xbf16>, vector<16x32xbf16>, vector<2x32xf32> -> vector<2x32xf32>
    %124 = vector.broadcast %19 : vector<1x32xf32> to vector<2x32xf32>
    %125 = arith.addf %123, %124 : vector<2x32xf32>
    %cst_67 = arith.constant dense<0.000000e+00> : vector<2x32xf32>
    %126 = tpu.matmul %118, %9, %cst_67 {dimension_numbers = #tpu.dot_dimension_numbers<[1], [0], [0], [1], [0, 0, 1, 1], [], []>} : vector<2x16xbf16>, vector<16x32xbf16>, vector<2x32xf32> -> vector<2x32xf32>
    %127 = vector.broadcast %21 : vector<1x32xf32> to vector<2x32xf32>
    %128 = arith.addf %126, %127 : vector<2x32xf32>
    %cst_68 = arith.constant dense<0.000000e+00> : vector<2x32xf32>
    %129 = tpu.matmul %119, %11, %cst_68 {dimension_numbers = #tpu.dot_dimension_numbers<[1], [0], [0], [1], [0, 0, 1, 1], [], []>} : vector<2x32xbf16>, vector<32x32xbf16>, vector<2x32xf32> -> vector<2x32xf32>
    %cst_69 = arith.constant dense<0.000000e+00> : vector<2x32xf32>
    %130 = tpu.matmul %119, %13, %cst_69 {dimension_numbers = #tpu.dot_dimension_numbers<[1], [0], [0], [1], [0, 0, 1, 1], [], []>} : vector<2x32xbf16>, vector<32x32xbf16>, vector<2x32xf32> -> vector<2x32xf32>
    %cst_70 = arith.constant dense<0.000000e+00> : vector<2x32xf32>
    %131 = tpu.matmul %119, %15, %cst_70 {dimension_numbers = #tpu.dot_dimension_numbers<[1], [0], [0], [1], [0, 0, 1, 1], [], []>} : vector<2x32xbf16>, vector<32x32xbf16>, vector<2x32xf32> -> vector<2x32xf32>
    %132 = arith.addf %122, %129 : vector<2x32xf32>
    %133 = arith.negf %132 : vector<2x32xf32>
    %134 = math.exp %133 : vector<2x32xf32>
    %cst_71 = arith.constant 1.000000e+00 : f32
    %135 = vector.broadcast %cst_71 : f32 to vector<2x32xf32>
    %136 = arith.addf %135, %134 : vector<2x32xf32>
    %137 = arith.divf %135, %136 : vector<2x32xf32>
    %138 = arith.addf %125, %130 : vector<2x32xf32>
    %139 = arith.negf %138 : vector<2x32xf32>
    %140 = math.exp %139 : vector<2x32xf32>
    %cst_72 = arith.constant 1.000000e+00 : f32
    %141 = vector.broadcast %cst_72 : f32 to vector<2x32xf32>
    %142 = arith.addf %141, %140 : vector<2x32xf32>
    %143 = arith.divf %141, %142 : vector<2x32xf32>
    %144 = vector.broadcast %3 : vector<1x32xf32> to vector<2x32xf32>
    %145 = arith.addf %131, %144 : vector<2x32xf32>
    %146 = arith.mulf %137, %145 : vector<2x32xf32>
    %147 = arith.addf %128, %146 : vector<2x32xf32>
    %148 = math.tanh %147 : vector<2x32xf32>
    %cst_73 = arith.constant 1.000000e+00 : f32
    %149 = vector.broadcast %cst_73 : f32 to vector<2x32xf32>
    %150 = arith.subf %149, %143 : vector<2x32xf32>
    %151 = arith.mulf %150, %148 : vector<2x32xf32>
    %152 = arith.mulf %143, %114 : vector<2x32xf32>
    %153 = arith.addf %151, %152 : vector<2x32xf32>
    %c0_74 = arith.constant 0 : index
    %c0_75 = arith.constant 0 : index
    %154 = vector.load %arg8[%c0_74, %c0_75] : memref<2x32xf32, #tpu.memory_space<vmem>>, vector<2x32xf32>
    tpu.vector_store %arg8[%c0_74, %c0_75], %153 {strides = array<i32>} : memref<2x32xf32, #tpu.memory_space<vmem>>, vector<2x32xf32>,
    %155 = arith.truncf %153 : vector<2x32xf32> to vector<2x32xbf16>
    %156 = arith.index_cast %c2_i32 : i32 to index
    %c0_76 = arith.constant 0 : index
    %c0_77 = arith.constant 0 : index
    %157 = vector.load %arg7[%156, %c0_76, %c0_77] : memref<8x2x32xbf16, #tpu.memory_space<vmem>>, vector<1x2x32xbf16>
    %158 = vector.shape_cast %157 : vector<1x2x32xbf16> to vector<2x32xbf16>
    %159 = vector.shape_cast %155 : vector<2x32xbf16> to vector<1x2x32xbf16>
    tpu.vector_store %arg7[%156, %c0_76, %c0_77], %159 {strides = array<i32>} : memref<8x2x32xbf16, #tpu.memory_space<vmem>>, vector<1x2x32xbf16>,
    %c3_i32 = arith.constant 3 : i32
    %c0_78 = arith.constant 0 : index
    %c0_79 = arith.constant 0 : index
    %160 = vector.load %arg8[%c0_78, %c0_79] : memref<2x32xf32, #tpu.memory_space<vmem>>, vector<2x32xf32>
    %161 = arith.index_cast %c3_i32 : i32 to index
    %c0_80 = arith.constant 0 : index
    %c0_81 = arith.constant 0 : index
    %162 = vector.load %arg2[%161, %c0_80, %c0_81] : memref<8x2x16xf32, #tpu.memory_space<vmem>>, vector<1x2x16xf32>
    %163 = vector.shape_cast %162 : vector<1x2x16xf32> to vector<2x16xf32>
    %164 = arith.truncf %163 : vector<2x16xf32> to vector<2x16xbf16>
    %165 = arith.truncf %160 : vector<2x32xf32> to vector<2x32xbf16>
    %cst_82 = arith.constant dense<0.000000e+00> : vector<2x32xf32>
    %166 = tpu.matmul %164, %5, %cst_82 {dimension_numbers = #tpu.dot_dimension_numbers<[1], [0], [0], [1], [0, 0, 1, 1], [], []>} : vector<2x16xbf16>, vector<16x32xbf16>, vector<2x32xf32> -> vector<2x32xf32>
    %167 = vector.broadcast %17 : vector<1x32xf32> to vector<2x32xf32>
    %168 = arith.addf %166, %167 : vector<2x32xf32>
    %cst_83 = arith.constant dense<0.000000e+00> : vector<2x32xf32>
    %169 = tpu.matmul %164, %7, %cst_83 {dimension_numbers = #tpu.dot_dimension_numbers<[1], [0], [0], [1], [0, 0, 1, 1], [], []>} : vector<2x16xbf16>, vector<16x32xbf16>, vector<2x32xf32> -> vector<2x32xf32>
    %170 = vector.broadcast %19 : vector<1x32xf32> to vector<2x32xf32>
    %171 = arith.addf %169, %170 : vector<2x32xf32>
    %cst_84 = arith.constant dense<0.000000e+00> : vector<2x32xf32>
    %172 = tpu.matmul %164, %9, %cst_84 {dimension_numbers = #tpu.dot_dimension_numbers<[1], [0], [0], [1], [0, 0, 1, 1], [], []>} : vector<2x16xbf16>, vector<16x32xbf16>, vector<2x32xf32> -> vector<2x32xf32>
    %173 = vector.broadcast %21 : vector<1x32xf32> to vector<2x32xf32>
    %174 = arith.addf %172, %173 : vector<2x32xf32>
    %cst_85 = arith.constant dense<0.000000e+00> : vector<2x32xf32>
    %175 = tpu.matmul %165, %11, %cst_85 {dimension_numbers = #tpu.dot_dimension_numbers<[1], [0], [0], [1], [0, 0, 1, 1], [], []>} : vector<2x32xbf16>, vector<32x32xbf16>, vector<2x32xf32> -> vector<2x32xf32>
    %cst_86 = arith.constant dense<0.000000e+00> : vector<2x32xf32>
    %176 = tpu.matmul %165, %13, %cst_86 {dimension_numbers = #tpu.dot_dimension_numbers<[1], [0], [0], [1], [0, 0, 1, 1], [], []>} : vector<2x32xbf16>, vector<32x32xbf16>, vector<2x32xf32> -> vector<2x32xf32>
    %cst_87 = arith.constant dense<0.000000e+00> : vector<2x32xf32>
    %177 = tpu.matmul %165, %15, %cst_87 {dimension_numbers = #tpu.dot_dimension_numbers<[1], [0], [0], [1], [0, 0, 1, 1], [], []>} : vector<2x32xbf16>, vector<32x32xbf16>, vector<2x32xf32> -> vector<2x32xf32>
    %178 = arith.addf %168, %175 : vector<2x32xf32>
    %179 = arith.negf %178 : vector<2x32xf32>
    %180 = math.exp %179 : vector<2x32xf32>
    %cst_88 = arith.constant 1.000000e+00 : f32
    %181 = vector.broadcast %cst_88 : f32 to vector<2x32xf32>
    %182 = arith.addf %181, %180 : vector<2x32xf32>
    %183 = arith.divf %181, %182 : vector<2x32xf32>
    %184 = arith.addf %171, %176 : vector<2x32xf32>
    %185 = arith.negf %184 : vector<2x32xf32>
    %186 = math.exp %185 : vector<2x32xf32>
    %cst_89 = arith.constant 1.000000e+00 : f32
    %187 = vector.broadcast %cst_89 : f32 to vector<2x32xf32>
    %188 = arith.addf %187, %186 : vector<2x32xf32>
    %189 = arith.divf %187, %188 : vector<2x32xf32>
    %190 = vector.broadcast %3 : vector<1x32xf32> to vector<2x32xf32>
    %191 = arith.addf %177, %190 : vector<2x32xf32>
    %192 = arith.mulf %183, %191 : vector<2x32xf32>
    %193 = arith.addf %174, %192 : vector<2x32xf32>
    %194 = math.tanh %193 : vector<2x32xf32>
    %cst_90 = arith.constant 1.000000e+00 : f32
    %195 = vector.broadcast %cst_90 : f32 to vector<2x32xf32>
    %196 = arith.subf %195, %189 : vector<2x32xf32>
    %197 = arith.mulf %196, %194 : vector<2x32xf32>
    %198 = arith.mulf %189, %160 : vector<2x32xf32>
    %199 = arith.addf %197, %198 : vector<2x32xf32>
    %c0_91 = arith.constant 0 : index
    %c0_92 = arith.constant 0 : index
    %200 = vector.load %arg8[%c0_91, %c0_92] : memref<2x32xf32, #tpu.memory_space<vmem>>, vector<2x32xf32>
    tpu.vector_store %arg8[%c0_91, %c0_92], %199 {strides = array<i32>} : memref<2x32xf32, #tpu.memory_space<vmem>>, vector<2x32xf32>,
    %201 = arith.truncf %199 : vector<2x32xf32> to vector<2x32xbf16>
    %202 = arith.index_cast %c3_i32 : i32 to index
    %c0_93 = arith.constant 0 : index
    %c0_94 = arith.constant 0 : index
    %203 = vector.load %arg7[%202, %c0_93, %c0_94] : memref<8x2x32xbf16, #tpu.memory_space<vmem>>, vector<1x2x32xbf16>
    %204 = vector.shape_cast %203 : vector<1x2x32xbf16> to vector<2x32xbf16>
    %205 = vector.shape_cast %201 : vector<2x32xbf16> to vector<1x2x32xbf16>
    tpu.vector_store %arg7[%202, %c0_93, %c0_94], %205 {strides = array<i32>} : memref<8x2x32xbf16, #tpu.memory_space<vmem>>, vector<1x2x32xbf16>,
    %c4_i32 = arith.constant 4 : i32
    %c0_95 = arith.constant 0 : index
    %c0_96 = arith.constant 0 : index
    %206 = vector.load %arg8[%c0_95, %c0_96] : memref<2x32xf32, #tpu.memory_space<vmem>>, vector<2x32xf32>
    %207 = arith.index_cast %c4_i32 : i32 to index
    %c0_97 = arith.constant 0 : index
    %c0_98 = arith.constant 0 : index
    %208 = vector.load %arg2[%207, %c0_97, %c0_98] : memref<8x2x16xf32, #tpu.memory_space<vmem>>, vector<1x2x16xf32>
    %209 = vector.shape_cast %208 : vector<1x2x16xf32> to vector<2x16xf32>
    %210 = arith.truncf %209 : vector<2x16xf32> to vector<2x16xbf16>
    %211 = arith.truncf %206 : vector<2x32xf32> to vector<2x32xbf16>
    %cst_99 = arith.constant dense<0.000000e+00> : vector<2x32xf32>
    %212 = tpu.matmul %210, %5, %cst_99 {dimension_numbers = #tpu.dot_dimension_numbers<[1], [0], [0], [1], [0, 0, 1, 1], [], []>} : vector<2x16xbf16>, vector<16x32xbf16>, vector<2x32xf32> -> vector<2x32xf32>
    %213 = vector.broadcast %17 : vector<1x32xf32> to vector<2x32xf32>
    %214 = arith.addf %212, %213 : vector<2x32xf32>
    %cst_100 = arith.constant dense<0.000000e+00> : vector<2x32xf32>
    %215 = tpu.matmul %210, %7, %cst_100 {dimension_numbers = #tpu.dot_dimension_numbers<[1], [0], [0], [1], [0, 0, 1, 1], [], []>} : vector<2x16xbf16>, vector<16x32xbf16>, vector<2x32xf32> -> vector<2x32xf32>
    %216 = vector.broadcast %19 : vector<1x32xf32> to vector<2x32xf32>
    %217 = arith.addf %215, %216 : vector<2x32xf32>
    %cst_101 = arith.constant dense<0.000000e+00> : vector<2x32xf32>
    %218 = tpu.matmul %210, %9, %cst_101 {dimension_numbers = #tpu.dot_dimension_numbers<[1], [0], [0], [1], [0, 0, 1, 1], [], []>} : vector<2x16xbf16>, vector<16x32xbf16>, vector<2x32xf32> -> vector<2x32xf32>
    %219 = vector.broadcast %21 : vector<1x32xf32> to vector<2x32xf32>
    %220 = arith.addf %218, %219 : vector<2x32xf32>
    %cst_102 = arith.constant dense<0.000000e+00> : vector<2x32xf32>
    %221 = tpu.matmul %211, %11, %cst_102 {dimension_numbers = #tpu.dot_dimension_numbers<[1], [0], [0], [1], [0, 0, 1, 1], [], []>} : vector<2x32xbf16>, vector<32x32xbf16>, vector<2x32xf32> -> vector<2x32xf32>
    %cst_103 = arith.constant dense<0.000000e+00> : vector<2x32xf32>
    %222 = tpu.matmul %211, %13, %cst_103 {dimension_numbers = #tpu.dot_dimension_numbers<[1], [0], [0], [1], [0, 0, 1, 1], [], []>} : vector<2x32xbf16>, vector<32x32xbf16>, vector<2x32xf32> -> vector<2x32xf32>
    %cst_104 = arith.constant dense<0.000000e+00> : vector<2x32xf32>
    %223 = tpu.matmul %211, %15, %cst_104 {dimension_numbers = #tpu.dot_dimension_numbers<[1], [0], [0], [1], [0, 0, 1, 1], [], []>} : vector<2x32xbf16>, vector<32x32xbf16>, vector<2x32xf32> -> vector<2x32xf32>
    %224 = arith.addf %214, %221 : vector<2x32xf32>
    %225 = arith.negf %224 : vector<2x32xf32>
    %226 = math.exp %225 : vector<2x32xf32>
    %cst_105 = arith.constant 1.000000e+00 : f32
    %227 = vector.broadcast %cst_105 : f32 to vector<2x32xf32>
    %228 = arith.addf %227, %226 : vector<2x32xf32>
    %229 = arith.divf %227, %228 : vector<2x32xf32>
    %230 = arith.addf %217, %222 : vector<2x32xf32>
    %231 = arith.negf %230 : vector<2x32xf32>
    %232 = math.exp %231 : vector<2x32xf32>
    %cst_106 = arith.constant 1.000000e+00 : f32
    %233 = vector.broadcast %cst_106 : f32 to vector<2x32xf32>
    %234 = arith.addf %233, %232 : vector<2x32xf32>
    %235 = arith.divf %233, %234 : vector<2x32xf32>
    %236 = vector.broadcast %3 : vector<1x32xf32> to vector<2x32xf32>
    %237 = arith.addf %223, %236 : vector<2x32xf32>
    %238 = arith.mulf %229, %237 : vector<2x32xf32>
    %239 = arith.addf %220, %238 : vector<2x32xf32>
    %240 = math.tanh %239 : vector<2x32xf32>
    %cst_107 = arith.constant 1.000000e+00 : f32
    %241 = vector.broadcast %cst_107 : f32 to vector<2x32xf32>
    %242 = arith.subf %241, %235 : vector<2x32xf32>
    %243 = arith.mulf %242, %240 : vector<2x32xf32>
    %244 = arith.mulf %235, %206 : vector<2x32xf32>
    %245 = arith.addf %243, %244 : vector<2x32xf32>
    %c0_108 = arith.constant 0 : index
    %c0_109 = arith.constant 0 : index
    %246 = vector.load %arg8[%c0_108, %c0_109] : memref<2x32xf32, #tpu.memory_space<vmem>>, vector<2x32xf32>
    tpu.vector_store %arg8[%c0_108, %c0_109], %245 {strides = array<i32>} : memref<2x32xf32, #tpu.memory_space<vmem>>, vector<2x32xf32>,
    %247 = arith.truncf %245 : vector<2x32xf32> to vector<2x32xbf16>
    %248 = arith.index_cast %c4_i32 : i32 to index
    %c0_110 = arith.constant 0 : index
    %c0_111 = arith.constant 0 : index
    %249 = vector.load %arg7[%248, %c0_110, %c0_111] : memref<8x2x32xbf16, #tpu.memory_space<vmem>>, vector<1x2x32xbf16>
    %250 = vector.shape_cast %249 : vector<1x2x32xbf16> to vector<2x32xbf16>
    %251 = vector.shape_cast %247 : vector<2x32xbf16> to vector<1x2x32xbf16>
    tpu.vector_store %arg7[%248, %c0_110, %c0_111], %251 {strides = array<i32>} : memref<8x2x32xbf16, #tpu.memory_space<vmem>>, vector<1x2x32xbf16>,
    %c5_i32 = arith.constant 5 : i32
    %c0_112 = arith.constant 0 : index
    %c0_113 = arith.constant 0 : index
    %252 = vector.load %arg8[%c0_112, %c0_113] : memref<2x32xf32, #tpu.memory_space<vmem>>, vector<2x32xf32>
    %253 = arith.index_cast %c5_i32 : i32 to index
    %c0_114 = arith.constant 0 : index
    %c0_115 = arith.constant 0 : index
    %254 = vector.load %arg2[%253, %c0_114, %c0_115] : memref<8x2x16xf32, #tpu.memory_space<vmem>>, vector<1x2x16xf32>
    %255 = vector.shape_cast %254 : vector<1x2x16xf32> to vector<2x16xf32>
    %256 = arith.truncf %255 : vector<2x16xf32> to vector<2x16xbf16>
    %257 = arith.truncf %252 : vector<2x32xf32> to vector<2x32xbf16>
    %cst_116 = arith.constant dense<0.000000e+00> : vector<2x32xf32>
    %258 = tpu.matmul %256, %5, %cst_116 {dimension_numbers = #tpu.dot_dimension_numbers<[1], [0], [0], [1], [0, 0, 1, 1], [], []>} : vector<2x16xbf16>, vector<16x32xbf16>, vector<2x32xf32> -> vector<2x32xf32>
    %259 = vector.broadcast %17 : vector<1x32xf32> to vector<2x32xf32>
    %260 = arith.addf %258, %259 : vector<2x32xf32>
    %cst_117 = arith.constant dense<0.000000e+00> : vector<2x32xf32>
    %261 = tpu.matmul %256, %7, %cst_117 {dimension_numbers = #tpu.dot_dimension_numbers<[1], [0], [0], [1], [0, 0, 1, 1], [], []>} : vector<2x16xbf16>, vector<16x32xbf16>, vector<2x32xf32> -> vector<2x32xf32>
    %262 = vector.broadcast %19 : vector<1x32xf32> to vector<2x32xf32>
    %263 = arith.addf %261, %262 : vector<2x32xf32>
    %cst_118 = arith.constant dense<0.000000e+00> : vector<2x32xf32>
    %264 = tpu.matmul %256, %9, %cst_118 {dimension_numbers = #tpu.dot_dimension_numbers<[1], [0], [0], [1], [0, 0, 1, 1], [], []>} : vector<2x16xbf16>, vector<16x32xbf16>, vector<2x32xf32> -> vector<2x32xf32>
    %265 = vector.broadcast %21 : vector<1x32xf32> to vector<2x32xf32>
    %266 = arith.addf %264, %265 : vector<2x32xf32>
    %cst_119 = arith.constant dense<0.000000e+00> : vector<2x32xf32>
    %267 = tpu.matmul %257, %11, %cst_119 {dimension_numbers = #tpu.dot_dimension_numbers<[1], [0], [0], [1], [0, 0, 1, 1], [], []>} : vector<2x32xbf16>, vector<32x32xbf16>, vector<2x32xf32> -> vector<2x32xf32>
    %cst_120 = arith.constant dense<0.000000e+00> : vector<2x32xf32>
    %268 = tpu.matmul %257, %13, %cst_120 {dimension_numbers = #tpu.dot_dimension_numbers<[1], [0], [0], [1], [0, 0, 1, 1], [], []>} : vector<2x32xbf16>, vector<32x32xbf16>, vector<2x32xf32> -> vector<2x32xf32>
    %cst_121 = arith.constant dense<0.000000e+00> : vector<2x32xf32>
    %269 = tpu.matmul %257, %15, %cst_121 {dimension_numbers = #tpu.dot_dimension_numbers<[1], [0], [0], [1], [0, 0, 1, 1], [], []>} : vector<2x32xbf16>, vector<32x32xbf16>, vector<2x32xf32> -> vector<2x32xf32>
    %270 = arith.addf %260, %267 : vector<2x32xf32>
    %271 = arith.negf %270 : vector<2x32xf32>
    %272 = math.exp %271 : vector<2x32xf32>
    %cst_122 = arith.constant 1.000000e+00 : f32
    %273 = vector.broadcast %cst_122 : f32 to vector<2x32xf32>
    %274 = arith.addf %273, %272 : vector<2x32xf32>
    %275 = arith.divf %273, %274 : vector<2x32xf32>
    %276 = arith.addf %263, %268 : vector<2x32xf32>
    %277 = arith.negf %276 : vector<2x32xf32>
    %278 = math.exp %277 : vector<2x32xf32>
    %cst_123 = arith.constant 1.000000e+00 : f32
    %279 = vector.broadcast %cst_123 : f32 to vector<2x32xf32>
    %280 = arith.addf %279, %278 : vector<2x32xf32>
    %281 = arith.divf %279, %280 : vector<2x32xf32>
    %282 = vector.broadcast %3 : vector<1x32xf32> to vector<2x32xf32>
    %283 = arith.addf %269, %282 : vector<2x32xf32>
    %284 = arith.mulf %275, %283 : vector<2x32xf32>
    %285 = arith.addf %266, %284 : vector<2x32xf32>
    %286 = math.tanh %285 : vector<2x32xf32>
    %cst_124 = arith.constant 1.000000e+00 : f32
    %287 = vector.broadcast %cst_124 : f32 to vector<2x32xf32>
    %288 = arith.subf %287, %281 : vector<2x32xf32>
    %289 = arith.mulf %288, %286 : vector<2x32xf32>
    %290 = arith.mulf %281, %252 : vector<2x32xf32>
    %291 = arith.addf %289, %290 : vector<2x32xf32>
    %c0_125 = arith.constant 0 : index
    %c0_126 = arith.constant 0 : index
    %292 = vector.load %arg8[%c0_125, %c0_126] : memref<2x32xf32, #tpu.memory_space<vmem>>, vector<2x32xf32>
    tpu.vector_store %arg8[%c0_125, %c0_126], %291 {strides = array<i32>} : memref<2x32xf32, #tpu.memory_space<vmem>>, vector<2x32xf32>,
    %293 = arith.truncf %291 : vector<2x32xf32> to vector<2x32xbf16>
    %294 = arith.index_cast %c5_i32 : i32 to index
    %c0_127 = arith.constant 0 : index
    %c0_128 = arith.constant 0 : index
    %295 = vector.load %arg7[%294, %c0_127, %c0_128] : memref<8x2x32xbf16, #tpu.memory_space<vmem>>, vector<1x2x32xbf16>
    %296 = vector.shape_cast %295 : vector<1x2x32xbf16> to vector<2x32xbf16>
    %297 = vector.shape_cast %293 : vector<2x32xbf16> to vector<1x2x32xbf16>
    tpu.vector_store %arg7[%294, %c0_127, %c0_128], %297 {strides = array<i32>} : memref<8x2x32xbf16, #tpu.memory_space<vmem>>, vector<1x2x32xbf16>,
    %c6_i32 = arith.constant 6 : i32
    %c0_129 = arith.constant 0 : index
    %c0_130 = arith.constant 0 : index
    %298 = vector.load %arg8[%c0_129, %c0_130] : memref<2x32xf32, #tpu.memory_space<vmem>>, vector<2x32xf32>
    %299 = arith.index_cast %c6_i32 : i32 to index
    %c0_131 = arith.constant 0 : index
    %c0_132 = arith.constant 0 : index
    %300 = vector.load %arg2[%299, %c0_131, %c0_132] : memref<8x2x16xf32, #tpu.memory_space<vmem>>, vector<1x2x16xf32>
    %301 = vector.shape_cast %300 : vector<1x2x16xf32> to vector<2x16xf32>
    %302 = arith.truncf %301 : vector<2x16xf32> to vector<2x16xbf16>
    %303 = arith.truncf %298 : vector<2x32xf32> to vector<2x32xbf16>
    %cst_133 = arith.constant dense<0.000000e+00> : vector<2x32xf32>
    %304 = tpu.matmul %302, %5, %cst_133 {dimension_numbers = #tpu.dot_dimension_numbers<[1], [0], [0], [1], [0, 0, 1, 1], [], []>} : vector<2x16xbf16>, vector<16x32xbf16>, vector<2x32xf32> -> vector<2x32xf32>
    %305 = vector.broadcast %17 : vector<1x32xf32> to vector<2x32xf32>
    %306 = arith.addf %304, %305 : vector<2x32xf32>
    %cst_134 = arith.constant dense<0.000000e+00> : vector<2x32xf32>
    %307 = tpu.matmul %302, %7, %cst_134 {dimension_numbers = #tpu.dot_dimension_numbers<[1], [0], [0], [1], [0, 0, 1, 1], [], []>} : vector<2x16xbf16>, vector<16x32xbf16>, vector<2x32xf32> -> vector<2x32xf32>
    %308 = vector.broadcast %19 : vector<1x32xf32> to vector<2x32xf32>
    %309 = arith.addf %307, %308 : vector<2x32xf32>
    %cst_135 = arith.constant dense<0.000000e+00> : vector<2x32xf32>
    %310 = tpu.matmul %302, %9, %cst_135 {dimension_numbers = #tpu.dot_dimension_numbers<[1], [0], [0], [1], [0, 0, 1, 1], [], []>} : vector<2x16xbf16>, vector<16x32xbf16>, vector<2x32xf32> -> vector<2x32xf32>
    %311 = vector.broadcast %21 : vector<1x32xf32> to vector<2x32xf32>
    %312 = arith.addf %310, %311 : vector<2x32xf32>
    %cst_136 = arith.constant dense<0.000000e+00> : vector<2x32xf32>
    %313 = tpu.matmul %303, %11, %cst_136 {dimension_numbers = #tpu.dot_dimension_numbers<[1], [0], [0], [1], [0, 0, 1, 1], [], []>} : vector<2x32xbf16>, vector<32x32xbf16>, vector<2x32xf32> -> vector<2x32xf32>
    %cst_137 = arith.constant dense<0.000000e+00> : vector<2x32xf32>
    %314 = tpu.matmul %303, %13, %cst_137 {dimension_numbers = #tpu.dot_dimension_numbers<[1], [0], [0], [1], [0, 0, 1, 1], [], []>} : vector<2x32xbf16>, vector<32x32xbf16>, vector<2x32xf32> -> vector<2x32xf32>
    %cst_138 = arith.constant dense<0.000000e+00> : vector<2x32xf32>
    %315 = tpu.matmul %303, %15, %cst_138 {dimension_numbers = #tpu.dot_dimension_numbers<[1], [0], [0], [1], [0, 0, 1, 1], [], []>} : vector<2x32xbf16>, vector<32x32xbf16>, vector<2x32xf32> -> vector<2x32xf32>
    %316 = arith.addf %306, %313 : vector<2x32xf32>
    %317 = arith.negf %316 : vector<2x32xf32>
    %318 = math.exp %317 : vector<2x32xf32>
    %cst_139 = arith.constant 1.000000e+00 : f32
    %319 = vector.broadcast %cst_139 : f32 to vector<2x32xf32>
    %320 = arith.addf %319, %318 : vector<2x32xf32>
    %321 = arith.divf %319, %320 : vector<2x32xf32>
    %322 = arith.addf %309, %314 : vector<2x32xf32>
    %323 = arith.negf %322 : vector<2x32xf32>
    %324 = math.exp %323 : vector<2x32xf32>
    %cst_140 = arith.constant 1.000000e+00 : f32
    %325 = vector.broadcast %cst_140 : f32 to vector<2x32xf32>
    %326 = arith.addf %325, %324 : vector<2x32xf32>
    %327 = arith.divf %325, %326 : vector<2x32xf32>
    %328 = vector.broadcast %3 : vector<1x32xf32> to vector<2x32xf32>
    %329 = arith.addf %315, %328 : vector<2x32xf32>
    %330 = arith.mulf %321, %329 : vector<2x32xf32>
    %331 = arith.addf %312, %330 : vector<2x32xf32>
    %332 = math.tanh %331 : vector<2x32xf32>
    %cst_141 = arith.constant 1.000000e+00 : f32
    %333 = vector.broadcast %cst_141 : f32 to vector<2x32xf32>
    %334 = arith.subf %333, %327 : vector<2x32xf32>
    %335 = arith.mulf %334, %332 : vector<2x32xf32>
    %336 = arith.mulf %327, %298 : vector<2x32xf32>
    %337 = arith.addf %335, %336 : vector<2x32xf32>
    %c0_142 = arith.constant 0 : index
    %c0_143 = arith.constant 0 : index
    %338 = vector.load %arg8[%c0_142, %c0_143] : memref<2x32xf32, #tpu.memory_space<vmem>>, vector<2x32xf32>
    tpu.vector_store %arg8[%c0_142, %c0_143], %337 {strides = array<i32>} : memref<2x32xf32, #tpu.memory_space<vmem>>, vector<2x32xf32>,
    %339 = arith.truncf %337 : vector<2x32xf32> to vector<2x32xbf16>
    %340 = arith.index_cast %c6_i32 : i32 to index
    %c0_144 = arith.constant 0 : index
    %c0_145 = arith.constant 0 : index
    %341 = vector.load %arg7[%340, %c0_144, %c0_145] : memref<8x2x32xbf16, #tpu.memory_space<vmem>>, vector<1x2x32xbf16>
    %342 = vector.shape_cast %341 : vector<1x2x32xbf16> to vector<2x32xbf16>
    %343 = vector.shape_cast %339 : vector<2x32xbf16> to vector<1x2x32xbf16>
    tpu.vector_store %arg7[%340, %c0_144, %c0_145], %343 {strides = array<i32>} : memref<8x2x32xbf16, #tpu.memory_space<vmem>>, vector<1x2x32xbf16>,
    %c7_i32 = arith.constant 7 : i32
    %c0_146 = arith.constant 0 : index
    %c0_147 = arith.constant 0 : index
    %344 = vector.load %arg8[%c0_146, %c0_147] : memref<2x32xf32, #tpu.memory_space<vmem>>, vector<2x32xf32>
    %345 = arith.index_cast %c7_i32 : i32 to index
    %c0_148 = arith.constant 0 : index
    %c0_149 = arith.constant 0 : index
    %346 = vector.load %arg2[%345, %c0_148, %c0_149] : memref<8x2x16xf32, #tpu.memory_space<vmem>>, vector<1x2x16xf32>
    %347 = vector.shape_cast %346 : vector<1x2x16xf32> to vector<2x16xf32>
    %348 = arith.truncf %347 : vector<2x16xf32> to vector<2x16xbf16>
    %349 = arith.truncf %344 : vector<2x32xf32> to vector<2x32xbf16>
    %cst_150 = arith.constant dense<0.000000e+00> : vector<2x32xf32>
    %350 = tpu.matmul %348, %5, %cst_150 {dimension_numbers = #tpu.dot_dimension_numbers<[1], [0], [0], [1], [0, 0, 1, 1], [], []>} : vector<2x16xbf16>, vector<16x32xbf16>, vector<2x32xf32> -> vector<2x32xf32>
    %351 = vector.broadcast %17 : vector<1x32xf32> to vector<2x32xf32>
    %352 = arith.addf %350, %351 : vector<2x32xf32>
    %cst_151 = arith.constant dense<0.000000e+00> : vector<2x32xf32>
    %353 = tpu.matmul %348, %7, %cst_151 {dimension_numbers = #tpu.dot_dimension_numbers<[1], [0], [0], [1], [0, 0, 1, 1], [], []>} : vector<2x16xbf16>, vector<16x32xbf16>, vector<2x32xf32> -> vector<2x32xf32>
    %354 = vector.broadcast %19 : vector<1x32xf32> to vector<2x32xf32>
    %355 = arith.addf %353, %354 : vector<2x32xf32>
    %cst_152 = arith.constant dense<0.000000e+00> : vector<2x32xf32>
    %356 = tpu.matmul %348, %9, %cst_152 {dimension_numbers = #tpu.dot_dimension_numbers<[1], [0], [0], [1], [0, 0, 1, 1], [], []>} : vector<2x16xbf16>, vector<16x32xbf16>, vector<2x32xf32> -> vector<2x32xf32>
    %357 = vector.broadcast %21 : vector<1x32xf32> to vector<2x32xf32>
    %358 = arith.addf %356, %357 : vector<2x32xf32>
    %cst_153 = arith.constant dense<0.000000e+00> : vector<2x32xf32>
    %359 = tpu.matmul %349, %11, %cst_153 {dimension_numbers = #tpu.dot_dimension_numbers<[1], [0], [0], [1], [0, 0, 1, 1], [], []>} : vector<2x32xbf16>, vector<32x32xbf16>, vector<2x32xf32> -> vector<2x32xf32>
    %cst_154 = arith.constant dense<0.000000e+00> : vector<2x32xf32>
    %360 = tpu.matmul %349, %13, %cst_154 {dimension_numbers = #tpu.dot_dimension_numbers<[1], [0], [0], [1], [0, 0, 1, 1], [], []>} : vector<2x32xbf16>, vector<32x32xbf16>, vector<2x32xf32> -> vector<2x32xf32>
    %cst_155 = arith.constant dense<0.000000e+00> : vector<2x32xf32>
    %361 = tpu.matmul %349, %15, %cst_155 {dimension_numbers = #tpu.dot_dimension_numbers<[1], [0], [0], [1], [0, 0, 1, 1], [], []>} : vector<2x32xbf16>, vector<32x32xbf16>, vector<2x32xf32> -> vector<2x32xf32>
    %362 = arith.addf %352, %359 : vector<2x32xf32>
    %363 = arith.negf %362 : vector<2x32xf32>
    %364 = math.exp %363 : vector<2x32xf32>
    %cst_156 = arith.constant 1.000000e+00 : f32
    %365 = vector.broadcast %cst_156 : f32 to vector<2x32xf32>
    %366 = arith.addf %365, %364 : vector<2x32xf32>
    %367 = arith.divf %365, %366 : vector<2x32xf32>
    %368 = arith.addf %355, %360 : vector<2x32xf32>
    %369 = arith.negf %368 : vector<2x32xf32>
    %370 = math.exp %369 : vector<2x32xf32>
    %cst_157 = arith.constant 1.000000e+00 : f32
    %371 = vector.broadcast %cst_157 : f32 to vector<2x32xf32>
    %372 = arith.addf %371, %370 : vector<2x32xf32>
    %373 = arith.divf %371, %372 : vector<2x32xf32>
    %374 = vector.broadcast %3 : vector<1x32xf32> to vector<2x32xf32>
    %375 = arith.addf %361, %374 : vector<2x32xf32>
    %376 = arith.mulf %367, %375 : vector<2x32xf32>
    %377 = arith.addf %358, %376 : vector<2x32xf32>
    %378 = math.tanh %377 : vector<2x32xf32>
    %cst_158 = arith.constant 1.000000e+00 : f32
    %379 = vector.broadcast %cst_158 : f32 to vector<2x32xf32>
    %380 = arith.subf %379, %373 : vector<2x32xf32>
    %381 = arith.mulf %380, %378 : vector<2x32xf32>
    %382 = arith.mulf %373, %344 : vector<2x32xf32>
    %383 = arith.addf %381, %382 : vector<2x32xf32>
    %c0_159 = arith.constant 0 : index
    %c0_160 = arith.constant 0 : index
    %384 = vector.load %arg8[%c0_159, %c0_160] : memref<2x32xf32, #tpu.memory_space<vmem>>, vector<2x32xf32>
    tpu.vector_store %arg8[%c0_159, %c0_160], %383 {strides = array<i32>} : memref<2x32xf32, #tpu.memory_space<vmem>>, vector<2x32xf32>,
    %385 = arith.truncf %383 : vector<2x32xf32> to vector<2x32xbf16>
    %386 = arith.index_cast %c7_i32 : i32 to index
    %c0_161 = arith.constant 0 : index
    %c0_162 = arith.constant 0 : index
    %387 = vector.load %arg7[%386, %c0_161, %c0_162] : memref<8x2x32xbf16, #tpu.memory_space<vmem>>, vector<1x2x32xbf16>
    %388 = vector.shape_cast %387 : vector<1x2x32xbf16> to vector<2x32xbf16>
    %389 = vector.shape_cast %385 : vector<2x32xbf16> to vector<1x2x32xbf16>
    tpu.vector_store %arg7[%386, %c0_161, %c0_162], %389 {strides = array<i32>} : memref<8x2x32xbf16, #tpu.memory_space<vmem>>, vector<1x2x32xbf16>,
    %c8_i32 = arith.constant 8 : i32
    return
  }
  func.func @transform_0(%arg0: i32, %arg1: i32) -> (i32, i32, i32) {
    %c0_i32 = arith.constant 0 : i32
    %c0_i32_0 = arith.constant 0 : i32
    return %arg1, %arg0, %c0_i32 : i32, i32, i32
  }
  func.func @transform_1(%arg0: i32, %arg1: i32) -> (i32, i32, i32) {
    %c0_i32 = arith.constant 0 : i32
    %c0_i32_0 = arith.constant 0 : i32
    %c0_i32_1 = arith.constant 0 : i32
    %c0_i32_2 = arith.constant 0 : i32
    return %c0_i32, %c0_i32_0, %c0_i32_1 : i32, i32, i32
  }
  func.func @transform_2(%arg0: i32, %arg1: i32) -> (i32, i32, i32) {
    %c0_i32 = arith.constant 0 : i32
    %c0_i32_0 = arith.constant 0 : i32
    %c0_i32_1 = arith.constant 0 : i32
    %c0_i32_2 = arith.constant 0 : i32
    return %c0_i32, %c0_i32_0, %c0_i32_1 : i32, i32, i32
  }
  func.func @transform_3(%arg0: i32, %arg1: i32) -> (i32, i32, i32) {
    %c0_i32 = arith.constant 0 : i32
    %c0_i32_0 = arith.constant 0 : i32
    %c0_i32_1 = arith.constant 0 : i32
    %c0_i32_2 = arith.constant 0 : i32
    return %c0_i32, %c0_i32_0, %c0_i32_1 : i32, i32, i32
  }
  func.func @transform_4(%arg0: i32, %arg1: i32) -> (i32, i32) {
    %c0_i32 = arith.constant 0 : i32
    %c0_i32_0 = arith.constant 0 : i32
    %c0_i32_1 = arith.constant 0 : i32
    return %c0_i32, %c0_i32_0 : i32, i32
  }
  func.func @transform_5(%arg0: i32, %arg1: i32) -> (i32, i32, i32) {
    %c0_i32 = arith.constant 0 : i32
    %c0_i32_0 = arith.constant 0 : i32
    return %arg1, %arg0, %c0_i32 : i32, i32, i32
  }
}

</mosaic_0001>

<bundles_post_ra>
// kernel: gru_forward.3
= control target key start
LH: loop header
LB: loop body
LE: loop exit
PB: predicated region body
PF: predicated region fallthrough
CT: control target
= control target key end

     0   :  { %v3293_v1 = vmov 0.0   ;;  %vm3294_vm0 = vmmov 0   ;;  %vm32_vm1 = vcmask 254976   ;;  %vm89_vm2 = vcmask 261120   ;;  %s3911_s0 = inlined_call_operand.vmem [shape: bf16[8,2,32], index: 0, kind: input, shape index: {}]   ;;  %s3912_s1 = inlined_call_operand.vmem [shape: bf16[3,32,32], index: 1, kind: input, shape index: {}]   ;;  %s3913_s2 = inlined_call_operand.vmem [shape: f32[3,1,32], index: 2, kind: input, shape index: {}]   ;;  %s3914_s3 = inlined_call_operand.vmem [shape: bf16[3,32,32], index: 3, kind: input, shape index: {}]   ;;  %s3915_s4 = inlined_call_operand.vmem [shape: f32[1,32], index: 4, kind: input, shape index: {}]   ;;  %s3916_s5 = inlined_call_operand.vmem [shape: bf16[32,4], index: 5, kind: input, shape index: {}]   ;;  %s3917_s6 = inlined_call_operand.vmem [shape: f32[1,4], index: 6, kind: input, shape index: {}]   ;;  %s3918_s7 = inlined_call_operand.hbm [shape: f32[2,4], index: 7, kind: output, shape index: {}]  }
   0x1   :  { %v3339_v0 = vld [vmem:[%s3912_s1] sm:$0xff]   ;;  %2684 = vmatprep.subr.bf16.mxu0 %v3293_v1  ;;  %2692 = vmatprep.subr.bf16.mxu1 %v3293_v1  ;;  %v3346_v2 = vld [vmem:[%s3912_s1 + $0x10] sm:$0xff]   ;;  %v3352_v3 = vld [vmem:[%s3912_s1 + $0x8] sm:$0xff]   ;;  %33 = vst.msk [vmem:[#allocation2] sm:$0x3] %vm32_vm1, %v3293_v1 }
   0x2   :  { %2685 = vmatpush3.bf16.msra.mxu0 %v3339_v0  ;;  %2688 = vmatprep.mubr.msk.bf16.mxu0 %vm3294_vm0, %v3293_v1  ;;  %v3362_v4 = vld [vmem:[%s3912_s1 + $0x18] sm:$0xff]   ;;  %v69_v5 = vld [vmem:[%s3911_s0] sm:$0x1]  ;;  %v3383_v7 = vld [vmem:[%s3914_s3 + $0x10] sm:$0xff]  }
   0x3   :  { %2686 = vmatprep.subr.bf16.mxu0 %v3293_v1  ;;  %2693 = vmatpush3.bf16.msra.mxu1 %v3346_v2  ;;  %v3375_v6 = vld [vmem:[%s3912_s1 + $0x20] sm:$0xff]   ;;  %v3391_v8 = vld [vmem:[%s3912_s1 + $0x28] sm:$0xff]   ;;  %v3400_v9 = vld [vmem:[%s3914_s3 + $0x18] sm:$0xff]  }
   0x4   :  { %2694 = vmatprep.subr.bf16.mxu1 %v3293_v1  ;;  %2696 = vmatprep.mubr.msk.bf16.mxu1 %vm3294_vm0, %v3293_v1  ;;  %v3409_v10 = vld [vmem:[%s3914_s3] sm:$0xff]  }
   0x6   :  { %2687 = vmatpush3.bf16.msra.mxu0 %v3352_v3 }
   0x7   :  { %2695 = vmatpush3.bf16.msra.mxu1 %v3362_v4  ;;  %2700 = vmatprep.subr.bf16.mxu0 %v3293_v1 }
   0x8   :  { %2716 = vmatprep.subr.bf16.mxu1 %v3293_v1 }
   0x9   :  { %2689 = vmatmul.mubr.msk.bf16.vlgmr.msra.gmra.mrb[0].mxu0 %vm89_vm2, %v69_v5 }
   0xa   :  { %2701 = vmatpush3.bf16.msra.mxu0 %v3375_v6  ;;  %2697 = vmatmul.mubr.msk.bf16.vlgmr.msra.gmra.mrb[0].mxu1 %vm89_vm2, %v69_v5 }
   0xb   :  { %2702 = vmatprep.subr.bf16.mxu0 %v3293_v1  ;;  %2704 = vmatprep.mubr.msk.bf16.mxu0 %vm3294_vm0, %v3293_v1 }
   0xc   :  { %2717 = vmatpush3.bf16.msra.mxu1 %v3383_v7  ;;  %2720 = vmatprep.mubr.msk.bf16.mxu1 %vm3294_vm0, %v3293_v1 }
   0xd   :  { %2718 = vmatprep.subr.bf16.mxu1 %v3293_v1 }
   0xe   :  { %2703 = vmatpush3.bf16.msra.mxu0 %v3391_v8 }
   0xf   :  { %12 = vsyncpa [#allocation4], 0  ;;  %2708 = vmatprep.subr.bf16.mxu0 %v3293_v1  ;;  %v3412_v11 = vld [vmem:[#allocation2] sm:$0x3]  ;;  %v3421_v12 = vld [vmem:[%s3914_s3 + $0x8] sm:$0xff]   ;;  %vm2412_vm3 = vcmask 25600  }
  0x10   :  { %2719 = vmatpush3.bf16.msra.mxu1 %v3400_v9  ;;  %v70_v13 = vpack.c.bf16 %v3412_v11, %v3412_v11  ;;  %v3431_v14 = vld [vmem:[%s3914_s3 + $0x20] sm:$0xff]   ;;  %v3439_v15 = vld [vmem:[%s3914_s3 + $0x28] sm:$0xff]  }
  0x11   :  { %2705 = vmatmul.mubr.msk.bf16.vlgmr.msra.gmra.mrb[4].mxu0 %vm89_vm2, %v69_v5  ;;  %2724 = vmatprep.subr.bf16.mxu1 %v3293_v1  ;;  %v2470_v16 = vld [vmem:[%s3911_s0 + $0x1] sm:$0x1]  ;;  %v3488_v22 = vld [vmem:[%s3913_s2] ss:$0 sm:$0xff]  ;;  %v3506_v45 = vld [vmem:[%s3913_s2 + $0x2] ss:$0 sm:$0xff] }
  0x12   :  { %2709 = vmatpush3.bf16.msra.mxu0 %v3409_v10  ;;  %2712 = vmatprep.mubr.msk.bf16.mxu0 %vm3294_vm0, %v3293_v1  ;;  %v3493_v27 = vld [vmem:[%s3913_s2 + $0x1] ss:$0 sm:$0xff]  ;;  %v3500_v42 = vld [vmem:[%s3915_s4] ss:$0 sm:$0xff]  ;;  %v2479_v62 = vld [vmem:[%s3911_s0 + $0x2] sm:$0x1] }
  0x13   :  { %2710 = vmatprep.subr.bf16.mxu0 %v3293_v1 }
  0x16   :  { %2711 = vmatpush3.bf16.msra.mxu0 %v3421_v12  ;;  %2721 = vmatmul.mubr.msk.bf16.vlgmr.msra.gmra.mrb[0].mxu1 %vm89_vm2, %v70_v13 }
  0x17   :  { %2725 = vmatpush3.bf16.msra.mxu1 %v3431_v14  ;;  %2728 = vmatprep.mubr.msk.bf16.mxu1 %vm3294_vm0, %v3293_v1 }
  0x18   :  { %2726 = vmatprep.subr.bf16.mxu1 %v3293_v1  ;;  %2732 = vmatprep.subr.bf16.mxu0 %v3293_v1 }
  0x19   :  { %2713 = vmatmul.mubr.msk.bf16.vlgmr.msra.gmra.mrb[0].mxu0 %vm89_vm2, %v70_v13 }
  0x1a   :  { %2733 = vmatpush3.bf16.msra.mxu0 %v3339_v0  ;;  %2736 = vmatprep.mubr.msk.bf16.mxu0 %vm3294_vm0, %v3293_v1 }
  0x1b   :  { %2727 = vmatpush3.bf16.msra.mxu1 %v3439_v15  ;;  %2734 = vmatprep.subr.bf16.mxu0 %v3293_v1 }
  0x1c   :  { %2740 = vmatprep.subr.bf16.mxu1 %v3293_v1 }
  0x1e   :  { %2729 = vmatmul.mubr.msk.bf16.vlgmr.msra.gmra.mrb[4].mxu1 %vm89_vm2, %v70_v13  ;;  %2735 = vmatpush3.bf16.msra.mxu0 %v3352_v3 }
  0x1f   :  { %2741 = vmatpush3.bf16.msra.mxu1 %v3346_v2  ;;  %2748 = vmatprep.subr.bf16.mxu0 %v3293_v1 }
  0x20   :  { %2742 = vmatprep.subr.bf16.mxu1 %v3293_v1  ;;  %2744 = vmatprep.mubr.msk.bf16.mxu1 %vm3294_vm0, %v3293_v1 }
  0x21   :  { %2737 = vmatmul.mubr.msk.bf16.vlgmr.msra.gmra.mrb[8].mxu0 %vm89_vm2, %v2470_v16 }
  0x22   :  { %2749 = vmatpush3.bf16.msra.mxu0 %v3375_v6  ;;  %2752 = vmatprep.mubr.msk.bf16.mxu0 %vm3294_vm0, %v3293_v1 }
  0x23   :  { %2743 = vmatpush3.bf16.msra.mxu1 %v3362_v4  ;;  %2750 = vmatprep.subr.bf16.mxu0 %v3293_v1 }
  0x24   :  { %2764 = vmatprep.subr.bf16.mxu1 %v3293_v1 }
  0x26   :  { %2745 = vmatmul.mubr.msk.bf16.vlgmr.msra.gmra.mrb[8].mxu1 %vm89_vm2, %v2470_v16  ;;  %2751 = vmatpush3.bf16.msra.mxu0 %v3391_v8 }
  0x27   :  { %2765 = vmatpush3.bf16.msra.mxu1 %v3383_v7  ;;  %2768 = vmatprep.mubr.msk.bf16.mxu1 %vm3294_vm0, %v3293_v1 }
  0x28   :  { %2766 = vmatprep.subr.bf16.mxu1 %v3293_v1  ;;  %2756 = vmatprep.subr.bf16.mxu0 %v3293_v1 }
  0x29   :  { %2753 = vmatmul.mubr.msk.bf16.vlgmr.msra.gmra.mrb[12].mxu0 %vm89_vm2, %v2470_v16 }
  0x2a   :  { %2757 = vmatpush3.bf16.msra.mxu0 %v3409_v10  ;;  %2760 = vmatprep.mubr.msk.bf16.mxu0 %vm3294_vm0, %v3293_v1 }
  0x2b   :  { %2767 = vmatpush3.bf16.msra.mxu1 %v3400_v9  ;;  %2758 = vmatprep.subr.bf16.mxu0 %v3293_v1 }
  0x2c   :  { %2772 = vmatprep.subr.bf16.mxu1 %v3293_v1 }
  0x2e   :  { %2759 = vmatpush3.bf16.msra.mxu0 %v3421_v12 }
  0x2f   :  { %2780 = vmatprep.subr.bf16.mxu0 %v3293_v1 }
  0xe4   :  { %v243_v17 = vpop.f32.mrb[4].mxu0 }
  0xe5   :  { %v2706_v18 = vpop.f32.mrb[5].mxu0  ;;  %v244_v47 = vadd.f32 %v3506_v45, %v243_v17 }
  0xe6   :  { %v246_v19 = vpop.f32.mrb[6].mxu0 }
  0xe7   :  { %v2707_v20 = vpop.f32.mrb[7].mxu0 }
  0xe9   :  { %v350_v21 = vpop.f32.mrb[0].mxu1 }
  0xea   :  { %v2722_v23 = vpop.f32.mrb[1].mxu1  ;;  %v3077_v33 = vadd.f32 %v3493_v27, %v350_v21 }
  0xeb   :  { %v353_v24 = vpop.f32.mrb[2].mxu1 }
  0xec   :  { %v298_v25 = vpop.f32.mrb[0].mxu0  ;;  %v2723_v26 = vpop.f32.mrb[3].mxu1  ;;  %v2465_v37 = vmul.f32 -1.442695, %v3077_v33 }
  0xed   :  { %v3076_v28 = vadd.f32 %v3488_v22, %v298_v25  ;;  %v2714_v29 = vpop.f32.mrb[1].mxu0 }
  0xee   :  { %v301_v30 = vpop.f32.mrb[2].mxu0 }
  0xef   :  { %v2464_v31 = vmul.f32 -1.442695, %v3076_v28  ;;  %v2715_v32 = vpop.f32.mrb[3].mxu0 }
  0xf1   :  { %3173 = vpow2.f32 %v2464_v31  ;;  %v422_v34 = vpop.f32.mrb[4].mxu1 }
  0xf2   :  { %v2730_v35 = vpop.f32.mrb[5].mxu1  ;;  %3175 = vpow2.f32 %v2465_v37  ;;  %v423_v44 = vadd.f32 %v3500_v42, %v422_v34 }
  0xf3   :  { %v425_v36 = vpop.f32.mrb[6].mxu1 }
  0xf4   :  { %v2731_v38 = vpop.f32.mrb[7].mxu1 }
  0xfb   :  { %v3174_v39 = vpop.eup %3173 }
  0xfc   :  { %v360_v40 = vadd.f32 1.0, %v3174_v39  ;;  %v3176_v41 = vpop.eup %3175  ;;  %v558_v58 = vpop.f32.mrb[12].mxu0 }
  0xfd   :  { %v367_v43 = vadd.f32 1.0, %v3176_v41  ;;  %v2754_v59 = vpop.f32.mrb[13].mxu0  ;;  %v559_v36 = vadd.f32 %v3506_v45, %v558_v58 }
  0xfe   :  { %3177 = vrcp.f32 %v360_v40  ;;  %v561_v60 = vpop.f32.mrb[14].mxu0 }
  0xff   :  { %3179 = vrcp.f32 %v367_v43  ;;  %v2755_v61 = vpop.f32.mrb[15].mxu0 }
 0x108   :  { %v3178_v46 = vpop.eup %3177 }
 0x109   :  { %v428_v48 = vmul.f32 %v3178_v46, %v423_v44  ;;  %v3180_v50 = vpop.eup %3179 }
 0x10a   :  { %v431_v51 = vsub.f32 1.0, %v3180_v50  ;;  %v433_v53 = vmul.f32 %v3180_v50, %v3412_v11 }
 0x10b   :  { %v429_v49 = vadd.f32 %v428_v48, %v244_v47 }
 0x10d   :  { %3181 = vtanh.f32 %v429_v49 }
 0x117   :  { %v3182_v52 = vpop.eup %3181 }
 0x118   :  { %v432_v54 = vmul.f32 %v3182_v52, %v431_v51 }
 0x11a   :  { %v434_v55 = vadd.f32 %v433_v53, %v432_v54  ;;  %v2488_v53 = vld [vmem:[%s3911_s0 + $0x3] sm:$0x1] }
 0x11c   :  { %436 = vst.msk [vmem:[#allocation2] sm:$0x3] %vm32_vm1, %v434_v55 }
 0x123   :  { %v3511_v56 = vld [vmem:[#allocation2] sm:$0x3] }
 0x124   :  { %v440_v57 = vpack.c.bf16 %v3511_v56, %v3511_v56 }
 0x126   :  { %2761 = vmatmul.mubr.msk.bf16.vlgmr.msra.gmra.mrb[8].mxu0 %vm89_vm2, %v440_v57  ;;  %2769 = vmatmul.mubr.msk.bf16.vlgmr.msra.gmra.mrb[8].mxu1 %vm89_vm2, %v440_v57 }
 0x127   :  { %2773 = vmatpush3.bf16.msra.mxu1 %v3431_v14  ;;  %2776 = vmatprep.mubr.msk.bf16.mxu1 %vm3294_vm0, %v3293_v1 }
 0x128   :  { %2774 = vmatprep.subr.bf16.mxu1 %v3293_v1  ;;  %2781 = vmatpush3.bf16.msra.mxu0 %v3339_v0 }
 0x129   :  { %2782 = vmatprep.subr.bf16.mxu0 %v3293_v1  ;;  %2784 = vmatprep.mubr.msk.bf16.mxu0 %vm3294_vm0, %v3293_v1 }
 0x12b   :  { %2775 = vmatpush3.bf16.msra.mxu1 %v3439_v15 }
 0x12c   :  { %2783 = vmatpush3.bf16.msra.mxu0 %v3352_v3  ;;  %2788 = vmatprep.subr.bf16.mxu1 %v3293_v1 }
 0x12d   :  { %2796 = vmatprep.subr.bf16.mxu0 %v3293_v1 }
 0x12e   :  { %2777 = vmatmul.mubr.msk.bf16.vlgmr.msra.gmra.mrb[12].mxu1 %vm89_vm2, %v440_v57 }
 0x12f   :  { %2789 = vmatpush3.bf16.msra.mxu1 %v3346_v2  ;;  %2792 = vmatprep.mubr.msk.bf16.mxu1 %vm3294_vm0, %v3293_v1 }
 0x130   :  { %2790 = vmatprep.subr.bf16.mxu1 %v3293_v1  ;;  %2785 = vmatmul.mubr.msk.bf16.vlgmr.msra.gmra.mrb[16].mxu0 %vm89_vm2, %v2479_v62 }
 0x131   :  { %2797 = vmatpush3.bf16.msra.mxu0 %v3375_v6  ;;  %2800 = vmatprep.mubr.msk.bf16.mxu0 %vm3294_vm0, %v3293_v1 }
 0x132   :  { %2798 = vmatprep.subr.bf16.mxu0 %v3293_v1 }
 0x133   :  { %2791 = vmatpush3.bf16.msra.mxu1 %v3362_v4 }
 0x134   :  { %2812 = vmatprep.subr.bf16.mxu1 %v3293_v1 }
 0x135   :  { %2799 = vmatpush3.bf16.msra.mxu0 %v3391_v8 }
 0x136   :  { %2793 = vmatmul.mubr.msk.bf16.vlgmr.msra.gmra.mrb[16].mxu1 %vm89_vm2, %v2479_v62  ;;  %2804 = vmatprep.subr.bf16.mxu0 %v3293_v1 }
 0x137   :  { %2813 = vmatpush3.bf16.msra.mxu1 %v3383_v7  ;;  %2816 = vmatprep.mubr.msk.bf16.mxu1 %vm3294_vm0, %v3293_v1 }
 0x138   :  { %2814 = vmatprep.subr.bf16.mxu1 %v3293_v1  ;;  %2801 = vmatmul.mubr.msk.bf16.vlgmr.msra.gmra.mrb[20].mxu0 %vm89_vm2, %v2479_v62 }
 0x139   :  { %2805 = vmatpush3.bf16.msra.mxu0 %v3409_v10  ;;  %2808 = vmatprep.mubr.msk.bf16.mxu0 %vm3294_vm0, %v3293_v1 }
 0x13a   :  { %2806 = vmatprep.subr.bf16.mxu0 %v3293_v1 }
 0x13b   :  { %2815 = vmatpush3.bf16.msra.mxu1 %v3400_v9 }
 0x13c   :  { %2820 = vmatprep.subr.bf16.mxu1 %v3293_v1 }
 0x13d   :  { %2807 = vmatpush3.bf16.msra.mxu0 %v3421_v12 }
 0x13e   :  { %2828 = vmatprep.subr.bf16.mxu0 %v3293_v1 }
 0x1f9   :  { %v601_v63 = vpop.f32.mrb[8].mxu0  ;;  %v641_v5 = vpop.f32.mrb[8].mxu1 }
 0x1fa   :  { %v3078_v11 = vadd.f32 %v3488_v22, %v601_v63  ;;  %v2762_v13 = vpop.f32.mrb[9].mxu0  ;;  %v2770_v16 = vpop.f32.mrb[9].mxu1  ;;  %v3079_v23 = vadd.f32 %v3493_v27, %v641_v5 }
 0x1fb   :  { %v604_v17 = vpop.f32.mrb[10].mxu0  ;;  %v644_v18 = vpop.f32.mrb[10].mxu1 }
 0x1fc   :  { %v2476_v19 = vmul.f32 -1.442695, %v3078_v11  ;;  %v2763_v20 = vpop.f32.mrb[11].mxu0  ;;  %v2771_v21 = vpop.f32.mrb[11].mxu1  ;;  %v2477_v24 = vmul.f32 -1.442695, %v3079_v23 }
 0x1fe   :  { %3183 = vpow2.f32 %v2476_v19 }
 0x1ff   :  { %3185 = vpow2.f32 %v2477_v24 }
 0x201   :  { %v695_v25 = vpop.f32.mrb[12].mxu1 }
 0x202   :  { %v2778_v26 = vpop.f32.mrb[13].mxu1  ;;  %v696_v34 = vadd.f32 %v3500_v42, %v695_v25 }
 0x203   :  { %v698_v28 = vpop.f32.mrb[14].mxu1 }
 0x204   :  { %v2779_v29 = vpop.f32.mrb[15].mxu1 }
 0x208   :  { %v3184_v30 = vpop.eup %3183 }
 0x209   :  { %v651_v31 = vadd.f32 1.0, %v3184_v30  ;;  %v3186_v32 = vpop.eup %3185 }
 0x20a   :  { %v658_v33 = vadd.f32 1.0, %v3186_v32 }
 0x20b   :  { %3187 = vrcp.f32 %v651_v31  ;;  %v830_v49 = vpop.f32.mrb[20].mxu0 }
 0x20c   :  { %3189 = vrcp.f32 %v658_v33  ;;  %v2802_v50 = vpop.f32.mrb[21].mxu0  ;;  %v831_v26 = vadd.f32 %v3506_v45, %v830_v49 }
 0x20d   :  { %v833_v51 = vpop.f32.mrb[22].mxu0 }
 0x20e   :  { %v2803_v52 = vpop.f32.mrb[23].mxu0 }
 0x215   :  { %v3188_v35 = vpop.eup %3187 }
 0x216   :  { %v701_v37 = vmul.f32 %v3188_v35, %v696_v34  ;;  %v3190_v39 = vpop.eup %3189 }
 0x217   :  { %v704_v40 = vsub.f32 1.0, %v3190_v39  ;;  %v706_v43 = vmul.f32 %v3190_v39, %v3511_v56 }
 0x218   :  { %v702_v38 = vadd.f32 %v701_v37, %v559_v36 }
 0x21a   :  { %3191 = vtanh.f32 %v702_v38 }
 0x224   :  { %v3192_v41 = vpop.eup %3191 }
 0x225   :  { %v705_v44 = vmul.f32 %v3192_v41, %v704_v40 }
 0x227   :  { %v707_v46 = vadd.f32 %v706_v43, %v705_v44  ;;  %v2497_v43 = vld [vmem:[%s3911_s0 + $0x4] sm:$0x1] }
 0x229   :  { %708 = vst.msk [vmem:[#allocation2] sm:$0x3] %vm32_vm1, %v707_v46 }
 0x230   :  { %v3566_v47 = vld [vmem:[#allocation2] sm:$0x3] }
 0x231   :  { %v712_v48 = vpack.c.bf16 %v3566_v47, %v3566_v47 }
 0x233   :  { %2809 = vmatmul.mubr.msk.bf16.vlgmr.msra.gmra.mrb[16].mxu0 %vm89_vm2, %v712_v48  ;;  %2817 = vmatmul.mubr.msk.bf16.vlgmr.msra.gmra.mrb[16].mxu1 %vm89_vm2, %v712_v48 }
 0x234   :  { %2821 = vmatpush3.bf16.msra.mxu1 %v3431_v14  ;;  %2824 = vmatprep.mubr.msk.bf16.mxu1 %vm3294_vm0, %v3293_v1 }
 0x235   :  { %2822 = vmatprep.subr.bf16.mxu1 %v3293_v1  ;;  %2829 = vmatpush3.bf16.msra.mxu0 %v3339_v0 }
 0x236   :  { %2830 = vmatprep.subr.bf16.mxu0 %v3293_v1  ;;  %2832 = vmatprep.mubr.msk.bf16.mxu0 %vm3294_vm0, %v3293_v1 }
 0x238   :  { %2823 = vmatpush3.bf16.msra.mxu1 %v3439_v15 }
 0x239   :  { %2831 = vmatpush3.bf16.msra.mxu0 %v3352_v3  ;;  %2836 = vmatprep.subr.bf16.mxu1 %v3293_v1 }
 0x23a   :  { %2844 = vmatprep.subr.bf16.mxu0 %v3293_v1 }
 0x23b   :  { %2825 = vmatmul.mubr.msk.bf16.vlgmr.msra.gmra.mrb[20].mxu1 %vm89_vm2, %v712_v48 }
 0x23c   :  { %2837 = vmatpush3.bf16.msra.mxu1 %v3346_v2  ;;  %2840 = vmatprep.mubr.msk.bf16.mxu1 %vm3294_vm0, %v3293_v1 }
 0x23d   :  { %2838 = vmatprep.subr.bf16.mxu1 %v3293_v1  ;;  %2833 = vmatmul.mubr.msk.bf16.vlgmr.msra.gmra.mrb[24].mxu0 %vm89_vm2, %v2488_v53 }
 0x23e   :  { %2845 = vmatpush3.bf16.msra.mxu0 %v3375_v6  ;;  %2848 = vmatprep.mubr.msk.bf16.mxu0 %vm3294_vm0, %v3293_v1 }
 0x23f   :  { %2846 = vmatprep.subr.bf16.mxu0 %v3293_v1 }
 0x240   :  { %2839 = vmatpush3.bf16.msra.mxu1 %v3362_v4 }
 0x241   :  { %2860 = vmatprep.subr.bf16.mxu1 %v3293_v1 }
 0x242   :  { %2847 = vmatpush3.bf16.msra.mxu0 %v3391_v8 }
 0x243   :  { %2841 = vmatmul.mubr.msk.bf16.vlgmr.msra.gmra.mrb[24].mxu1 %vm89_vm2, %v2488_v53  ;;  %2852 = vmatprep.subr.bf16.mxu0 %v3293_v1 }
 0x244   :  { %2861 = vmatpush3.bf16.msra.mxu1 %v3383_v7  ;;  %2864 = vmatprep.mubr.msk.bf16.mxu1 %vm3294_vm0, %v3293_v1 }
 0x245   :  { %2862 = vmatprep.subr.bf16.mxu1 %v3293_v1  ;;  %2849 = vmatmul.mubr.msk.bf16.vlgmr.msra.gmra.mrb[28].mxu0 %vm89_vm2, %v2488_v53 }
 0x246   :  { %2853 = vmatpush3.bf16.msra.mxu0 %v3409_v10  ;;  %2856 = vmatprep.mubr.msk.bf16.mxu0 %vm3294_vm0, %v3293_v1 }
 0x247   :  { %2854 = vmatprep.subr.bf16.mxu0 %v3293_v1 }
 0x248   :  { %2863 = vmatpush3.bf16.msra.mxu1 %v3400_v9 }
 0x249   :  { %2868 = vmatprep.subr.bf16.mxu1 %v3293_v1 }
 0x24a   :  { %2855 = vmatpush3.bf16.msra.mxu0 %v3421_v12 }
 0x24b   :  { %2876 = vmatprep.subr.bf16.mxu0 %v3293_v1 }
 0x306   :  { %v873_v54 = vpop.f32.mrb[16].mxu0  ;;  %v913_v55 = vpop.f32.mrb[16].mxu1 }
 0x307   :  { %v3080_v56 = vadd.f32 %v3488_v22, %v873_v54  ;;  %v2810_v57 = vpop.f32.mrb[17].mxu0  ;;  %v2818_v58 = vpop.f32.mrb[17].mxu1  ;;  %v3081_v5 = vadd.f32 %v3493_v27, %v913_v55 }
 0x308   :  { %v876_v59 = vpop.f32.mrb[18].mxu0  ;;  %v916_v60 = vpop.f32.mrb[18].mxu1 }
 0x309   :  { %v2485_v61 = vmul.f32 -1.442695, %v3080_v56  ;;  %v2811_v62 = vpop.f32.mrb[19].mxu0  ;;  %v2819_v63 = vpop.f32.mrb[19].mxu1  ;;  %v2486_v11 = vmul.f32 -1.442695, %v3081_v5 }
 0x30b   :  { %3193 = vpow2.f32 %v2485_v61 }
 0x30c   :  { %3195 = vpow2.f32 %v2486_v11 }
 0x30e   :  { %v967_v13 = vpop.f32.mrb[20].mxu1 }
 0x30f   :  { %v2826_v16 = vpop.f32.mrb[21].mxu1  ;;  %v968_v24 = vadd.f32 %v3500_v42, %v967_v13 }
 0x310   :  { %v970_v17 = vpop.f32.mrb[22].mxu1 }
 0x311   :  { %v2827_v18 = vpop.f32.mrb[23].mxu1 }
 0x315   :  { %v3194_v19 = vpop.eup %3193 }
 0x316   :  { %v923_v20 = vadd.f32 1.0, %v3194_v19  ;;  %v3196_v21 = vpop.eup %3195 }
 0x317   :  { %v930_v23 = vadd.f32 1.0, %v3196_v21 }
 0x318   :  { %3197 = vrcp.f32 %v923_v20  ;;  %v1102_v38 = vpop.f32.mrb[28].mxu0 }
 0x319   :  { %3199 = vrcp.f32 %v930_v23  ;;  %v2850_v39 = vpop.f32.mrb[29].mxu0  ;;  %v1103_v16 = vadd.f32 %v3506_v45, %v1102_v38 }
 0x31a   :  { %v1105_v40 = vpop.f32.mrb[30].mxu0 }
 0x31b   :  { %v2851_v41 = vpop.f32.mrb[31].mxu0 }
 0x322   :  { %v3198_v25 = vpop.eup %3197 }
 0x323   :  { %v973_v28 = vmul.f32 %v3198_v25, %v968_v24  ;;  %v3200_v30 = vpop.eup %3199 }
 0x324   :  { %v976_v31 = vsub.f32 1.0, %v3200_v30  ;;  %v978_v33 = vmul.f32 %v3200_v30, %v3566_v47 }
 0x325   :  { %v974_v29 = vadd.f32 %v973_v28, %v831_v26 }
 0x327   :  { %3201 = vtanh.f32 %v974_v29 }
 0x331   :  { %v3202_v32 = vpop.eup %3201 }
 0x332   :  { %v977_v34 = vmul.f32 %v3202_v32, %v976_v31 }
 0x334   :  { %v979_v35 = vadd.f32 %v978_v33, %v977_v34  ;;  %v2506_v33 = vld [vmem:[%s3911_s0 + $0x5] sm:$0x1] }
 0x336   :  { %980 = vst.msk [vmem:[#allocation2] sm:$0x3] %vm32_vm1, %v979_v35 }
 0x33d   :  { %v3621_v36 = vld [vmem:[#allocation2] sm:$0x3] }
 0x33e   :  { %v984_v37 = vpack.c.bf16 %v3621_v36, %v3621_v36 }
 0x340   :  { %2857 = vmatmul.mubr.msk.bf16.vlgmr.msra.gmra.mrb[24].mxu0 %vm89_vm2, %v984_v37  ;;  %2865 = vmatmul.mubr.msk.bf16.vlgmr.msra.gmra.mrb[24].mxu1 %vm89_vm2, %v984_v37 }
 0x341   :  { %2869 = vmatpush3.bf16.msra.mxu1 %v3431_v14  ;;  %2872 = vmatprep.mubr.msk.bf16.mxu1 %vm3294_vm0, %v3293_v1 }
 0x342   :  { %2870 = vmatprep.subr.bf16.mxu1 %v3293_v1  ;;  %2877 = vmatpush3.bf16.msra.mxu0 %v3339_v0 }
 0x343   :  { %2878 = vmatprep.subr.bf16.mxu0 %v3293_v1  ;;  %2880 = vmatprep.mubr.msk.bf16.mxu0 %vm3294_vm0, %v3293_v1 }
 0x345   :  { %2871 = vmatpush3.bf16.msra.mxu1 %v3439_v15 }
 0x346   :  { %2879 = vmatpush3.bf16.msra.mxu0 %v3352_v3  ;;  %2884 = vmatprep.subr.bf16.mxu1 %v3293_v1 }
 0x347   :  { %2892 = vmatprep.subr.bf16.mxu0 %v3293_v1 }
 0x348   :  { %2873 = vmatmul.mubr.msk.bf16.vlgmr.msra.gmra.mrb[28].mxu1 %vm89_vm2, %v984_v37 }
 0x349   :  { %2885 = vmatpush3.bf16.msra.mxu1 %v3346_v2  ;;  %2888 = vmatprep.mubr.msk.bf16.mxu1 %vm3294_vm0, %v3293_v1 }
 0x34a   :  { %2886 = vmatprep.subr.bf16.mxu1 %v3293_v1  ;;  %2881 = vmatmul.mubr.msk.bf16.vlgmr.msra.gmra.mrb[32].mxu0 %vm89_vm2, %v2497_v43 }
 0x34b   :  { %2893 = vmatpush3.bf16.msra.mxu0 %v3375_v6  ;;  %2896 = vmatprep.mubr.msk.bf16.mxu0 %vm3294_vm0, %v3293_v1 }
 0x34c   :  { %2894 = vmatprep.subr.bf16.mxu0 %v3293_v1 }
 0x34d   :  { %2887 = vmatpush3.bf16.msra.mxu1 %v3362_v4 }
 0x34e   :  { %2908 = vmatprep.subr.bf16.mxu1 %v3293_v1 }
 0x34f   :  { %2895 = vmatpush3.bf16.msra.mxu0 %v3391_v8 }
 0x350   :  { %2889 = vmatmul.mubr.msk.bf16.vlgmr.msra.gmra.mrb[32].mxu1 %vm89_vm2, %v2497_v43  ;;  %2900 = vmatprep.subr.bf16.mxu0 %v3293_v1 }
 0x351   :  { %2909 = vmatpush3.bf16.msra.mxu1 %v3383_v7  ;;  %2912 = vmatprep.mubr.msk.bf16.mxu1 %vm3294_vm0, %v3293_v1 }
 0x352   :  { %2910 = vmatprep.subr.bf16.mxu1 %v3293_v1  ;;  %2897 = vmatmul.mubr.msk.bf16.vlgmr.msra.gmra.mrb[36].mxu0 %vm89_vm2, %v2497_v43 }
 0x353   :  { %2901 = vmatpush3.bf16.msra.mxu0 %v3409_v10  ;;  %2904 = vmatprep.mubr.msk.bf16.mxu0 %vm3294_vm0, %v3293_v1 }
 0x354   :  { %2902 = vmatprep.subr.bf16.mxu0 %v3293_v1 }
 0x355   :  { %2911 = vmatpush3.bf16.msra.mxu1 %v3400_v9 }
 0x356   :  { %2916 = vmatprep.subr.bf16.mxu1 %v3293_v1 }
 0x357   :  { %2903 = vmatpush3.bf16.msra.mxu0 %v3421_v12 }
 0x358   :  { %2924 = vmatprep.subr.bf16.mxu0 %v3293_v1 }
 0x413   :  { %v1145_v44 = vpop.f32.mrb[24].mxu0  ;;  %v1185_v46 = vpop.f32.mrb[24].mxu1 }
 0x414   :  { %v3082_v47 = vadd.f32 %v3488_v22, %v1145_v44  ;;  %v2858_v48 = vpop.f32.mrb[25].mxu0  ;;  %v2866_v49 = vpop.f32.mrb[25].mxu1  ;;  %v3083_v55 = vadd.f32 %v3493_v27, %v1185_v46 }
 0x415   :  { %v1148_v50 = vpop.f32.mrb[26].mxu0  ;;  %v1188_v51 = vpop.f32.mrb[26].mxu1 }
 0x416   :  { %v2494_v52 = vmul.f32 -1.442695, %v3082_v47  ;;  %v2859_v53 = vpop.f32.mrb[27].mxu0  ;;  %v2867_v54 = vpop.f32.mrb[27].mxu1  ;;  %v2495_v56 = vmul.f32 -1.442695, %v3083_v55 }
 0x418   :  { %3203 = vpow2.f32 %v2494_v52 }
 0x419   :  { %3205 = vpow2.f32 %v2495_v56 }
 0x41b   :  { %v1239_v57 = vpop.f32.mrb[28].mxu1 }
 0x41c   :  { %v2874_v58 = vpop.f32.mrb[29].mxu1  ;;  %v1240_v11 = vadd.f32 %v3500_v42, %v1239_v57 }
 0x41d   :  { %v1242_v59 = vpop.f32.mrb[30].mxu1 }
 0x41e   :  { %v2875_v60 = vpop.f32.mrb[31].mxu1 }
 0x422   :  { %v3204_v61 = vpop.eup %3203 }
 0x423   :  { %v1195_v62 = vadd.f32 1.0, %v3204_v61  ;;  %v3206_v63 = vpop.eup %3205 }
 0x424   :  { %v1202_v5 = vadd.f32 1.0, %v3206_v63 }
 0x425   :  { %3207 = vrcp.f32 %v1195_v62  ;;  %v1374_v29 = vpop.f32.mrb[36].mxu0 }
 0x426   :  { %3209 = vrcp.f32 %v1202_v5  ;;  %v2898_v30 = vpop.f32.mrb[37].mxu0  ;;  %v1375_v58 = vadd.f32 %v3506_v45, %v1374_v29 }
 0x427   :  { %v1377_v31 = vpop.f32.mrb[38].mxu0 }
 0x428   :  { %v2899_v32 = vpop.f32.mrb[39].mxu0 }
 0x42f   :  { %v3208_v13 = vpop.eup %3207 }
 0x430   :  { %v1245_v17 = vmul.f32 %v3208_v13, %v1240_v11  ;;  %v3210_v19 = vpop.eup %3209 }
 0x431   :  { %v1248_v20 = vsub.f32 1.0, %v3210_v19  ;;  %v1250_v23 = vmul.f32 %v3210_v19, %v3621_v36 }
 0x432   :  { %v1246_v18 = vadd.f32 %v1245_v17, %v1103_v16 }
 0x434   :  { %3211 = vtanh.f32 %v1246_v18 }
 0x43e   :  { %v3212_v21 = vpop.eup %3211 }
 0x43f   :  { %v1249_v24 = vmul.f32 %v3212_v21, %v1248_v20  ;;  %v2515_v20 = vld [vmem:[%s3911_s0 + $0x6] sm:$0x1] }
 0x441   :  { %v1251_v25 = vadd.f32 %v1250_v23, %v1249_v24 }
 0x443   :  { %1252 = vst.msk [vmem:[#allocation2] sm:$0x3] %vm32_vm1, %v1251_v25 }
 0x44a   :  { %v3676_v26 = vld [vmem:[#allocation2] sm:$0x3] }
 0x44b   :  { %v1256_v28 = vpack.c.bf16 %v3676_v26, %v3676_v26 }
 0x44d   :  { %2905 = vmatmul.mubr.msk.bf16.vlgmr.msra.gmra.mrb[32].mxu0 %vm89_vm2, %v1256_v28  ;;  %2913 = vmatmul.mubr.msk.bf16.vlgmr.msra.gmra.mrb[32].mxu1 %vm89_vm2, %v1256_v28 }
 0x44e   :  { %2917 = vmatpush3.bf16.msra.mxu1 %v3431_v14  ;;  %2920 = vmatprep.mubr.msk.bf16.mxu1 %vm3294_vm0, %v3293_v1 }
 0x44f   :  { %2918 = vmatprep.subr.bf16.mxu1 %v3293_v1  ;;  %2925 = vmatpush3.bf16.msra.mxu0 %v3339_v0 }
 0x450   :  { %2926 = vmatprep.subr.bf16.mxu0 %v3293_v1  ;;  %2928 = vmatprep.mubr.msk.bf16.mxu0 %vm3294_vm0, %v3293_v1 }
 0x452   :  { %2919 = vmatpush3.bf16.msra.mxu1 %v3439_v15 }
 0x453   :  { %2927 = vmatpush3.bf16.msra.mxu0 %v3352_v3  ;;  %2932 = vmatprep.subr.bf16.mxu1 %v3293_v1 }
 0x454   :  { %2940 = vmatprep.subr.bf16.mxu0 %v3293_v1 }
 0x455   :  { %2921 = vmatmul.mubr.msk.bf16.vlgmr.msra.gmra.mrb[36].mxu1 %vm89_vm2, %v1256_v28 }
 0x456   :  { %2933 = vmatpush3.bf16.msra.mxu1 %v3346_v2  ;;  %2936 = vmatprep.mubr.msk.bf16.mxu1 %vm3294_vm0, %v3293_v1 }
 0x457   :  { %2934 = vmatprep.subr.bf16.mxu1 %v3293_v1  ;;  %2929 = vmatmul.mubr.msk.bf16.vlgmr.msra.gmra.mrb[40].mxu0 %vm89_vm2, %v2506_v33 }
 0x458   :  { %2941 = vmatpush3.bf16.msra.mxu0 %v3375_v6  ;;  %2944 = vmatprep.mubr.msk.bf16.mxu0 %vm3294_vm0, %v3293_v1 }
 0x459   :  { %2942 = vmatprep.subr.bf16.mxu0 %v3293_v1 }
 0x45a   :  { %2935 = vmatpush3.bf16.msra.mxu1 %v3362_v4 }
 0x45b   :  { %2956 = vmatprep.subr.bf16.mxu1 %v3293_v1 }
 0x45c   :  { %2943 = vmatpush3.bf16.msra.mxu0 %v3391_v8 }
 0x45d   :  { %2937 = vmatmul.mubr.msk.bf16.vlgmr.msra.gmra.mrb[40].mxu1 %vm89_vm2, %v2506_v33  ;;  %2948 = vmatprep.subr.bf16.mxu0 %v3293_v1 }
 0x45e   :  { %2957 = vmatpush3.bf16.msra.mxu1 %v3383_v7  ;;  %2960 = vmatprep.mubr.msk.bf16.mxu1 %vm3294_vm0, %v3293_v1 }
 0x45f   :  { %2958 = vmatprep.subr.bf16.mxu1 %v3293_v1  ;;  %2945 = vmatmul.mubr.msk.bf16.vlgmr.msra.gmra.mrb[44].mxu0 %vm89_vm2, %v2506_v33 }
 0x460   :  { %2949 = vmatpush3.bf16.msra.mxu0 %v3409_v10  ;;  %2952 = vmatprep.mubr.msk.bf16.mxu0 %vm3294_vm0, %v3293_v1 }
 0x461   :  { %2950 = vmatprep.subr.bf16.mxu0 %v3293_v1 }
 0x462   :  { %2959 = vmatpush3.bf16.msra.mxu1 %v3400_v9 }
 0x463   :  { %2964 = vmatprep.subr.bf16.mxu1 %v3293_v1 }
 0x464   :  { %2951 = vmatpush3.bf16.msra.mxu0 %v3421_v12 }
 0x465   :  { %2972 = vmatprep.subr.bf16.mxu0 %v3293_v1 }
 0x520   :  { %v1417_v34 = vpop.f32.mrb[32].mxu0  ;;  %v1457_v35 = vpop.f32.mrb[32].mxu1 }
 0x521   :  { %v3084_v36 = vadd.f32 %v3488_v22, %v1417_v34  ;;  %v2906_v37 = vpop.f32.mrb[33].mxu0  ;;  %v2914_v38 = vpop.f32.mrb[33].mxu1  ;;  %v3085_v46 = vadd.f32 %v3493_v27, %v1457_v35 }
 0x522   :  { %v1420_v39 = vpop.f32.mrb[34].mxu0  ;;  %v1460_v40 = vpop.f32.mrb[34].mxu1 }
 0x523   :  { %v2503_v41 = vmul.f32 -1.442695, %v3084_v36  ;;  %v2907_v43 = vpop.f32.mrb[35].mxu0  ;;  %v2915_v44 = vpop.f32.mrb[35].mxu1  ;;  %v2504_v47 = vmul.f32 -1.442695, %v3085_v46 }
 0x525   :  { %3213 = vpow2.f32 %v2503_v41 }
 0x526   :  { %3215 = vpow2.f32 %v2504_v47 }
 0x528   :  { %v1511_v48 = vpop.f32.mrb[36].mxu1 }
 0x529   :  { %v2922_v49 = vpop.f32.mrb[37].mxu1  ;;  %v1512_v56 = vadd.f32 %v3500_v42, %v1511_v48 }
 0x52a   :  { %v1514_v50 = vpop.f32.mrb[38].mxu1 }
 0x52b   :  { %v2923_v51 = vpop.f32.mrb[39].mxu1  ;;  %v3253_v50 = vld [vmem:[%s3912_s1] sm:$0xff]  }
 0x52c   :  { %v3255_v51 = vld [vmem:[%s3912_s1 + $0x10] sm:$0xff]  }
 0x52f   :  { %v3214_v52 = vpop.eup %3213 }
 0x530   :  { %v1467_v53 = vadd.f32 1.0, %v3214_v52  ;;  %v3216_v54 = vpop.eup %3215 }
 0x531   :  { %v1474_v55 = vadd.f32 1.0, %v3216_v54 }
 0x532   :  { %3217 = vrcp.f32 %v1467_v53 }
 0x533   :  { %3219 = vrcp.f32 %v1474_v55 }
 0x53c   :  { %v3218_v57 = vpop.eup %3217 }
 0x53d   :  { %v1517_v59 = vmul.f32 %v3218_v57, %v1512_v56  ;;  %v3220_v61 = vpop.eup %3219  ;;  %v2524_v56 = vld [vmem:[%s3911_s0 + $0x7] sm:$0x1] }
 0x53e   :  { %v1520_v62 = vsub.f32 1.0, %v3220_v61  ;;  %v1522_v5 = vmul.f32 %v3220_v61, %v3676_v26  ;;  %v3257_v57 = vld [vmem:[%s3912_s1 + $0x20] sm:$0xff]  }
 0x53f   :  { %v1518_v60 = vadd.f32 %v1517_v59, %v1375_v58  ;;  %v3258_v58 = vld [vmem:[%s3914_s3 + $0x10] sm:$0xff]   ;;  %v3259_v59 = vld [vmem:[%s3912_s1 + $0x28] sm:$0xff]   ;;  %v3261_v61 = vld [vmem:[%s3914_s3] sm:$0xff]  }
 0x541   :  { %3221 = vtanh.f32 %v1518_v60  ;;  %v3260_v60 = vld [vmem:[%s3914_s3 + $0x18] sm:$0xff]  }
 0x54b   :  { %v3222_v63 = vpop.eup %3221 }
 0x54c   :  { %v1521_v11 = vmul.f32 %v3222_v63, %v1520_v62  ;;  %v3262_v62 = vld [vmem:[%s3914_s3 + $0x8] sm:$0xff]  }
 0x54e   :  { %v1523_v13 = vadd.f32 %v1522_v5, %v1521_v11 }
 0x550   :  { %1524 = vst.msk [vmem:[#allocation2] sm:$0x3] %vm32_vm1, %v1523_v13 }
 0x557   :  { %v3731_v16 = vld [vmem:[#allocation2] sm:$0x3] }
 0x558   :  { %v1528_v17 = vpack.c.bf16 %v3731_v16, %v3731_v16 }
 0x55a   :  { %2953 = vmatmul.mubr.msk.bf16.vlgmr.msra.gmra.mrb[40].mxu0 %vm89_vm2, %v1528_v17  ;;  %2961 = vmatmul.mubr.msk.bf16.vlgmr.msra.gmra.mrb[40].mxu1 %vm89_vm2, %v1528_v17 }
 0x55b   :  { %2965 = vmatpush3.bf16.msra.mxu1 %v3431_v14  ;;  %2968 = vmatprep.mubr.msk.bf16.mxu1 %vm3294_vm0, %v3293_v1 }
 0x55c   :  { %2966 = vmatprep.subr.bf16.mxu1 %v3293_v1  ;;  %2973 = vmatpush3.bf16.msra.mxu0 %v3339_v0  ;;  %v1646_v0 = vpop.f32.mrb[44].mxu0 }
 0x55d   :  { %2974 = vmatprep.subr.bf16.mxu0 %v3293_v1  ;;  %2976 = vmatprep.mubr.msk.bf16.mxu0 %vm3294_vm0, %v3293_v1  ;;  %v2946_v18 = vpop.f32.mrb[45].mxu0  ;;  %v1647_v37 = vadd.f32 %v3506_v45, %v1646_v0 }
 0x55f   :  { %2967 = vmatpush3.bf16.msra.mxu1 %v3439_v15 }
 0x560   :  { %2975 = vmatpush3.bf16.msra.mxu0 %v3352_v3  ;;  %2980 = vmatprep.subr.bf16.mxu1 %v3293_v1  ;;  %v1649_v3 = vpop.f32.mrb[46].mxu0 }
 0x561   :  { %2988 = vmatprep.subr.bf16.mxu0 %v3293_v1  ;;  %v2947_v19 = vpop.f32.mrb[47].mxu0 }
 0x562   :  { %2969 = vmatmul.mubr.msk.bf16.vlgmr.msra.gmra.mrb[44].mxu1 %vm89_vm2, %v1528_v17 }
 0x563   :  { %2981 = vmatpush3.bf16.msra.mxu1 %v3346_v2  ;;  %2984 = vmatprep.mubr.msk.bf16.mxu1 %vm3294_vm0, %v3293_v1 }
 0x564   :  { %2982 = vmatprep.subr.bf16.mxu1 %v3293_v1  ;;  %2977 = vmatmul.mubr.msk.bf16.vlgmr.msra.gmra.mrb[48].mxu0 %vm89_vm2, %v2515_v20 }
 0x565   :  { %2989 = vmatpush3.bf16.msra.mxu0 %v3375_v6  ;;  %2992 = vmatprep.mubr.msk.bf16.mxu0 %vm3294_vm0, %v3293_v1 }
 0x566   :  { %2990 = vmatprep.subr.bf16.mxu0 %v3293_v1 }
 0x567   :  { %2983 = vmatpush3.bf16.msra.mxu1 %v3362_v4 }
 0x568   :  { %3004 = vmatprep.subr.bf16.mxu1 %v3293_v1 }
 0x569   :  { %2991 = vmatpush3.bf16.msra.mxu0 %v3391_v8 }
 0x56a   :  { %2985 = vmatmul.mubr.msk.bf16.vlgmr.msra.gmra.mrb[48].mxu1 %vm89_vm2, %v2515_v20  ;;  %2996 = vmatprep.subr.bf16.mxu0 %v3293_v1 }
 0x56b   :  { %3005 = vmatpush3.bf16.msra.mxu1 %v3383_v7  ;;  %3008 = vmatprep.mubr.msk.bf16.mxu1 %vm3294_vm0, %v3293_v1 }
 0x56c   :  { %3006 = vmatprep.subr.bf16.mxu1 %v3293_v1  ;;  %2993 = vmatmul.mubr.msk.bf16.vlgmr.msra.gmra.mrb[52].mxu0 %vm89_vm2, %v2515_v20 }
 0x56d   :  { %2997 = vmatpush3.bf16.msra.mxu0 %v3409_v10  ;;  %3000 = vmatprep.mubr.msk.bf16.mxu0 %vm3294_vm0, %v3293_v1 }
 0x56e   :  { %2998 = vmatprep.subr.bf16.mxu0 %v3293_v1 }
 0x56f   :  { %3007 = vmatpush3.bf16.msra.mxu1 %v3400_v9 }
 0x570   :  { %3012 = vmatprep.subr.bf16.mxu1 %v3293_v1 }
 0x571   :  { %2999 = vmatpush3.bf16.msra.mxu0 %v3421_v12 }
 0x572   :  { %3020 = vmatprep.subr.bf16.mxu0 %v3293_v1 }
 0x62d   :  { %v1689_v2 = vpop.f32.mrb[40].mxu0  ;;  %v1729_v4 = vpop.f32.mrb[40].mxu1 }
 0x62e   :  { %v3086_v6 = vadd.f32 %v3488_v22, %v1689_v2  ;;  %v2954_v7 = vpop.f32.mrb[41].mxu0  ;;  %v2962_v8 = vpop.f32.mrb[41].mxu1  ;;  %v3087_v25 = vadd.f32 %v3493_v27, %v1729_v4 }
 0x62f   :  { %v1692_v9 = vpop.f32.mrb[42].mxu0  ;;  %v1732_v21 = vpop.f32.mrb[42].mxu1 }
 0x630   :  { %v2512_v23 = vmul.f32 -1.442695, %v3086_v6  ;;  %v2955_v24 = vpop.f32.mrb[43].mxu0  ;;  %v2963_v10 = vpop.f32.mrb[43].mxu1  ;;  %v2513_v26 = vmul.f32 -1.442695, %v3087_v25 }
 0x632   :  { %3223 = vpow2.f32 %v2512_v23 }
 0x633   :  { %3225 = vpow2.f32 %v2513_v26 }
 0x635   :  { %v1783_v28 = vpop.f32.mrb[44].mxu1 }
 0x636   :  { %v2970_v29 = vpop.f32.mrb[45].mxu1  ;;  %v1784_v35 = vadd.f32 %v3500_v42, %v1783_v28 }
 0x637   :  { %v1786_v12 = vpop.f32.mrb[46].mxu1 }
 0x638   :  { %v2971_v30 = vpop.f32.mrb[47].mxu1 }
 0x63c   :  { %v3224_v31 = vpop.eup %3223 }
 0x63d   :  { %v1739_v32 = vadd.f32 1.0, %v3224_v31  ;;  %v3226_v33 = vpop.eup %3225 }
 0x63e   :  { %v1746_v34 = vadd.f32 1.0, %v3226_v33 }
 0x63f   :  { %3227 = vrcp.f32 %v1739_v32  ;;  %v1918_v52 = vpop.f32.mrb[52].mxu0 }
 0x640   :  { %3229 = vrcp.f32 %v1746_v34  ;;  %v2994_v53 = vpop.f32.mrb[53].mxu0  ;;  %v1919_v25 = vadd.f32 %v3506_v45, %v1918_v52  ;;  %v3264_v45 = vld [vmem:[%s3914_s3 + $0x28] sm:$0xff]   ;;  %v3266_v52 = vld [vmem:[%s3913_s2 + $0x1] ss:$0 sm:$0xff] }
 0x641   :  { %v1921_v54 = vpop.f32.mrb[54].mxu0 }
 0x642   :  { %v2995_v55 = vpop.f32.mrb[55].mxu0 }
 0x649   :  { %v3228_v36 = vpop.eup %3227 }
 0x64a   :  { %v1789_v38 = vmul.f32 %v3228_v36, %v1784_v35  ;;  %v3230_v40 = vpop.eup %3229 }
 0x64b   :  { %v1792_v41 = vsub.f32 1.0, %v3230_v40  ;;  %v1794_v44 = vmul.f32 %v3230_v40, %v3731_v16  ;;  %v3172_v40 = vld [vmem:[%s3916_s5 + $0x8] sm:$0xff]  }
 0x64c   :  { %v1790_v39 = vadd.f32 %v1789_v38, %v1647_v37 }
 0x64e   :  { %3231 = vtanh.f32 %v1790_v39  ;;  %v3171_v39 = vld [vmem:[%s3916_s5] sm:$0xff]  }
 0x658   :  { %v3232_v43 = vpop.eup %3231 }
 0x659   :  { %v1793_v46 = vmul.f32 %v3232_v43, %v1792_v41 }
 0x65b   :  { %v1795_v47 = vadd.f32 %v1794_v44, %v1793_v46  ;;  %v3265_v44 = vld [vmem:[%s3913_s2] ss:$0 sm:$0xff] }
 0x65d   :  { %1796 = vst.msk [vmem:[#allocation2] sm:$0x3] %vm32_vm1, %v1795_v47 }
 0x664   :  { %v3786_v48 = vld [vmem:[#allocation2] sm:$0x3] }
 0x665   :  { %v1800_v49 = vpack.c.bf16 %v3786_v48, %v3786_v48 }
 0x667   :  { %3001 = vmatmul.mubr.msk.bf16.vlgmr.msra.gmra.mrb[48].mxu0 %vm89_vm2, %v1800_v49  ;;  %3009 = vmatmul.mubr.msk.bf16.vlgmr.msra.gmra.mrb[48].mxu1 %vm89_vm2, %v1800_v49 }
 0x668   :  { %3013 = vmatpush3.bf16.msra.mxu1 %v3431_v14  ;;  %3016 = vmatprep.mubr.msk.bf16.mxu1 %vm3294_vm0, %v3293_v1  ;;  %v3254_v14 = vld [vmem:[%s3912_s1 + $0x8] sm:$0xff]  }
 0x669   :  { %3014 = vmatprep.subr.bf16.mxu1 %v3293_v1  ;;  %3021 = vmatpush3.bf16.msra.mxu0 %v3253_v50 }
 0x66a   :  { %3022 = vmatprep.subr.bf16.mxu0 %v3293_v1  ;;  %3024 = vmatprep.mubr.msk.bf16.mxu0 %vm3294_vm0, %v3293_v1 }
 0x66c   :  { %3015 = vmatpush3.bf16.msra.mxu1 %v3439_v15  ;;  %v3256_v15 = vld [vmem:[%s3912_s1 + $0x18] sm:$0xff]  }
 0x66d   :  { %3023 = vmatpush3.bf16.msra.mxu0 %v3254_v14  ;;  %3028 = vmatprep.subr.bf16.mxu1 %v3293_v1 }
 0x66e   :  { %3036 = vmatprep.subr.bf16.mxu0 %v3293_v1 }
 0x66f   :  { %3017 = vmatmul.mubr.msk.bf16.vlgmr.msra.gmra.mrb[52].mxu1 %vm89_vm2, %v1800_v49 }
 0x670   :  { %3029 = vmatpush3.bf16.msra.mxu1 %v3255_v51  ;;  %3032 = vmatprep.mubr.msk.bf16.mxu1 %vm3294_vm0, %v3293_v1 }
 0x671   :  { %3030 = vmatprep.subr.bf16.mxu1 %v3293_v1  ;;  %3025 = vmatmul.mubr.msk.bf16.vlgmr.msra.gmra.mrb[56].mxu0 %vm89_vm2, %v2524_v56 }
 0x672   :  { %3037 = vmatpush3.bf16.msra.mxu0 %v3257_v57  ;;  %3040 = vmatprep.mubr.msk.bf16.mxu0 %vm3294_vm0, %v3293_v1 }
 0x673   :  { %3038 = vmatprep.subr.bf16.mxu0 %v3293_v1 }
 0x674   :  { %3031 = vmatpush3.bf16.msra.mxu1 %v3256_v15 }
 0x675   :  { %3052 = vmatprep.subr.bf16.mxu1 %v3293_v1 }
 0x676   :  { %3039 = vmatpush3.bf16.msra.mxu0 %v3259_v59 }
 0x677   :  { %3033 = vmatmul.mubr.msk.bf16.vlgmr.msra.gmra.mrb[56].mxu1 %vm89_vm2, %v2524_v56  ;;  %3044 = vmatprep.subr.bf16.mxu0 %v3293_v1 }
 0x678   :  { %3053 = vmatpush3.bf16.msra.mxu1 %v3258_v58  ;;  %3056 = vmatprep.mubr.msk.bf16.mxu1 %vm3294_vm0, %v3293_v1 }
 0x679   :  { %3054 = vmatprep.subr.bf16.mxu1 %v3293_v1  ;;  %3041 = vmatmul.mubr.msk.bf16.vlgmr.msra.gmra.mrb[60].mxu0 %vm89_vm2, %v2524_v56 }
 0x67a   :  { %3045 = vmatpush3.bf16.msra.mxu0 %v3261_v61  ;;  %3048 = vmatprep.mubr.msk.bf16.mxu0 %vm3294_vm0, %v3293_v1 }
 0x67b   :  { %3046 = vmatprep.subr.bf16.mxu0 %v3293_v1 }
 0x67c   :  { %3055 = vmatpush3.bf16.msra.mxu1 %v3260_v60 }
 0x67d   :  { %3060 = vmatprep.subr.bf16.mxu1 %v3293_v1 }
 0x67e   :  { %3047 = vmatpush3.bf16.msra.mxu0 %v3262_v62  ;;  %v3267_v62 = vld [vmem:[%s3915_s4] ss:$0 sm:$0xff] }
 0x67f   :  { %3068 = vmatprep.subr.bf16.mxu0 %v3293_v1 }
 0x73a   :  { %v1961_v63 = vpop.f32.mrb[48].mxu0  ;;  %v2001_v5 = vpop.f32.mrb[48].mxu1 }
 0x73b   :  { %v3088_v11 = vadd.f32 %v3488_v22, %v1961_v63  ;;  %v3002_v13 = vpop.f32.mrb[49].mxu0  ;;  %v3010_v16 = vpop.f32.mrb[49].mxu1  ;;  %v3089_v20 = vadd.f32 %v3493_v27, %v2001_v5 }
 0x73c   :  { %v1964_v17 = vpop.f32.mrb[50].mxu0  ;;  %v2004_v0 = vpop.f32.mrb[50].mxu1 }
 0x73d   :  { %v2521_v18 = vmul.f32 -1.442695, %v3088_v11  ;;  %v3003_v3 = vpop.f32.mrb[51].mxu0  ;;  %v3011_v19 = vpop.f32.mrb[51].mxu1  ;;  %v2522_v2 = vmul.f32 -1.442695, %v3089_v20 }
 0x73e   :  { %v3268_v11 = vld [vmem:[%s3913_s2 + $0x2] ss:$0 sm:$0xff]  ;;  %s3295_s2 = smov [#allocation3]  }
 0x73f   :  { %3233 = vpow2.f32 %v2521_v18  ;;  %s2420_s13 = sshll.u32 %s3295_s2, 4  ;;  %s2421_s13 = int_to_ptr.vmem [resolvable:$true] %s2420_s13 }
 0x740   :  { %3235 = vpow2.f32 %v2522_v2  ;;  %s3269_s14 = scalar_lea.vmem %s2421_s13, 32  ;;  %p3274_p1 = scmp.lt.s32.totalorder %s2421_s13, %s2421_s13 }
 0x741   :  { %p3270_p0 = scmp.ne.s32.totalorder %s2421_s13, %s3269_s14  ;;  %p3275_p2 = scmp.lt.s32.totalorder %s3269_s14, %s3269_s14 }
 0x742   :  { %v2055_v4 = vpop.f32.mrb[52].mxu1 }
 0x743   :  { %v3018_v6 = vpop.f32.mrb[53].mxu1  ;;  %v2056_v24 = vadd.f32 %v3500_v42, %v2055_v4  ;;  %v3263_v42 = vld [vmem:[%s3914_s3 + $0x20] sm:$0xff]   ;;  %p3276_p3 = por %p3275_p2, %p3274_p1 }
 0x744   :  { %v2058_v7 = vpop.f32.mrb[54].mxu1 }
 0x745   :  { %v3019_v8 = vpop.f32.mrb[55].mxu1  ;;  %v2533_v7 = vld [vmem:[%s3917_s6] ss:$0 sm:$0xff]  ;;  %p3277_p4 = pnand %p3276_p3, %p3270_p0 }
 0x749   :  { %v3234_v9 = vpop.eup %3233 }
 0x74a   :  { %v2011_v21 = vadd.f32 1.0, %v3234_v9  ;;  %v3236_v22 = vpop.eup %3235 }
 0x74b   :  { %v2018_v23 = vadd.f32 1.0, %v3236_v22 }
 0x74c   :  { %3237 = vrcp.f32 %v2011_v21  ;;  %v2190_v35 = vpop.f32.mrb[60].mxu0 }
 0x74d   :  { %3239 = vrcp.f32 %v2018_v23  ;;  %v3042_v36 = vpop.f32.mrb[61].mxu0  ;;  %v2191_v13 = vadd.f32 %v3268_v11, %v2190_v35 }
 0x74e   :  { %v2193_v37 = vpop.f32.mrb[62].mxu0 }
 0x74f   :  { %v3043_v38 = vpop.f32.mrb[63].mxu0 }
 0x756   :  { %v3238_v10 = vpop.eup %3237 }
 0x757   :  { %v2061_v26 = vmul.f32 %v3238_v10, %v2056_v24  ;;  %v3240_v28 = vpop.eup %3239 }
 0x758   :  { %v2064_v29 = vsub.f32 1.0, %v3240_v28  ;;  %v2066_v30 = vmul.f32 %v3240_v28, %v3786_v48 }
 0x759   :  { %v2062_v27 = vadd.f32 %v2061_v26, %v1919_v25 }
 0x75b   :  { %3241 = vtanh.f32 %v2062_v27 }
 0x765   :  { %v3242_v12 = vpop.eup %3241 }
 0x766   :  { %v2065_v31 = vmul.f32 %v3242_v12, %v2064_v29 }
 0x768   :  { %v2067_v32 = vadd.f32 %v2066_v30, %v2065_v31 }
 0x76a   :  { %2068 = vst.msk [vmem:[#allocation2] sm:$0x3] %vm32_vm1, %v2067_v32 }
 0x771   :  { %v2069_v33 = vld [vmem:[#allocation2] sm:$0x3] }
 0x772   :  { %v2072_v34 = vpack.c.bf16 %v2069_v33, %v2069_v33 }
 0x774   :  { %3049 = vmatmul.mubr.msk.bf16.vlgmr.msra.gmra.mrb[56].mxu0 %vm89_vm2, %v2072_v34  ;;  %3057 = vmatmul.mubr.msk.bf16.vlgmr.msra.gmra.mrb[56].mxu1 %vm89_vm2, %v2072_v34 }
 0x775   :  { %3061 = vmatpush3.bf16.msra.mxu1 %v3263_v42  ;;  %3064 = vmatprep.mubr.msk.bf16.mxu1 %vm3294_vm0, %v3293_v1 }
 0x776   :  { %3062 = vmatprep.subr.bf16.mxu1 %v3293_v1  ;;  %3072 = vmatprep.mubr.msk.bf16.mxu0 %vm3294_vm0, %v3293_v1 }
 0x777   :  { %3069 = vmatpush3.bf16.msra.mxu0 %v3171_v39 }
 0x778   :  { %3070 = vmatprep.subr.bf16.mxu0 %v3293_v1 }
 0x779   :  { %3063 = vmatpush3.bf16.msra.mxu1 %v3264_v45 }
 0x77b   :  { %3071 = vmatpush3.bf16.msra.mxu0 %v3172_v40 }
 0x77c   :  { %3065 = vmatmul.mubr.msk.bf16.vlgmr.msra.gmra.mrb[60].mxu1 %vm89_vm2, %v2072_v34 }
 0x847   :  { %v2233_v41 = vpop.f32.mrb[56].mxu0  ;;  %v2273_v43 = vpop.f32.mrb[56].mxu1 }
 0x848   :  { %v3090_v46 = vadd.f32 %v3265_v44, %v2233_v41  ;;  %v3050_v47 = vpop.f32.mrb[57].mxu0  ;;  %v3058_v48 = vpop.f32.mrb[57].mxu1  ;;  %v3091_v1 = vadd.f32 %v3266_v52, %v2273_v43 }
 0x849   :  { %v2236_v49 = vpop.f32.mrb[58].mxu0  ;;  %v2276_v50 = vpop.f32.mrb[58].mxu1 }
 0x84a   :  { %v2530_v14 = vmul.f32 -1.442695, %v3090_v46  ;;  %v3051_v51 = vpop.f32.mrb[59].mxu0  ;;  %v3059_v15 = vpop.f32.mrb[59].mxu1  ;;  %v2531_v53 = vmul.f32 -1.442695, %v3091_v1 }
 0x84c   :  { %3243 = vpow2.f32 %v2530_v14 }
 0x84d   :  { %3245 = vpow2.f32 %v2531_v53 }
 0x84f   :  { %v2327_v54 = vpop.f32.mrb[60].mxu1 }
 0x850   :  { %v3066_v55 = vpop.f32.mrb[61].mxu1  ;;  %v2328_v63 = vadd.f32 %v3267_v62, %v2327_v54 }
 0x851   :  { %v2330_v56 = vpop.f32.mrb[62].mxu1 }
 0x852   :  { %v3067_v57 = vpop.f32.mrb[63].mxu1 }
 0x856   :  { %v3244_v58 = vpop.eup %3243 }
 0x857   :  { %v2283_v59 = vadd.f32 1.0, %v3244_v58  ;;  %v3246_v60 = vpop.eup %3245 }
 0x858   :  { %v2290_v61 = vadd.f32 1.0, %v3246_v60 }
 0x859   :  { %3247 = vrcp.f32 %v2283_v59 }
 0x85a   :  { %3249 = vrcp.f32 %v2290_v61 }
 0x863   :  { %v3248_v5 = vpop.eup %3247 }
 0x864   :  { %v2333_v16 = vmul.f32 %v3248_v5, %v2328_v63  ;;  %v3250_v0 = vpop.eup %3249 }
 0x865   :  { %v2336_v18 = vsub.f32 1.0, %v3250_v0  ;;  %v2338_v19 = vmul.f32 %v3250_v0, %v2069_v33 }
 0x866   :  { %v2334_v17 = vadd.f32 %v2333_v16, %v2191_v13 }
 0x868   :  { %3251 = vtanh.f32 %v2334_v17 }
 0x872   :  { %v3252_v3 = vpop.eup %3251 }
 0x873   :  { %v2337_v20 = vmul.f32 %v3252_v3, %v2336_v18 }
 0x875   :  { %v2339_v2 = vadd.f32 %v2338_v19, %v2337_v20 }
 0x877   :  { %2340 = vst.msk [vmem:[#allocation2] sm:$0x3] %vm32_vm1, %v2339_v2 }
 0x87e   :  { %v2344_v4 = vld [vmem:[#allocation2] sm:$0x3] }
 0x87f   :  { %v2345_v6 = vpack.c.bf16 %v2344_v4, %v2344_v4 }
 0x881   :  { %3073 = vmatmul.mubr.msk.bf16.vlgmr.msra.gmra.mrb[64].mxu0 %vm89_vm2, %v2345_v6 }
 0x954   :  { %v2406_v8 = vpop.f32.mrb[64].mxu0 }
 0x955   :  { %v2407_v9 = vadd.f32 %v2533_v7, %v2406_v8  ;;  %v3074_v21 = vpop.f32.mrb[65].mxu0 }
 0x956   :  { %v2409_v22 = vpop.f32.mrb[66].mxu0 }
 0x957   :  { %v3075_v23 = vpop.f32.mrb[67].mxu0  ;;  %2413 = vst.msk [vmem:[#allocation3] sm:$0x3] %vm2412_vm3, %v2407_v9 }
 0x958   :  { %3280 = shalt.err (!%p3277_p4)
}
 0x959   :  { %s3281_s6 = scalar_lea.hbm %s3918_s7, 32 }
 0x95a   :  { %p3282_p5 = scmp.ne.s32.totalorder %s3918_s7, %s3281_s6  ;;  %p3285_p6 = scmp.lt.u32.totalorder %s3281_s6, %s3918_s7 }
 0x95c   :  { %p3287_p7 = pnand %p3285_p6, %p3282_p5 }
 0x95e   :  { %3290 = shalt.err (!%p3287_p7)
}
 0x95f   :  { %2423 = dma.vmem_to_hbm [thread:$0]  %s2421_s13, 32, %s3918_s7, [#allocation4]  }
 0x960   :  { %3291 = dma.done.wait [#allocation4], 32  }
 0x961   :  { %3292 = vsyncadd [#allocation4], 4294967264 }
 0x962   :  { %2427 = vsyncpa [#allocation4], 1 }

// kernel: gru_forward.2
= control target key start
LH: loop header
LB: loop body
LE: loop exit
PB: predicated region body
PF: predicated region fallthrough
CT: control target
= control target key end

     0   :  { %10 = vsyncpa [#allocation4], 0  ;;  %s3129_s18 = smov [#allocation3]   ;;  %s3668_s0 = inlined_call_operand.vmem [shape: f32[8,2,16], index: 0, kind: input, shape index: {}]   ;;  %s3669_s1 = inlined_call_operand.hbm [shape: bf16[3,16,32], index: 1, kind: input, shape index: {}]   ;;  %s3670_s2 = inlined_call_operand.vmem [shape: f32[3,1,32], index: 2, kind: input, shape index: {}]   ;;  %s3671_s3 = inlined_call_operand.vmem [shape: bf16[3,32,32], index: 3, kind: input, shape index: {}]   ;;  %s3672_s4 = inlined_call_operand.vmem [shape: f32[1,32], index: 4, kind: input, shape index: {}]   ;;  %s3673_s5 = inlined_call_operand.vmem [shape: bf16[8,2,32], index: 5, kind: output, shape index: {}]  }
   0x1   :  { %s18_s19 = sshll.u32 %s3129_s18, 4  ;;  %s3105_s22 = scalar_lea.hbm %s3669_s1, 384  ;;  %s19_s19 = int_to_ptr.vmem [resolvable:$true] %s18_s19 }
   0x2   :  { %p3106_p0 = scmp.ne.s32.totalorder %s3669_s1, %s3105_s22  ;;  %p3109_p1 = scmp.lt.u32.totalorder %s3105_s22, %s3669_s1 }
   0x4   :  { %p3111_p2 = pnand %p3109_p1, %p3106_p0 }
   0x6   :  { %3114 = shalt.err (!%p3111_p2)
}
   0x7   :  { %s3115_s27 = scalar_lea.vmem %s19_s19, 384  ;;  %p3120_p4 = scmp.lt.s32.totalorder %s19_s19, %s19_s19 }
   0x8   :  { %p3116_p3 = scmp.ne.s32.totalorder %s19_s19, %s3115_s27  ;;  %p3121_p5 = scmp.lt.s32.totalorder %s3115_s27, %s3115_s27 }
   0xa   :  { %p3122_p6 = por %p3121_p5, %p3120_p4 }
   0xc   :  { %p3123_p7 = pnand %p3122_p6, %p3116_p3 }
   0xe   :  { %3126 = shalt.err (!%p3123_p7)
}
   0xf   :  { %s3130_s28 = smov 64   ;;  %s3131_s29 = smov 4  }
  0x10   :  { %24 = dma.hbm_to_vmem [thread:$0]  %s3669_s1, 384, %s19_s19, [#allocation4], %s3130_s28, %s3130_s28, %s3131_s29  }
  0x11   :  { %3127 = dma.done.wait [#allocation4], 384  }
  0x12   :  { %3128 = vsyncadd [#allocation4], 4294966912  ;;  %vm39_vm0 = vcmask 254976   ;;  %v3132_v0 = vmov 0.0   ;;  %vm3133_vm1 = vmmov 0   ;;  %v3184_v1 = vld [vmem:[#allocation3] sm:$0xff]  }
  0x13   :  { %2583 = vmatprep.subr.bf16.mxu0 %v3132_v0  ;;  %2585 = vmatprep.mubr.msk.bf16.mxu0 %vm3133_vm1, %v3132_v0  ;;  %40 = vst.msk [vmem:[#allocation2] sm:$0x3] %vm39_vm0, %v3132_v0  ;;  %v70_v2 = vld [vmem:[%s3668_s0] sm:$0x3]  ;;  %vm85_vm2 = vcmask 130048   ;;  %v3190_v4 = vld [vmem:[#allocation3 + $0x8] sm:$0xff]  }
  0x14   :  { %2589 = vmatprep.subr.bf16.mxu1 %v3132_v0  ;;  %2591 = vmatprep.mubr.msk.bf16.mxu1 %vm3133_vm1, %v3132_v0  ;;  %v71_v3 = vpack.c.bf16 %v70_v2, %v70_v2  ;;  %v3193_v5 = vld [vmem:[#allocation3 + $0x10] sm:$0xff]   ;;  %v3220_v8 = vld [vmem:[%s3671_s3] sm:$0xff]   ;;  %v3231_v10 = vld [vmem:[%s3671_s3 + $0x8] sm:$0xff]   ;;  %vm245_vm3 = vcmask 261120   ;;  %vm423_vm4 = vcmask 253952  }
  0x15   :  { %2584 = vmatpush3.bf16.msra.mxu0 %v3184_v1  ;;  %2590 = vmatpush3.bf16.msra.mxu1 %v3190_v4  ;;  %v3199_v6 = vld [vmem:[%s3671_s3 + $0x10] sm:$0xff]   ;;  %v3212_v7 = vld [vmem:[%s3671_s3 + $0x18] sm:$0xff]   ;;  %v3241_v12 = vld [vmem:[%s3671_s3 + $0x20] sm:$0xff]  }
  0x16   :  { %2595 = vmatprep.subr.bf16.mxu0 %v3132_v0  ;;  %2609 = vmatprep.subr.bf16.mxu1 %v3132_v0  ;;  %v3250_v13 = vld [vmem:[%s3671_s3 + $0x28] sm:$0xff]   ;;  %v2393_v14 = vld [vmem:[%s3668_s0 + $0x2] sm:$0x3]  ;;  %v3292_v21 = vld [vmem:[%s3670_s2] ss:$0 sm:$0xff] }
  0x17   :  { %v428_v15 = vpack.c.bf16 %v2393_v14, %v2393_v14  ;;  %v3297_v25 = vld [vmem:[%s3670_s2 + $0x1] ss:$0 sm:$0xff]  ;;  %v3304_v41 = vld [vmem:[%s3672_s4] ss:$0 sm:$0xff]  ;;  %v3310_v44 = vld [vmem:[%s3670_s2 + $0x2] ss:$0 sm:$0xff] }
  0x18   :  { %2586 = vmatmul.mubr.msk.bf16.vlgmr.msra.gmra.mrb[0].mxu0 %vm85_vm2, %v71_v3  ;;  %2592 = vmatmul.mubr.msk.bf16.vlgmr.msra.gmra.mrb[0].mxu1 %vm85_vm2, %v71_v3  ;;  %v2403_v62 = vld [vmem:[%s3668_s0 + $0x4] sm:$0x3] }
  0x19   :  { %2596 = vmatpush3.bf16.msra.mxu0 %v3193_v5  ;;  %2597 = vmatprep.mubr.msk.bf16.mxu0 %vm3133_vm1, %v3132_v0  ;;  %v704_v63 = vpack.c.bf16 %v2403_v62, %v2403_v62 }
  0x1a   :  { %2601 = vmatprep.subr.bf16.mxu0 %v3132_v0  ;;  %2610 = vmatpush3.bf16.msra.mxu1 %v3199_v6  ;;  %v3223_v9 = vld [vmem:[#allocation2] sm:$0x3] }
  0x1b   :  { %2613 = vmatprep.mubr.msk.bf16.mxu1 %vm3133_vm1, %v3132_v0  ;;  %2611 = vmatprep.subr.bf16.mxu1 %v3132_v0  ;;  %v72_v11 = vpack.c.bf16 %v3223_v9, %v3223_v9 }
  0x1e   :  { %2612 = vmatpush3.bf16.msra.mxu1 %v3212_v7 }
  0x1f   :  { %2617 = vmatprep.subr.bf16.mxu1 %v3132_v0 }
  0x20   :  { %2598 = vmatmul.mubr.msk.bf16.vlgmr.msra.gmra.mrb[4].mxu0 %vm85_vm2, %v71_v3 }
  0x21   :  { %2602 = vmatpush3.bf16.msra.mxu0 %v3220_v8  ;;  %2605 = vmatprep.mubr.msk.bf16.mxu0 %vm3133_vm1, %v3132_v0 }
  0x22   :  { %2603 = vmatprep.subr.bf16.mxu0 %v3132_v0 }
  0x24   :  { %2614 = vmatmul.mubr.msk.bf16.vlgmr.msra.gmra.mrb[0].mxu1 %vm245_vm3, %v72_v11 }
  0x25   :  { %2604 = vmatpush3.bf16.msra.mxu0 %v3231_v10  ;;  %2618 = vmatpush3.bf16.msra.mxu1 %v3241_v12 }
  0x26   :  { %2625 = vmatprep.subr.bf16.mxu0 %v3132_v0  ;;  %2621 = vmatprep.mubr.msk.bf16.mxu1 %vm3133_vm1, %v3132_v0 }
  0x27   :  { %2619 = vmatprep.subr.bf16.mxu1 %v3132_v0 }
  0x28   :  { %2606 = vmatmul.mubr.msk.bf16.vlgmr.msra.gmra.mrb[0].mxu0 %vm245_vm3, %v72_v11 }
  0x29   :  { %2626 = vmatpush3.bf16.msra.mxu0 %v3184_v1  ;;  %2627 = vmatprep.mubr.msk.bf16.mxu0 %vm3133_vm1, %v3132_v0 }
  0x2a   :  { %2637 = vmatprep.subr.bf16.mxu0 %v3132_v0  ;;  %2620 = vmatpush3.bf16.msra.mxu1 %v3250_v13 }
  0x2b   :  { %2631 = vmatprep.subr.bf16.mxu1 %v3132_v0 }
  0x2d   :  { %2622 = vmatmul.mubr.msk.bf16.vlgmr.msra.gmra.mrb[4].mxu1 %vm245_vm3, %v72_v11 }
  0x2e   :  { %2632 = vmatpush3.bf16.msra.mxu1 %v3190_v4  ;;  %2633 = vmatprep.mubr.msk.bf16.mxu1 %vm3133_vm1, %v3132_v0 }
  0x2f   :  { %2651 = vmatprep.subr.bf16.mxu1 %v3132_v0 }
  0x30   :  { %2628 = vmatmul.mubr.msk.bf16.vlgmr.msra.gmra.mrb[8].mxu0 %vm85_vm2, %v428_v15 }
  0x31   :  { %2638 = vmatpush3.bf16.msra.mxu0 %v3193_v5  ;;  %2639 = vmatprep.mubr.msk.bf16.mxu0 %vm3133_vm1, %v3132_v0 }
  0x32   :  { %2643 = vmatprep.subr.bf16.mxu0 %v3132_v0 }
  0x35   :  { %2634 = vmatmul.mubr.msk.bf16.vlgmr.msra.gmra.mrb[8].mxu1 %vm85_vm2, %v428_v15 }
  0x36   :  { %2652 = vmatpush3.bf16.msra.mxu1 %v3199_v6  ;;  %2655 = vmatprep.mubr.msk.bf16.mxu1 %vm3133_vm1, %v3132_v0 }
  0x37   :  { %2653 = vmatprep.subr.bf16.mxu1 %v3132_v0 }
  0x38   :  { %2640 = vmatmul.mubr.msk.bf16.vlgmr.msra.gmra.mrb[12].mxu0 %vm85_vm2, %v428_v15 }
  0x39   :  { %2644 = vmatpush3.bf16.msra.mxu0 %v3220_v8  ;;  %2647 = vmatprep.mubr.msk.bf16.mxu0 %vm3133_vm1, %v3132_v0 }
  0x3a   :  { %2654 = vmatpush3.bf16.msra.mxu1 %v3212_v7  ;;  %2645 = vmatprep.subr.bf16.mxu0 %v3132_v0 }
  0x3b   :  { %2659 = vmatprep.subr.bf16.mxu1 %v3132_v0 }
  0x3d   :  { %2646 = vmatpush3.bf16.msra.mxu0 %v3231_v10 }
  0x3e   :  { %2667 = vmatprep.subr.bf16.mxu0 %v3132_v0 }
  0xf3   :  { %v227_v16 = vpop.f32.mrb[4].mxu0 }
  0xf4   :  { %v2599_v17 = vpop.f32.mrb[5].mxu0  ;;  %v228_v46 = vadd.f32 %v3310_v44, %v227_v16 }
  0xf5   :  { %v230_v18 = vpop.f32.mrb[6].mxu0 }
  0xf6   :  { %v2600_v19 = vpop.f32.mrb[7].mxu0 }
  0xf7   :  { %v335_v20 = vpop.f32.mrb[0].mxu1 }
  0xf8   :  { %v2615_v22 = vpop.f32.mrb[1].mxu1  ;;  %v2920_v32 = vadd.f32 %v3297_v25, %v335_v20 }
  0xf9   :  { %v338_v24 = vpop.f32.mrb[2].mxu1 }
  0xfa   :  { %v2616_v28 = vpop.f32.mrb[3].mxu1  ;;  %v2388_v35 = vmul.f32 -1.442695, %v2920_v32 }
  0xfb   :  { %v283_v23 = vpop.f32.mrb[0].mxu0 }
  0xfc   :  { %v2919_v26 = vadd.f32 %v3292_v21, %v283_v23  ;;  %v2607_v27 = vpop.f32.mrb[1].mxu0 }
  0xfd   :  { %v286_v29 = vpop.f32.mrb[2].mxu0 }
  0xfe   :  { %v2387_v30 = vmul.f32 -1.442695, %v2919_v26  ;;  %v2608_v31 = vpop.f32.mrb[3].mxu0 }
 0x100   :  { %3013 = vpow2.f32 %v2387_v30  ;;  %v407_v33 = vpop.f32.mrb[4].mxu1 }
 0x101   :  { %v2623_v34 = vpop.f32.mrb[5].mxu1  ;;  %3015 = vpow2.f32 %v2388_v35  ;;  %v408_v43 = vadd.f32 %v3304_v41, %v407_v33 }
 0x102   :  { %v410_v36 = vpop.f32.mrb[6].mxu1 }
 0x103   :  { %v2624_v37 = vpop.f32.mrb[7].mxu1 }
 0x10a   :  { %v3014_v38 = vpop.eup %3013 }
 0x10b   :  { %v345_v39 = vadd.f32 1.0, %v3014_v38  ;;  %v3016_v40 = vpop.eup %3015  ;;  %v547_v58 = vpop.f32.mrb[12].mxu0 }
 0x10c   :  { %v352_v42 = vadd.f32 1.0, %v3016_v40  ;;  %v2641_v59 = vpop.f32.mrb[13].mxu0  ;;  %v548_v34 = vadd.f32 %v3310_v44, %v547_v58 }
 0x10d   :  { %3017 = vrcp.f32 %v345_v39  ;;  %v550_v60 = vpop.f32.mrb[14].mxu0 }
 0x10e   :  { %3019 = vrcp.f32 %v352_v42  ;;  %v2642_v61 = vpop.f32.mrb[15].mxu0 }
 0x117   :  { %v3018_v45 = vpop.eup %3017 }
 0x118   :  { %v413_v47 = vmul.f32 %v3018_v45, %v408_v43  ;;  %v3020_v49 = vpop.eup %3019 }
 0x119   :  { %v416_v50 = vsub.f32 1.0, %v3020_v49  ;;  %v418_v52 = vmul.f32 %v3020_v49, %v3223_v9 }
 0x11a   :  { %v414_v48 = vadd.f32 %v413_v47, %v228_v46 }
 0x11c   :  { %3021 = vtanh.f32 %v414_v48 }
 0x126   :  { %v3022_v51 = vpop.eup %3021 }
 0x127   :  { %v417_v53 = vmul.f32 %v3022_v51, %v416_v50 }
 0x129   :  { %v419_v54 = vadd.f32 %v418_v52, %v417_v53  ;;  %v2413_v52 = vld [vmem:[%s3668_s0 + $0x6] sm:$0x3] }
 0x12a   :  { %v980_v53 = vpack.c.bf16 %v2413_v52, %v2413_v52 }
 0x12b   :  { %421 = vst.msk [vmem:[#allocation2] sm:$0x3] %vm39_vm0, %v419_v54  ;;  %v422_v55 = vpack.c.bf16 %v419_v54, %v419_v54 }
 0x12d   :  { %424 = vst.msk [vmem:[%s3673_s5] sm:$0x1] %vm423_vm4, %v422_v55 }
 0x132   :  { %v3319_v56 = vld [vmem:[#allocation2] sm:$0x3] }
 0x133   :  { %v429_v57 = vpack.c.bf16 %v3319_v56, %v3319_v56 }
 0x135   :  { %2648 = vmatmul.mubr.msk.bf16.vlgmr.msra.gmra.mrb[8].mxu0 %vm245_vm3, %v429_v57  ;;  %2656 = vmatmul.mubr.msk.bf16.vlgmr.msra.gmra.mrb[8].mxu1 %vm245_vm3, %v429_v57 }
 0x136   :  { %2660 = vmatpush3.bf16.msra.mxu1 %v3241_v12  ;;  %2663 = vmatprep.mubr.msk.bf16.mxu1 %vm3133_vm1, %v3132_v0 }
 0x137   :  { %2661 = vmatprep.subr.bf16.mxu1 %v3132_v0  ;;  %2668 = vmatpush3.bf16.msra.mxu0 %v3184_v1 }
 0x138   :  { %2669 = vmatprep.mubr.msk.bf16.mxu0 %vm3133_vm1, %v3132_v0  ;;  %2679 = vmatprep.subr.bf16.mxu0 %v3132_v0 }
 0x13a   :  { %2662 = vmatpush3.bf16.msra.mxu1 %v3250_v13 }
 0x13b   :  { %2673 = vmatprep.subr.bf16.mxu1 %v3132_v0 }
 0x13d   :  { %2664 = vmatmul.mubr.msk.bf16.vlgmr.msra.gmra.mrb[12].mxu1 %vm245_vm3, %v429_v57  ;;  %2670 = vmatmul.mubr.msk.bf16.vlgmr.msra.gmra.mrb[16].mxu0 %vm85_vm2, %v704_v63 }
 0x13e   :  { %2674 = vmatpush3.bf16.msra.mxu1 %v3190_v4  ;;  %2675 = vmatprep.mubr.msk.bf16.mxu1 %vm3133_vm1, %v3132_v0 }
 0x13f   :  { %2693 = vmatprep.subr.bf16.mxu1 %v3132_v0  ;;  %2680 = vmatpush3.bf16.msra.mxu0 %v3193_v5 }
 0x140   :  { %2681 = vmatprep.mubr.msk.bf16.mxu0 %vm3133_vm1, %v3132_v0  ;;  %2685 = vmatprep.subr.bf16.mxu0 %v3132_v0 }
 0x145   :  { %2676 = vmatmul.mubr.msk.bf16.vlgmr.msra.gmra.mrb[16].mxu1 %vm85_vm2, %v704_v63  ;;  %2682 = vmatmul.mubr.msk.bf16.vlgmr.msra.gmra.mrb[20].mxu0 %vm85_vm2, %v704_v63 }
 0x146   :  { %2694 = vmatpush3.bf16.msra.mxu1 %v3199_v6  ;;  %2697 = vmatprep.mubr.msk.bf16.mxu1 %vm3133_vm1, %v3132_v0 }
 0x147   :  { %2695 = vmatprep.subr.bf16.mxu1 %v3132_v0  ;;  %2686 = vmatpush3.bf16.msra.mxu0 %v3220_v8 }
 0x148   :  { %2689 = vmatprep.mubr.msk.bf16.mxu0 %vm3133_vm1, %v3132_v0  ;;  %2687 = vmatprep.subr.bf16.mxu0 %v3132_v0 }
 0x14a   :  { %2696 = vmatpush3.bf16.msra.mxu1 %v3212_v7 }
 0x14b   :  { %2701 = vmatprep.subr.bf16.mxu1 %v3132_v0  ;;  %2688 = vmatpush3.bf16.msra.mxu0 %v3231_v10 }
 0x14c   :  { %2709 = vmatprep.subr.bf16.mxu0 %v3132_v0 }
 0x208   :  { %v590_v2 = vpop.f32.mrb[8].mxu0  ;;  %v630_v3 = vpop.f32.mrb[8].mxu1 }
 0x209   :  { %v2921_v9 = vadd.f32 %v3292_v21, %v590_v2  ;;  %v2649_v11 = vpop.f32.mrb[9].mxu0  ;;  %v2657_v14 = vpop.f32.mrb[9].mxu1  ;;  %v2922_v20 = vadd.f32 %v3297_v25, %v630_v3 }
 0x20a   :  { %v593_v15 = vpop.f32.mrb[10].mxu0  ;;  %v633_v16 = vpop.f32.mrb[10].mxu1 }
 0x20b   :  { %v2399_v17 = vmul.f32 -1.442695, %v2921_v9  ;;  %v2650_v18 = vpop.f32.mrb[11].mxu0  ;;  %v2658_v19 = vpop.f32.mrb[11].mxu1  ;;  %v2400_v22 = vmul.f32 -1.442695, %v2922_v20 }
 0x20d   :  { %3023 = vpow2.f32 %v2399_v17 }
 0x20e   :  { %3025 = vpow2.f32 %v2400_v22 }
 0x210   :  { %v684_v23 = vpop.f32.mrb[12].mxu1 }
 0x211   :  { %v2665_v24 = vpop.f32.mrb[13].mxu1  ;;  %v685_v32 = vadd.f32 %v3304_v41, %v684_v23 }
 0x212   :  { %v687_v26 = vpop.f32.mrb[14].mxu1 }
 0x213   :  { %v2666_v27 = vpop.f32.mrb[15].mxu1 }
 0x217   :  { %v3024_v28 = vpop.eup %3023 }
 0x218   :  { %v640_v29 = vadd.f32 1.0, %v3024_v28  ;;  %v3026_v30 = vpop.eup %3025  ;;  %v823_v48 = vpop.f32.mrb[20].mxu0 }
 0x219   :  { %v647_v31 = vadd.f32 1.0, %v3026_v30  ;;  %v2683_v49 = vpop.f32.mrb[21].mxu0  ;;  %v824_v23 = vadd.f32 %v3310_v44, %v823_v48 }
 0x21a   :  { %3027 = vrcp.f32 %v640_v29  ;;  %v826_v50 = vpop.f32.mrb[22].mxu0 }
 0x21b   :  { %3029 = vrcp.f32 %v647_v31  ;;  %v2684_v51 = vpop.f32.mrb[23].mxu0 }
 0x224   :  { %v3028_v33 = vpop.eup %3027 }
 0x225   :  { %v690_v35 = vmul.f32 %v3028_v33, %v685_v32  ;;  %v3030_v37 = vpop.eup %3029 }
 0x226   :  { %v693_v38 = vsub.f32 1.0, %v3030_v37  ;;  %v695_v40 = vmul.f32 %v3030_v37, %v3319_v56 }
 0x227   :  { %v691_v36 = vadd.f32 %v690_v35, %v548_v34 }
 0x229   :  { %3031 = vtanh.f32 %v691_v36 }
 0x233   :  { %v3032_v39 = vpop.eup %3031 }
 0x234   :  { %v694_v42 = vmul.f32 %v3032_v39, %v693_v38 }
 0x236   :  { %v696_v43 = vadd.f32 %v695_v40, %v694_v42  ;;  %v2423_v40 = vld [vmem:[%s3668_s0 + $0x8] sm:$0x3] }
 0x237   :  { %v1256_v42 = vpack.c.bf16 %v2423_v40, %v2423_v40 }
 0x238   :  { %697 = vst.msk [vmem:[#allocation2] sm:$0x3] %vm39_vm0, %v696_v43  ;;  %v698_v45 = vpack.c.bf16 %v696_v43, %v696_v43 }
 0x23a   :  { %2402 = vst.msk [vmem:[%s3673_s5 + $0x1] sm:$0x1] %vm423_vm4, %v698_v45 }
 0x23f   :  { %v3372_v46 = vld [vmem:[#allocation2] sm:$0x3] }
 0x240   :  { %v705_v47 = vpack.c.bf16 %v3372_v46, %v3372_v46 }
 0x242   :  { %2690 = vmatmul.mubr.msk.bf16.vlgmr.msra.gmra.mrb[16].mxu0 %vm245_vm3, %v705_v47  ;;  %2698 = vmatmul.mubr.msk.bf16.vlgmr.msra.gmra.mrb[16].mxu1 %vm245_vm3, %v705_v47 }
 0x243   :  { %2702 = vmatpush3.bf16.msra.mxu1 %v3241_v12  ;;  %2705 = vmatprep.mubr.msk.bf16.mxu1 %vm3133_vm1, %v3132_v0 }
 0x244   :  { %2703 = vmatprep.subr.bf16.mxu1 %v3132_v0  ;;  %2710 = vmatpush3.bf16.msra.mxu0 %v3184_v1 }
 0x245   :  { %2711 = vmatprep.mubr.msk.bf16.mxu0 %vm3133_vm1, %v3132_v0  ;;  %2721 = vmatprep.subr.bf16.mxu0 %v3132_v0 }
 0x247   :  { %2704 = vmatpush3.bf16.msra.mxu1 %v3250_v13 }
 0x248   :  { %2715 = vmatprep.subr.bf16.mxu1 %v3132_v0 }
 0x24a   :  { %2706 = vmatmul.mubr.msk.bf16.vlgmr.msra.gmra.mrb[20].mxu1 %vm245_vm3, %v705_v47  ;;  %2712 = vmatmul.mubr.msk.bf16.vlgmr.msra.gmra.mrb[24].mxu0 %vm85_vm2, %v980_v53 }
 0x24b   :  { %2716 = vmatpush3.bf16.msra.mxu1 %v3190_v4  ;;  %2717 = vmatprep.mubr.msk.bf16.mxu1 %vm3133_vm1, %v3132_v0 }
 0x24c   :  { %2735 = vmatprep.subr.bf16.mxu1 %v3132_v0  ;;  %2722 = vmatpush3.bf16.msra.mxu0 %v3193_v5 }
 0x24d   :  { %2723 = vmatprep.mubr.msk.bf16.mxu0 %vm3133_vm1, %v3132_v0  ;;  %2727 = vmatprep.subr.bf16.mxu0 %v3132_v0 }
 0x252   :  { %2718 = vmatmul.mubr.msk.bf16.vlgmr.msra.gmra.mrb[24].mxu1 %vm85_vm2, %v980_v53  ;;  %2724 = vmatmul.mubr.msk.bf16.vlgmr.msra.gmra.mrb[28].mxu0 %vm85_vm2, %v980_v53 }
 0x253   :  { %2736 = vmatpush3.bf16.msra.mxu1 %v3199_v6  ;;  %2739 = vmatprep.mubr.msk.bf16.mxu1 %vm3133_vm1, %v3132_v0 }
 0x254   :  { %2737 = vmatprep.subr.bf16.mxu1 %v3132_v0  ;;  %2728 = vmatpush3.bf16.msra.mxu0 %v3220_v8 }
 0x255   :  { %2731 = vmatprep.mubr.msk.bf16.mxu0 %vm3133_vm1, %v3132_v0  ;;  %2729 = vmatprep.subr.bf16.mxu0 %v3132_v0 }
 0x257   :  { %2738 = vmatpush3.bf16.msra.mxu1 %v3212_v7 }
 0x258   :  { %2743 = vmatprep.subr.bf16.mxu1 %v3132_v0  ;;  %2730 = vmatpush3.bf16.msra.mxu0 %v3231_v10 }
 0x259   :  { %2751 = vmatprep.subr.bf16.mxu0 %v3132_v0 }
 0x315   :  { %v866_v54 = vpop.f32.mrb[16].mxu0  ;;  %v906_v55 = vpop.f32.mrb[16].mxu1 }
 0x316   :  { %v2923_v56 = vadd.f32 %v3292_v21, %v866_v54  ;;  %v2691_v57 = vpop.f32.mrb[17].mxu0  ;;  %v2699_v58 = vpop.f32.mrb[17].mxu1  ;;  %v2924_v2 = vadd.f32 %v3297_v25, %v906_v55 }
 0x317   :  { %v869_v59 = vpop.f32.mrb[18].mxu0  ;;  %v909_v60 = vpop.f32.mrb[18].mxu1 }
 0x318   :  { %v2409_v61 = vmul.f32 -1.442695, %v2923_v56  ;;  %v2692_v62 = vpop.f32.mrb[19].mxu0  ;;  %v2700_v63 = vpop.f32.mrb[19].mxu1  ;;  %v2410_v3 = vmul.f32 -1.442695, %v2924_v2 }
 0x31a   :  { %3033 = vpow2.f32 %v2409_v61 }
 0x31b   :  { %3035 = vpow2.f32 %v2410_v3 }
 0x31d   :  { %v960_v9 = vpop.f32.mrb[20].mxu1 }
 0x31e   :  { %v2707_v11 = vpop.f32.mrb[21].mxu1  ;;  %v961_v20 = vadd.f32 %v3304_v41, %v960_v9 }
 0x31f   :  { %v963_v14 = vpop.f32.mrb[22].mxu1 }
 0x320   :  { %v2708_v15 = vpop.f32.mrb[23].mxu1 }
 0x324   :  { %v3034_v16 = vpop.eup %3033 }
 0x325   :  { %v916_v17 = vadd.f32 1.0, %v3034_v16  ;;  %v3036_v18 = vpop.eup %3035  ;;  %v1099_v36 = vpop.f32.mrb[28].mxu0 }
 0x326   :  { %v923_v19 = vadd.f32 1.0, %v3036_v18  ;;  %v2725_v37 = vpop.f32.mrb[29].mxu0  ;;  %v1100_v9 = vadd.f32 %v3310_v44, %v1099_v36 }
 0x327   :  { %3037 = vrcp.f32 %v916_v17  ;;  %v1102_v38 = vpop.f32.mrb[30].mxu0 }
 0x328   :  { %3039 = vrcp.f32 %v923_v19  ;;  %v2726_v39 = vpop.f32.mrb[31].mxu0 }
 0x331   :  { %v3038_v22 = vpop.eup %3037 }
 0x332   :  { %v966_v24 = vmul.f32 %v3038_v22, %v961_v20  ;;  %v3040_v27 = vpop.eup %3039 }
 0x333   :  { %v969_v28 = vsub.f32 1.0, %v3040_v27  ;;  %v971_v30 = vmul.f32 %v3040_v27, %v3372_v46 }
 0x334   :  { %v967_v26 = vadd.f32 %v966_v24, %v824_v23 }
 0x336   :  { %3041 = vtanh.f32 %v967_v26 }
 0x340   :  { %v3042_v29 = vpop.eup %3041 }
 0x341   :  { %v970_v31 = vmul.f32 %v3042_v29, %v969_v28 }
 0x343   :  { %v972_v32 = vadd.f32 %v971_v30, %v970_v31  ;;  %v2433_v30 = vld [vmem:[%s3668_s0 + $0xa] sm:$0x3] }
 0x344   :  { %v1532_v31 = vpack.c.bf16 %v2433_v30, %v2433_v30 }
 0x345   :  { %973 = vst.msk [vmem:[#allocation2] sm:$0x3] %vm39_vm0, %v972_v32  ;;  %v974_v33 = vpack.c.bf16 %v972_v32, %v972_v32 }
 0x347   :  { %2412 = vst.msk [vmem:[%s3673_s5 + $0x2] sm:$0x1] %vm423_vm4, %v974_v33 }
 0x34c   :  { %v3425_v34 = vld [vmem:[#allocation2] sm:$0x3] }
 0x34d   :  { %v981_v35 = vpack.c.bf16 %v3425_v34, %v3425_v34 }
 0x34f   :  { %2732 = vmatmul.mubr.msk.bf16.vlgmr.msra.gmra.mrb[24].mxu0 %vm245_vm3, %v981_v35  ;;  %2740 = vmatmul.mubr.msk.bf16.vlgmr.msra.gmra.mrb[24].mxu1 %vm245_vm3, %v981_v35 }
 0x350   :  { %2744 = vmatpush3.bf16.msra.mxu1 %v3241_v12  ;;  %2747 = vmatprep.mubr.msk.bf16.mxu1 %vm3133_vm1, %v3132_v0 }
 0x351   :  { %2745 = vmatprep.subr.bf16.mxu1 %v3132_v0  ;;  %2752 = vmatpush3.bf16.msra.mxu0 %v3184_v1 }
 0x352   :  { %2753 = vmatprep.mubr.msk.bf16.mxu0 %vm3133_vm1, %v3132_v0  ;;  %2763 = vmatprep.subr.bf16.mxu0 %v3132_v0 }
 0x354   :  { %2746 = vmatpush3.bf16.msra.mxu1 %v3250_v13 }
 0x355   :  { %2757 = vmatprep.subr.bf16.mxu1 %v3132_v0 }
 0x357   :  { %2748 = vmatmul.mubr.msk.bf16.vlgmr.msra.gmra.mrb[28].mxu1 %vm245_vm3, %v981_v35  ;;  %2754 = vmatmul.mubr.msk.bf16.vlgmr.msra.gmra.mrb[32].mxu0 %vm85_vm2, %v1256_v42 }
 0x358   :  { %2758 = vmatpush3.bf16.msra.mxu1 %v3190_v4  ;;  %2759 = vmatprep.mubr.msk.bf16.mxu1 %vm3133_vm1, %v3132_v0 }
 0x359   :  { %2777 = vmatprep.subr.bf16.mxu1 %v3132_v0  ;;  %2764 = vmatpush3.bf16.msra.mxu0 %v3193_v5 }
 0x35a   :  { %2765 = vmatprep.mubr.msk.bf16.mxu0 %vm3133_vm1, %v3132_v0  ;;  %2769 = vmatprep.subr.bf16.mxu0 %v3132_v0 }
 0x35f   :  { %2760 = vmatmul.mubr.msk.bf16.vlgmr.msra.gmra.mrb[32].mxu1 %vm85_vm2, %v1256_v42  ;;  %2766 = vmatmul.mubr.msk.bf16.vlgmr.msra.gmra.mrb[36].mxu0 %vm85_vm2, %v1256_v42 }
 0x360   :  { %2778 = vmatpush3.bf16.msra.mxu1 %v3199_v6  ;;  %2781 = vmatprep.mubr.msk.bf16.mxu1 %vm3133_vm1, %v3132_v0 }
 0x361   :  { %2779 = vmatprep.subr.bf16.mxu1 %v3132_v0  ;;  %2770 = vmatpush3.bf16.msra.mxu0 %v3220_v8 }
 0x362   :  { %2773 = vmatprep.mubr.msk.bf16.mxu0 %vm3133_vm1, %v3132_v0  ;;  %2771 = vmatprep.subr.bf16.mxu0 %v3132_v0 }
 0x364   :  { %2780 = vmatpush3.bf16.msra.mxu1 %v3212_v7 }
 0x365   :  { %2785 = vmatprep.subr.bf16.mxu1 %v3132_v0  ;;  %2772 = vmatpush3.bf16.msra.mxu0 %v3231_v10 }
 0x366   :  { %2793 = vmatprep.subr.bf16.mxu0 %v3132_v0 }
 0x422   :  { %v1142_v43 = vpop.f32.mrb[24].mxu0  ;;  %v1182_v45 = vpop.f32.mrb[24].mxu1 }
 0x423   :  { %v2925_v46 = vadd.f32 %v3292_v21, %v1142_v43  ;;  %v2733_v47 = vpop.f32.mrb[25].mxu0  ;;  %v2741_v48 = vpop.f32.mrb[25].mxu1  ;;  %v2926_v54 = vadd.f32 %v3297_v25, %v1182_v45 }
 0x424   :  { %v1145_v49 = vpop.f32.mrb[26].mxu0  ;;  %v1185_v50 = vpop.f32.mrb[26].mxu1 }
 0x425   :  { %v2419_v51 = vmul.f32 -1.442695, %v2925_v46  ;;  %v2734_v52 = vpop.f32.mrb[27].mxu0  ;;  %v2742_v53 = vpop.f32.mrb[27].mxu1  ;;  %v2420_v55 = vmul.f32 -1.442695, %v2926_v54 }
 0x427   :  { %3043 = vpow2.f32 %v2419_v51 }
 0x428   :  { %3045 = vpow2.f32 %v2420_v55 }
 0x42a   :  { %v1236_v56 = vpop.f32.mrb[28].mxu1 }
 0x42b   :  { %v2749_v57 = vpop.f32.mrb[29].mxu1  ;;  %v1237_v2 = vadd.f32 %v3304_v41, %v1236_v56 }
 0x42c   :  { %v1239_v58 = vpop.f32.mrb[30].mxu1 }
 0x42d   :  { %v2750_v59 = vpop.f32.mrb[31].mxu1 }
 0x431   :  { %v3044_v60 = vpop.eup %3043 }
 0x432   :  { %v1192_v61 = vadd.f32 1.0, %v3044_v60  ;;  %v3046_v62 = vpop.eup %3045  ;;  %v1375_v26 = vpop.f32.mrb[36].mxu0 }
 0x433   :  { %v1199_v63 = vadd.f32 1.0, %v3046_v62  ;;  %v2767_v27 = vpop.f32.mrb[37].mxu0  ;;  %v1376_v56 = vadd.f32 %v3310_v44, %v1375_v26 }
 0x434   :  { %3047 = vrcp.f32 %v1192_v61  ;;  %v1378_v28 = vpop.f32.mrb[38].mxu0 }
 0x435   :  { %3049 = vrcp.f32 %v1199_v63  ;;  %v2768_v29 = vpop.f32.mrb[39].mxu0 }
 0x43e   :  { %v3048_v3 = vpop.eup %3047 }
 0x43f   :  { %v1242_v11 = vmul.f32 %v3048_v3, %v1237_v2  ;;  %v3050_v15 = vpop.eup %3049 }
 0x440   :  { %v1245_v16 = vsub.f32 1.0, %v3050_v15  ;;  %v1247_v18 = vmul.f32 %v3050_v15, %v3425_v34 }
 0x441   :  { %v1243_v14 = vadd.f32 %v1242_v11, %v1100_v9 }
 0x443   :  { %3051 = vtanh.f32 %v1243_v14 }
 0x44d   :  { %v3052_v17 = vpop.eup %3051 }
 0x44e   :  { %v1246_v19 = vmul.f32 %v3052_v17, %v1245_v16  ;;  %v2443_v17 = vld [vmem:[%s3668_s0 + $0xc] sm:$0x3] }
 0x450   :  { %v1248_v20 = vadd.f32 %v1247_v18, %v1246_v19  ;;  %v1808_v18 = vpack.c.bf16 %v2443_v17, %v2443_v17 }
 0x452   :  { %1249 = vst.msk [vmem:[#allocation2] sm:$0x3] %vm39_vm0, %v1248_v20  ;;  %v1250_v22 = vpack.c.bf16 %v1248_v20, %v1248_v20 }
 0x454   :  { %2422 = vst.msk [vmem:[%s3673_s5 + $0x3] sm:$0x1] %vm423_vm4, %v1250_v22 }
 0x459   :  { %v3478_v23 = vld [vmem:[#allocation2] sm:$0x3] }
 0x45a   :  { %v1257_v24 = vpack.c.bf16 %v3478_v23, %v3478_v23 }
 0x45c   :  { %2774 = vmatmul.mubr.msk.bf16.vlgmr.msra.gmra.mrb[32].mxu0 %vm245_vm3, %v1257_v24  ;;  %2782 = vmatmul.mubr.msk.bf16.vlgmr.msra.gmra.mrb[32].mxu1 %vm245_vm3, %v1257_v24 }
 0x45d   :  { %2786 = vmatpush3.bf16.msra.mxu1 %v3241_v12  ;;  %2789 = vmatprep.mubr.msk.bf16.mxu1 %vm3133_vm1, %v3132_v0 }
 0x45e   :  { %2787 = vmatprep.subr.bf16.mxu1 %v3132_v0  ;;  %2794 = vmatpush3.bf16.msra.mxu0 %v3184_v1 }
 0x45f   :  { %2795 = vmatprep.mubr.msk.bf16.mxu0 %vm3133_vm1, %v3132_v0  ;;  %2805 = vmatprep.subr.bf16.mxu0 %v3132_v0 }
 0x461   :  { %2788 = vmatpush3.bf16.msra.mxu1 %v3250_v13 }
 0x462   :  { %2799 = vmatprep.subr.bf16.mxu1 %v3132_v0 }
 0x464   :  { %2790 = vmatmul.mubr.msk.bf16.vlgmr.msra.gmra.mrb[36].mxu1 %vm245_vm3, %v1257_v24  ;;  %2796 = vmatmul.mubr.msk.bf16.vlgmr.msra.gmra.mrb[40].mxu0 %vm85_vm2, %v1532_v31 }
 0x465   :  { %2800 = vmatpush3.bf16.msra.mxu1 %v3190_v4  ;;  %2801 = vmatprep.mubr.msk.bf16.mxu1 %vm3133_vm1, %v3132_v0 }
 0x466   :  { %2819 = vmatprep.subr.bf16.mxu1 %v3132_v0  ;;  %2806 = vmatpush3.bf16.msra.mxu0 %v3193_v5 }
 0x467   :  { %2807 = vmatprep.mubr.msk.bf16.mxu0 %vm3133_vm1, %v3132_v0  ;;  %2811 = vmatprep.subr.bf16.mxu0 %v3132_v0 }
 0x46c   :  { %2802 = vmatmul.mubr.msk.bf16.vlgmr.msra.gmra.mrb[40].mxu1 %vm85_vm2, %v1532_v31  ;;  %2808 = vmatmul.mubr.msk.bf16.vlgmr.msra.gmra.mrb[44].mxu0 %vm85_vm2, %v1532_v31 }
 0x46d   :  { %2820 = vmatpush3.bf16.msra.mxu1 %v3199_v6  ;;  %2823 = vmatprep.mubr.msk.bf16.mxu1 %vm3133_vm1, %v3132_v0 }
 0x46e   :  { %2821 = vmatprep.subr.bf16.mxu1 %v3132_v0  ;;  %2812 = vmatpush3.bf16.msra.mxu0 %v3220_v8 }
 0x46f   :  { %2815 = vmatprep.mubr.msk.bf16.mxu0 %vm3133_vm1, %v3132_v0  ;;  %2813 = vmatprep.subr.bf16.mxu0 %v3132_v0 }
 0x471   :  { %2822 = vmatpush3.bf16.msra.mxu1 %v3212_v7 }
 0x472   :  { %2827 = vmatprep.subr.bf16.mxu1 %v3132_v0  ;;  %2814 = vmatpush3.bf16.msra.mxu0 %v3231_v10 }
 0x473   :  { %2835 = vmatprep.subr.bf16.mxu0 %v3132_v0 }
 0x52f   :  { %v1418_v32 = vpop.f32.mrb[32].mxu0  ;;  %v1458_v33 = vpop.f32.mrb[32].mxu1 }
 0x530   :  { %v2927_v34 = vadd.f32 %v3292_v21, %v1418_v32  ;;  %v2775_v35 = vpop.f32.mrb[33].mxu0  ;;  %v2783_v36 = vpop.f32.mrb[33].mxu1  ;;  %v2928_v43 = vadd.f32 %v3297_v25, %v1458_v33 }
 0x531   :  { %v1421_v37 = vpop.f32.mrb[34].mxu0  ;;  %v1461_v38 = vpop.f32.mrb[34].mxu1 }
 0x532   :  { %v2429_v39 = vmul.f32 -1.442695, %v2927_v34  ;;  %v2776_v40 = vpop.f32.mrb[35].mxu0  ;;  %v2784_v42 = vpop.f32.mrb[35].mxu1  ;;  %v2430_v45 = vmul.f32 -1.442695, %v2928_v43 }
 0x534   :  { %3053 = vpow2.f32 %v2429_v39 }
 0x535   :  { %3055 = vpow2.f32 %v2430_v45 }
 0x537   :  { %v1512_v46 = vpop.f32.mrb[36].mxu1 }
 0x538   :  { %v2791_v47 = vpop.f32.mrb[37].mxu1  ;;  %v1513_v54 = vadd.f32 %v3304_v41, %v1512_v46 }
 0x539   :  { %v1515_v48 = vpop.f32.mrb[38].mxu1 }
 0x53a   :  { %v2792_v49 = vpop.f32.mrb[39].mxu1 }
 0x53e   :  { %v3054_v50 = vpop.eup %3053 }
 0x53f   :  { %v1468_v51 = vadd.f32 1.0, %v3054_v50  ;;  %v3056_v52 = vpop.eup %3055  ;;  %v1651_v14 = vpop.f32.mrb[44].mxu0 }
 0x540   :  { %v1475_v53 = vadd.f32 1.0, %v3056_v52  ;;  %v1652_v38 = vadd.f32 %v3310_v44, %v1651_v14  ;;  %v3093_v52 = vld [vmem:[#allocation3] sm:$0xff]  }
 0x541   :  { %3057 = vrcp.f32 %v1468_v51 }
 0x542   :  { %3059 = vrcp.f32 %v1475_v53  ;;  %v3094_v53 = vld [vmem:[#allocation3 + $0x8] sm:$0xff]  }
 0x54b   :  { %v3058_v55 = vpop.eup %3057 }
 0x54c   :  { %v1518_v57 = vmul.f32 %v3058_v55, %v1513_v54  ;;  %v3060_v59 = vpop.eup %3059 }
 0x54d   :  { %v1521_v60 = vsub.f32 1.0, %v3060_v59  ;;  %v1523_v62 = vmul.f32 %v3060_v59, %v3478_v23  ;;  %v3096_v59 = vld [vmem:[%s3671_s3 + $0x10] sm:$0xff]  }
 0x54e   :  { %v1519_v58 = vadd.f32 %v1518_v57, %v1376_v56  ;;  %v2453_v57 = vld [vmem:[%s3668_s0 + $0xe] sm:$0x3] }
 0x550   :  { %3061 = vtanh.f32 %v1519_v58  ;;  %v3095_v58 = vld [vmem:[#allocation3 + $0x10] sm:$0xff]  }
 0x55a   :  { %v3062_v61 = vpop.eup %3061 }
 0x55b   :  { %v1522_v63 = vmul.f32 %v3062_v61, %v1521_v60  ;;  %v3097_v60 = vld [vmem:[%s3671_s3 + $0x18] sm:$0xff]   ;;  %v3098_v61 = vld [vmem:[%s3671_s3] sm:$0xff]  }
 0x55d   :  { %v1524_v2 = vadd.f32 %v1523_v62, %v1522_v63 }
 0x55f   :  { %v1526_v3 = vpack.c.bf16 %v1524_v2, %v1524_v2  ;;  %1525 = vst.msk [vmem:[#allocation2] sm:$0x3] %vm39_vm0, %v1524_v2 }
 0x561   :  { %2432 = vst.msk [vmem:[%s3673_s5 + $0x4] sm:$0x1] %vm423_vm4, %v1526_v3 }
 0x566   :  { %v3531_v9 = vld [vmem:[#allocation2] sm:$0x3] }
 0x567   :  { %v1533_v11 = vpack.c.bf16 %v3531_v9, %v3531_v9 }
 0x569   :  { %2816 = vmatmul.mubr.msk.bf16.vlgmr.msra.gmra.mrb[40].mxu0 %vm245_vm3, %v1533_v11  ;;  %2824 = vmatmul.mubr.msk.bf16.vlgmr.msra.gmra.mrb[40].mxu1 %vm245_vm3, %v1533_v11 }
 0x56a   :  { %2828 = vmatpush3.bf16.msra.mxu1 %v3241_v12  ;;  %2831 = vmatprep.mubr.msk.bf16.mxu1 %vm3133_vm1, %v3132_v0 }
 0x56b   :  { %2829 = vmatprep.subr.bf16.mxu1 %v3132_v0  ;;  %2836 = vmatpush3.bf16.msra.mxu0 %v3184_v1  ;;  %v2809_v1 = vpop.f32.mrb[45].mxu0 }
 0x56c   :  { %2837 = vmatprep.mubr.msk.bf16.mxu0 %vm3133_vm1, %v3132_v0  ;;  %2847 = vmatprep.subr.bf16.mxu0 %v3132_v0  ;;  %v1654_v15 = vpop.f32.mrb[46].mxu0 }
 0x56d   :  { %v2810_v16 = vpop.f32.mrb[47].mxu0 }
 0x56e   :  { %2830 = vmatpush3.bf16.msra.mxu1 %v3250_v13 }
 0x56f   :  { %2841 = vmatprep.subr.bf16.mxu1 %v3132_v0 }
 0x571   :  { %2832 = vmatmul.mubr.msk.bf16.vlgmr.msra.gmra.mrb[44].mxu1 %vm245_vm3, %v1533_v11  ;;  %2838 = vmatmul.mubr.msk.bf16.vlgmr.msra.gmra.mrb[48].mxu0 %vm85_vm2, %v1808_v18 }
 0x572   :  { %2842 = vmatpush3.bf16.msra.mxu1 %v3190_v4  ;;  %2843 = vmatprep.mubr.msk.bf16.mxu1 %vm3133_vm1, %v3132_v0 }
 0x573   :  { %2861 = vmatprep.subr.bf16.mxu1 %v3132_v0  ;;  %2848 = vmatpush3.bf16.msra.mxu0 %v3193_v5 }
 0x574   :  { %2849 = vmatprep.mubr.msk.bf16.mxu0 %vm3133_vm1, %v3132_v0  ;;  %2853 = vmatprep.subr.bf16.mxu0 %v3132_v0 }
 0x579   :  { %2844 = vmatmul.mubr.msk.bf16.vlgmr.msra.gmra.mrb[48].mxu1 %vm85_vm2, %v1808_v18  ;;  %2850 = vmatmul.mubr.msk.bf16.vlgmr.msra.gmra.mrb[52].mxu0 %vm85_vm2, %v1808_v18 }
 0x57a   :  { %2862 = vmatpush3.bf16.msra.mxu1 %v3199_v6  ;;  %2865 = vmatprep.mubr.msk.bf16.mxu1 %vm3133_vm1, %v3132_v0 }
 0x57b   :  { %2863 = vmatprep.subr.bf16.mxu1 %v3132_v0  ;;  %2854 = vmatpush3.bf16.msra.mxu0 %v3220_v8 }
 0x57c   :  { %2857 = vmatprep.mubr.msk.bf16.mxu0 %vm3133_vm1, %v3132_v0  ;;  %2855 = vmatprep.subr.bf16.mxu0 %v3132_v0 }
 0x57e   :  { %2864 = vmatpush3.bf16.msra.mxu1 %v3212_v7 }
 0x57f   :  { %2869 = vmatprep.subr.bf16.mxu1 %v3132_v0  ;;  %2856 = vmatpush3.bf16.msra.mxu0 %v3231_v10 }
 0x580   :  { %2877 = vmatprep.subr.bf16.mxu0 %v3132_v0 }
 0x63c   :  { %v1694_v4 = vpop.f32.mrb[40].mxu0  ;;  %v1734_v5 = vpop.f32.mrb[40].mxu1 }
 0x63d   :  { %v2929_v6 = vadd.f32 %v3292_v21, %v1694_v4  ;;  %v2817_v7 = vpop.f32.mrb[41].mxu0  ;;  %v2825_v19 = vpop.f32.mrb[41].mxu1  ;;  %v2930_v26 = vadd.f32 %v3297_v25, %v1734_v5 }
 0x63e   :  { %v1697_v20 = vpop.f32.mrb[42].mxu0  ;;  %v1737_v22 = vpop.f32.mrb[42].mxu1 }
 0x63f   :  { %v2439_v23 = vmul.f32 -1.442695, %v2929_v6  ;;  %v2818_v24 = vpop.f32.mrb[43].mxu0  ;;  %v2826_v8 = vpop.f32.mrb[43].mxu1  ;;  %v2440_v27 = vmul.f32 -1.442695, %v2930_v26 }
 0x641   :  { %3063 = vpow2.f32 %v2439_v23 }
 0x642   :  { %3065 = vpow2.f32 %v2440_v27 }
 0x644   :  { %v1788_v28 = vpop.f32.mrb[44].mxu1 }
 0x645   :  { %v2833_v29 = vpop.f32.mrb[45].mxu1  ;;  %v1789_v36 = vadd.f32 %v3304_v41, %v1788_v28 }
 0x646   :  { %v1791_v30 = vpop.f32.mrb[46].mxu1 }
 0x647   :  { %v2834_v31 = vpop.f32.mrb[47].mxu1 }
 0x64b   :  { %v3064_v32 = vpop.eup %3063 }
 0x64c   :  { %v1744_v33 = vadd.f32 1.0, %v3064_v32  ;;  %v3066_v34 = vpop.eup %3065 }
 0x64d   :  { %v1751_v35 = vadd.f32 1.0, %v3066_v34  ;;  %v3100_v34 = vld [vmem:[%s3671_s3 + $0x28] sm:$0xff]  }
 0x64e   :  { %3067 = vrcp.f32 %v1744_v33  ;;  %v3099_v33 = vld [vmem:[%s3671_s3 + $0x20] sm:$0xff]  }
 0x64f   :  { %3069 = vrcp.f32 %v1751_v35 }
 0x658   :  { %v3068_v37 = vpop.eup %3067 }
 0x659   :  { %v1794_v39 = vmul.f32 %v3068_v37, %v1789_v36  ;;  %v3070_v42 = vpop.eup %3069 }
 0x65a   :  { %v1797_v43 = vsub.f32 1.0, %v3070_v42  ;;  %v1799_v46 = vmul.f32 %v3070_v42, %v3531_v9  ;;  %v3101_v42 = vld [vmem:[%s3670_s2] ss:$0 sm:$0xff] }
 0x65b   :  { %v1795_v40 = vadd.f32 %v1794_v39, %v1652_v38 }
 0x65d   :  { %3071 = vtanh.f32 %v1795_v40 }
 0x667   :  { %v3072_v45 = vpop.eup %3071 }
 0x668   :  { %v1798_v47 = vmul.f32 %v3072_v45, %v1797_v43 }
 0x66a   :  { %v1800_v48 = vadd.f32 %v1799_v46, %v1798_v47 }
 0x66c   :  { %v1802_v49 = vpack.c.bf16 %v1800_v48, %v1800_v48  ;;  %1801 = vst.msk [vmem:[#allocation2] sm:$0x3] %vm39_vm0, %v1800_v48 }
 0x66e   :  { %2442 = vst.msk [vmem:[%s3673_s5 + $0x5] sm:$0x1] %vm423_vm4, %v1802_v49 }
 0x673   :  { %v3584_v50 = vld [vmem:[#allocation2] sm:$0x3] }
 0x674   :  { %v1809_v51 = vpack.c.bf16 %v3584_v50, %v3584_v50 }
 0x676   :  { %2858 = vmatmul.mubr.msk.bf16.vlgmr.msra.gmra.mrb[48].mxu0 %vm245_vm3, %v1809_v51  ;;  %2866 = vmatmul.mubr.msk.bf16.vlgmr.msra.gmra.mrb[48].mxu1 %vm245_vm3, %v1809_v51 }
 0x677   :  { %2870 = vmatpush3.bf16.msra.mxu1 %v3241_v12  ;;  %2873 = vmatprep.mubr.msk.bf16.mxu1 %vm3133_vm1, %v3132_v0  ;;  %v1927_v12 = vpop.f32.mrb[52].mxu0 }
 0x678   :  { %2871 = vmatprep.subr.bf16.mxu1 %v3132_v0  ;;  %2878 = vmatpush3.bf16.msra.mxu0 %v3093_v52  ;;  %v2851_v54 = vpop.f32.mrb[53].mxu0  ;;  %v1928_v24 = vadd.f32 %v3310_v44, %v1927_v12 }
 0x679   :  { %2879 = vmatprep.mubr.msk.bf16.mxu0 %vm3133_vm1, %v3132_v0  ;;  %2889 = vmatprep.subr.bf16.mxu0 %v3132_v0  ;;  %v1930_v55 = vpop.f32.mrb[54].mxu0 }
 0x67a   :  { %v2852_v56 = vpop.f32.mrb[55].mxu0 }
 0x67b   :  { %2872 = vmatpush3.bf16.msra.mxu1 %v3250_v13  ;;  %v2084_v13 = vpack.c.bf16 %v2453_v57, %v2453_v57 }
 0x67c   :  { %2883 = vmatprep.subr.bf16.mxu1 %v3132_v0 }
 0x67e   :  { %2874 = vmatmul.mubr.msk.bf16.vlgmr.msra.gmra.mrb[52].mxu1 %vm245_vm3, %v1809_v51  ;;  %2880 = vmatmul.mubr.msk.bf16.vlgmr.msra.gmra.mrb[56].mxu0 %vm85_vm2, %v2084_v13  ;;  %v3102_v51 = vld [vmem:[%s3670_s2 + $0x1] ss:$0 sm:$0xff] }
 0x67f   :  { %2884 = vmatpush3.bf16.msra.mxu1 %v3094_v53  ;;  %2885 = vmatprep.mubr.msk.bf16.mxu1 %vm3133_vm1, %v3132_v0 }
 0x680   :  { %2903 = vmatprep.subr.bf16.mxu1 %v3132_v0  ;;  %2890 = vmatpush3.bf16.msra.mxu0 %v3095_v58 }
 0x681   :  { %2891 = vmatprep.mubr.msk.bf16.mxu0 %vm3133_vm1, %v3132_v0  ;;  %2895 = vmatprep.subr.bf16.mxu0 %v3132_v0 }
 0x686   :  { %2886 = vmatmul.mubr.msk.bf16.vlgmr.msra.gmra.mrb[56].mxu1 %vm85_vm2, %v2084_v13  ;;  %2892 = vmatmul.mubr.msk.bf16.vlgmr.msra.gmra.mrb[60].mxu0 %vm85_vm2, %v2084_v13 }
 0x687   :  { %2904 = vmatpush3.bf16.msra.mxu1 %v3096_v59  ;;  %2907 = vmatprep.mubr.msk.bf16.mxu1 %vm3133_vm1, %v3132_v0 }
 0x688   :  { %2905 = vmatprep.subr.bf16.mxu1 %v3132_v0  ;;  %2896 = vmatpush3.bf16.msra.mxu0 %v3098_v61 }
 0x689   :  { %2899 = vmatprep.mubr.msk.bf16.mxu0 %vm3133_vm1, %v3132_v0  ;;  %2897 = vmatprep.subr.bf16.mxu0 %v3132_v0 }
 0x68b   :  { %2906 = vmatpush3.bf16.msra.mxu1 %v3097_v60  ;;  %v3103_v60 = vld [vmem:[%s3672_s4] ss:$0 sm:$0xff] }
 0x68c   :  { %2911 = vmatprep.subr.bf16.mxu1 %v3132_v0  ;;  %2898 = vmatpush3.bf16.msra.mxu0 %v3231_v10 }
 0x749   :  { %v1970_v62 = vpop.f32.mrb[48].mxu0  ;;  %v2010_v63 = vpop.f32.mrb[48].mxu1 }
 0x74a   :  { %v2931_v2 = vadd.f32 %v3292_v21, %v1970_v62  ;;  %v2859_v3 = vpop.f32.mrb[49].mxu0  ;;  %v2867_v9 = vpop.f32.mrb[49].mxu1  ;;  %v2932_v17 = vadd.f32 %v3297_v25, %v2010_v63  ;;  %v3104_v63 = vld [vmem:[%s3670_s2 + $0x2] ss:$0 sm:$0xff] }
 0x74b   :  { %v1973_v11 = vpop.f32.mrb[50].mxu0  ;;  %v2013_v14 = vpop.f32.mrb[50].mxu1 }
 0x74c   :  { %v2449_v1 = vmul.f32 -1.442695, %v2931_v2  ;;  %v2860_v15 = vpop.f32.mrb[51].mxu0  ;;  %v2868_v16 = vpop.f32.mrb[51].mxu1  ;;  %v2450_v18 = vmul.f32 -1.442695, %v2932_v17 }
 0x74e   :  { %3073 = vpow2.f32 %v2449_v1 }
 0x74f   :  { %3075 = vpow2.f32 %v2450_v18 }
 0x751   :  { %v2064_v4 = vpop.f32.mrb[52].mxu1 }
 0x752   :  { %v2875_v5 = vpop.f32.mrb[53].mxu1  ;;  %v2065_v22 = vadd.f32 %v3304_v41, %v2064_v4 }
 0x753   :  { %v2067_v6 = vpop.f32.mrb[54].mxu1 }
 0x754   :  { %v2876_v7 = vpop.f32.mrb[55].mxu1 }
 0x758   :  { %v3074_v10 = vpop.eup %3073 }
 0x759   :  { %v2020_v19 = vadd.f32 1.0, %v3074_v10  ;;  %v3076_v21 = vpop.eup %3075  ;;  %v2203_v35 = vpop.f32.mrb[60].mxu0 }
 0x75a   :  { %v2027_v20 = vadd.f32 1.0, %v3076_v21  ;;  %v2893_v36 = vpop.f32.mrb[61].mxu0  ;;  %v2204_v2 = vadd.f32 %v3104_v63, %v2203_v35 }
 0x75b   :  { %3077 = vrcp.f32 %v2020_v19  ;;  %v2206_v37 = vpop.f32.mrb[62].mxu0 }
 0x75c   :  { %3079 = vrcp.f32 %v2027_v20  ;;  %v2894_v38 = vpop.f32.mrb[63].mxu0 }
 0x765   :  { %v3078_v23 = vpop.eup %3077 }
 0x766   :  { %v2070_v8 = vmul.f32 %v3078_v23, %v2065_v22  ;;  %v3080_v26 = vpop.eup %3079 }
 0x767   :  { %v2073_v27 = vsub.f32 1.0, %v3080_v26  ;;  %v2075_v29 = vmul.f32 %v3080_v26, %v3584_v50 }
 0x768   :  { %v2071_v25 = vadd.f32 %v2070_v8, %v1928_v24 }
 0x76a   :  { %3081 = vtanh.f32 %v2071_v25 }
 0x774   :  { %v3082_v28 = vpop.eup %3081 }
 0x775   :  { %v2074_v30 = vmul.f32 %v3082_v28, %v2073_v27 }
 0x777   :  { %v2076_v31 = vadd.f32 %v2075_v29, %v2074_v30 }
 0x779   :  { %v2078_v32 = vpack.c.bf16 %v2076_v31, %v2076_v31  ;;  %2077 = vst.msk [vmem:[#allocation2] sm:$0x3] %vm39_vm0, %v2076_v31 }
 0x77b   :  { %2452 = vst.msk [vmem:[%s3673_s5 + $0x6] sm:$0x1] %vm423_vm4, %v2078_v32 }
 0x780   :  { %v2081_v41 = vld [vmem:[#allocation2] sm:$0x3] }
 0x781   :  { %v2085_v44 = vpack.c.bf16 %v2081_v41, %v2081_v41 }
 0x783   :  { %2900 = vmatmul.mubr.msk.bf16.vlgmr.msra.gmra.mrb[56].mxu0 %vm245_vm3, %v2085_v44  ;;  %2908 = vmatmul.mubr.msk.bf16.vlgmr.msra.gmra.mrb[56].mxu1 %vm245_vm3, %v2085_v44 }
 0x784   :  { %2912 = vmatpush3.bf16.msra.mxu1 %v3099_v33  ;;  %2915 = vmatprep.mubr.msk.bf16.mxu1 %vm3133_vm1, %v3132_v0 }
 0x785   :  { %2913 = vmatprep.subr.bf16.mxu1 %v3132_v0 }
 0x788   :  { %2914 = vmatpush3.bf16.msra.mxu1 %v3100_v34 }
 0x78b   :  { %2916 = vmatmul.mubr.msk.bf16.vlgmr.msra.gmra.mrb[60].mxu1 %vm245_vm3, %v2085_v44 }
 0x856   :  { %v2246_v39 = vpop.f32.mrb[56].mxu0  ;;  %v2286_v40 = vpop.f32.mrb[56].mxu1 }
 0x857   :  { %v2933_v43 = vadd.f32 %v3101_v42, %v2246_v39  ;;  %v2901_v45 = vpop.f32.mrb[57].mxu0  ;;  %v2909_v0 = vpop.f32.mrb[57].mxu1  ;;  %v2934_v52 = vadd.f32 %v3102_v51, %v2286_v40 }
 0x858   :  { %v2249_v46 = vpop.f32.mrb[58].mxu0  ;;  %v2289_v47 = vpop.f32.mrb[58].mxu1 }
 0x859   :  { %v2459_v48 = vmul.f32 -1.442695, %v2933_v43  ;;  %v2902_v49 = vpop.f32.mrb[59].mxu0  ;;  %v2910_v50 = vpop.f32.mrb[59].mxu1  ;;  %v2460_v53 = vmul.f32 -1.442695, %v2934_v52 }
 0x85b   :  { %3083 = vpow2.f32 %v2459_v48 }
 0x85c   :  { %3085 = vpow2.f32 %v2460_v53 }
 0x85e   :  { %v2340_v12 = vpop.f32.mrb[60].mxu1 }
 0x85f   :  { %v2917_v54 = vpop.f32.mrb[61].mxu1  ;;  %v2341_v61 = vadd.f32 %v3103_v60, %v2340_v12 }
 0x860   :  { %v2343_v55 = vpop.f32.mrb[62].mxu1 }
 0x861   :  { %v2918_v56 = vpop.f32.mrb[63].mxu1 }
 0x865   :  { %v3084_v57 = vpop.eup %3083 }
 0x866   :  { %v2296_v13 = vadd.f32 1.0, %v3084_v57  ;;  %v3086_v58 = vpop.eup %3085 }
 0x867   :  { %v2303_v59 = vadd.f32 1.0, %v3086_v58 }
 0x868   :  { %3087 = vrcp.f32 %v2296_v13 }
 0x869   :  { %3089 = vrcp.f32 %v2303_v59 }
 0x872   :  { %v3088_v62 = vpop.eup %3087 }
 0x873   :  { %v2346_v3 = vmul.f32 %v3088_v62, %v2341_v61  ;;  %v3090_v11 = vpop.eup %3089 }
 0x874   :  { %v2349_v14 = vsub.f32 1.0, %v3090_v11  ;;  %v2351_v15 = vmul.f32 %v3090_v11, %v2081_v41 }
 0x875   :  { %v2347_v9 = vadd.f32 %v2346_v3, %v2204_v2 }
 0x877   :  { %3091 = vtanh.f32 %v2347_v9 }
 0x881   :  { %v3092_v1 = vpop.eup %3091 }
 0x882   :  { %v2350_v16 = vmul.f32 %v3092_v1, %v2349_v14 }
 0x884   :  { %v2352_v17 = vadd.f32 %v2351_v15, %v2350_v16 }
 0x886   :  { %2353 = vst.msk [vmem:[#allocation2] sm:$0x3] %vm39_vm0, %v2352_v17  ;;  %v2354_v18 = vpack.c.bf16 %v2352_v17, %v2352_v17 }
 0x888   :  { %2462 = vst.msk [vmem:[%s3673_s5 + $0x7] sm:$0x1] %vm423_vm4, %v2354_v18 }
 0x889   :  { %2361 = vsyncpa [#allocation4], 1 }

</bundles_post_ra>
